<compile_context>
chip_gen: v7x
topology: tpu7x:2x2x1
jax: 0.10.0
libtpu: 0.0.40
codegen_flags: <defaults>
</compile_context>

<pallas_src>
import functools

import jax
import jax.numpy as jnp
from jax.experimental import pallas as pl
from jax.experimental.pallas import tpu as pltpu

BN_EPS = 1e-5                 # PyTorch BatchNorm default eps
KMAX = 7                      # all branch kernels zero-embedded to K=7
NUM_BRANCH = 3
KERNEL_SIZES = (3, 5, 7)
TILE_ROWS = 512               # target M-tile (review: 512-1024 rows)
VMEM_LIMIT = 32 * 1024 * 1024 # safe on v5e/v6e (128 MiB) and v7x (64 MiB)


# --------------------------------------------------------------------------
# Pallas kernels
# --------------------------------------------------------------------------
def conv_stats_kernel(x_ref, w_ref, bias_ref, y_ref, stats_ref):
    """Pass 1: conv-as-matmul (even/odd output positions) + sum/sumsq reduction.

    x_ref    : (2, Tm, K*Cin) bf16   even / odd im2col patches
    w_ref    : (K*Cin, Cout)  bf16   branch-fused weights
    bias_ref : (1, Cout)      f32
    y_ref    : (2, Tm, Cout)  f32    pre-BN conv output (per tile)
    stats_ref: (2, Cout)      f32    [sum; sumsq] accumulator (resident block)
    """
    @pl.when(pl.program_id(0) == 0)
    def _init():
        stats_ref[...] = jnp.zeros_like(stats_ref)

    w = w_ref[...]
    bias = bias_ref[...]
    y0 = jnp.dot(x_ref[0], w, preferred_element_type=jnp.float32) + bias
    y1 = jnp.dot(x_ref[1], w, preferred_element_type=jnp.float32) + bias
    y_ref[0, :, :] = y0
    y_ref[1, :, :] = y1

    s = jnp.sum(y0, axis=0, keepdims=True) + jnp.sum(y1, axis=0, keepdims=True)
    ss = (jnp.sum(y0 * y0, axis=0, keepdims=True) +
          jnp.sum(y1 * y1, axis=0, keepdims=True))
    stats_ref[...] += jnp.concatenate([s, ss], axis=0)


def bn_relu_pool_kernel(y_ref, stats_ref, g_ref, b_ref, o_ref, *, n_rows):
    """Pass 2: folded BatchNorm (batch stats) + ReLU + MaxPool1d(2).

    y_ref    : (2, Tm, C) f32  even/odd conv outputs
    stats_ref: (2, C)     f32  [sum; sumsq] over all 2*Mh rows
    g_ref/b_ref : (1, C)  f32  BN affine (tiled across branches)
    o_ref    : (Tm, C)    bf16 pooled activation
    """
    inv_n = 1.0 / n_rows
    mean = stats_ref[0:1, :] * inv_n
    var = jnp.maximum(stats_ref[1:2, :] * inv_n - mean * mean, 0.0)
    scale = jax.lax.rsqrt(var + BN_EPS) * g_ref[...]
    shift = b_ref[...] - mean * scale
    h0 = jnp.maximum(y_ref[0] * scale + shift, 0.0)
    h1 = jnp.maximum(y_ref[1] * scale + shift, 0.0)
    o_ref[...] = jnp.maximum(h0, h1).astype(o_ref.dtype)   # MaxPool1d(2)


def conv_bn_relu_kernel(x_ref, w_ref, bias_ref, g_ref, b_ref, o_ref):
    """conv5 (valid) + BatchNorm(batch stats) + ReLU — rows = B only, single block.

    x_ref : (M, K5*3*f4) bf16, w_ref : (K5*3*f4, 3*f4) bf16, o_ref : (M, 3*f4) f32
    """
    y = jnp.dot(x_ref[...], w_ref[...],
                preferred_element_type=jnp.float32) + bias_ref[...]
    mean = jnp.mean(y, axis=0, keepdims=True)
    var = jnp.maximum(jnp.mean(y * y, axis=0, keepdims=True) - mean * mean, 0.0)
    scale = jax.lax.rsqrt(var + BN_EPS) * g_ref[...]
    shift = b_ref[...] - mean * scale
    o_ref[...] = jnp.maximum(y * scale + shift, 0.0)


def gaussian_head_kernel(x_ref, w_ref, bias_ref, eps_ref,
                         z_ref, mu_ref, lv_ref, *, latent_dim):
    """Fused GaussianSample: one (D, 2*latent) matmul, softplus, reparametrize."""
    lin = jnp.dot(x_ref[...], w_ref[...],
                  preferred_element_type=jnp.float32) + bias_ref[...]
    mu = lin[:, :latent_dim]
    lv_lin = lin[:, latent_dim:]
    # numerically stable softplus (matches F.softplus up to its threshold detail)
    log_var = jnp.maximum(lv_lin, 0.0) + jnp.log1p(jnp.exp(-jnp.abs(lv_lin)))
    z_ref[...] = mu + jnp.exp(0.5 * log_var) * eps_ref[...]
    mu_ref[...] = mu
    lv_ref[...] = log_var


# --------------------------------------------------------------------------
# JAX glue: im2col, tiling helpers, layer wrappers
# --------------------------------------------------------------------------
def im2col_1d(x, K, pad):
    """x: (B, L, C) -> (B, L_out, K*C), patch flatten order (k, c)."""
    B, L, C = x.shape
    xp = jnp.pad(x, ((0, 0), (pad, pad), (0, 0)))
    L_out = L + 2 * pad - K + 1
    cols = jnp.stack([xp[:, k:k + L_out, :] for k in range(K)], axis=2)
    return cols.reshape(B, L_out, K * C)


def _pick_tile(m, target=TILE_ROWS):
    """Largest divisor of m that is a multiple of 8 and <= target (else m)."""
    if m <= target:
        return m
    t = (target // 8) * 8
    while t >= 8:
        if m % t == 0:
            return t
        t -= 8
    return m


def conv_pool_layer(h, W, bias, gamma, beta):
    """maxpool2(relu(bn(conv_same_K7(h)))) for all 3 branches fused into one matmul.

    h: (B, L, Cin_total) bf16 -> (B, L//2, Cout_total) bf16.
    """
    B, L, Cin = h.shape
    KC, Cout = W.shape
    patches = im2col_1d(h, KMAX, KMAX // 2)            # (B, L, 7*Cin) bf16
    Lh = L // 2
    Mh = B * Lh
    even = patches[:, 0::2, :].reshape(Mh, KC)
    odd = patches[:, 1::2, :].reshape(Mh, KC)
    xp = jnp.stack([even, odd], axis=0)                # (2, Mh, 7*Cin)

    Tm = _pick_tile(Mh)
    n_tiles = Mh // Tm
    flops = 2 * (2 * Mh) * KC * Cout
    bytes_accessed = (xp.size * 2 + W.size * 2 + bias.size * 4 +
                      2 * Mh * Cout * 4 + 2 * Cout * 4)

    # -- pass 1: conv + global sum/sumsq (reduction over M tiles) ------------
    y, stats = pl.pallas_call(
        conv_stats_kernel,
        grid=(n_tiles,),
        in_specs=[pl.BlockSpec((2, Tm, KC), lambda t: (0, t, 0)),
                  pl.BlockSpec((KC, Cout), lambda t: (0, 0)),
                  pl.BlockSpec((1, Cout), lambda t: (0, 0))],
        out_specs=(pl.BlockSpec((2, Tm, Cout), lambda t: (0, t, 0)),
                   pl.BlockSpec((2, Cout), lambda t: (0, 0))),
        out_shape=(jax.ShapeDtypeStruct((2, Mh, Cout), jnp.float32),
                   jax.ShapeDtypeStruct((2, Cout), jnp.float32)),
        compiler_params=pltpu.CompilerParams(
            dimension_semantics=("arbitrary",),
            vmem_limit_bytes=VMEM_LIMIT),
        cost_estimate=pl.CostEstimate(flops=int(flops), transcendentals=0,
                                      bytes_accessed=int(bytes_accessed)),
    )(xp, W, bias)

    # -- pass 2: BN (folded scale/shift) + ReLU + MaxPool(2) ------------------
    pooled = pl.pallas_call(
        functools.partial(bn_relu_pool_kernel, n_rows=float(2 * Mh)),
        grid=(n_tiles,),
        in_specs=[pl.BlockSpec((2, Tm, Cout), lambda t: (0, t, 0)),
                  pl.BlockSpec((2, Cout), lambda t: (0, 0)),
                  pl.BlockSpec((1, Cout), lambda t: (0, 0)),
                  pl.BlockSpec((1, Cout), lambda t: (0, 0))],
        out_specs=pl.BlockSpec((Tm, Cout), lambda t: (t, 0)),
        out_shape=jax.ShapeDtypeStruct((Mh, Cout), jnp.bfloat16),
        compiler_params=pltpu.CompilerParams(
            dimension_semantics=("parallel",),
            vmem_limit_bytes=VMEM_LIMIT),
    )(y, stats, gamma, beta)
    return pooled.reshape(B, Lh, Cout)


def conv5_bn_relu(h, W5, bias5, g5, b5):
    """Shared conv5 (valid) + bn5 + relu for all branches (block-diag weights)."""
    B, L, C = h.shape
    KC, Cout = W5.shape
    K5 = KC // C
    Lo = L - K5 + 1                                     # == 1 for this model
    patches = im2col_1d(h, K5, 0).reshape(B * Lo, KC)
    vmem = pl.BlockSpec(memory_space=pltpu.MemorySpace.VMEM)
    return pl.pallas_call(
        conv_bn_relu_kernel,
        out_shape=jax.ShapeDtypeStruct((B * Lo, Cout), jnp.float32),
        in_specs=[vmem] * 5,
        out_specs=vmem,
        compiler_params=pltpu.CompilerParams(vmem_limit_bytes=VMEM_LIMIT),
    )(patches, W5, bias5, g5, b5)


def gaussian_head(feat, Whead, bhead, eps, latent_dim):
    B = feat.shape[0]
    vmem = pl.BlockSpec(memory_space=pltpu.MemorySpace.VMEM)
    return pl.pallas_call(
        functools.partial(gaussian_head_kernel, latent_dim=latent_dim),
        out_shape=(jax.ShapeDtypeStruct((B, latent_dim), jnp.float32),) * 3,
        in_specs=[vmem] * 4,
        out_specs=(vmem,) * 3,
        compiler_params=pltpu.CompilerParams(vmem_limit_bytes=VMEM_LIMIT),
    )(feat.astype(jnp.bfloat16), Whead, bhead, eps)


# --------------------------------------------------------------------------
# Parameters: per-branch "PyTorch-like" raw params + branch-fused forms
# --------------------------------------------------------------------------
def init_raw_params(key, num_param, window_size, latent_dim,
                    f1=8, f2=16, f3=32, f4=64):
    assert window_size % 16 == 0, "window_size must be divisible by 16"
    chans = [(num_param, f1), (f1, f2), (f2, f3), (f3, f4)]
    keys = iter(jax.random.split(key, 64))

    def uinit(k, fan_in, shape):
        b = 1.0 / (fan_in ** 0.5)
        return jax.random.uniform(k, shape, jnp.float32, -b, b)

    raw = {"conv": [], "conv_b": [], "bn_g": [], "bn_b": []}
    for cin, cout in chans:
        ws, bs = [], []
        for K in KERNEL_SIZES:
            ws.append(uinit(next(keys), cin * K, (K, cin, cout)))  # (K, Cin, Cout)
            bs.append(uinit(next(keys), cin * K, (cout,)))
        raw["conv"].append(ws)
        raw["conv_b"].append(bs)
        raw["bn_g"].append(jnp.ones((cout,), jnp.float32))
        raw["bn_b"].append(jnp.zeros((cout,), jnp.float32))

    K5 = window_size // 16
    raw["w5"] = uinit(next(keys), f4 * K5, (K5, f4, f4))
    raw["b5"] = uinit(next(keys), f4 * K5, (f4,))
    raw["bn5_g"] = jnp.ones((f4,), jnp.float32)
    raw["bn5_b"] = jnp.zeros((f4,), jnp.float32)

    D = NUM_BRANCH * f4
    raw["wmu"] = uinit(next(keys), D, (D, latent_dim))
    raw["bmu"] = uinit(next(keys), D, (latent_dim,))
    raw["wlv"] = uinit(next(keys), D, (D, latent_dim))
    raw["blv"] = uinit(next(keys), D, (latent_dim,))
    return raw


def _embed_k(w, kmax=KMAX):
    """Zero-embed a (K, Cin, Cout) 'same'-padded kernel into K=kmax (equivalent conv)."""
    K = w.shape[0]
    off = (kmax - K) // 2
    return jnp.zeros((kmax,) + w.shape[1:], w.dtype).at[off:off + K].set(w)


def _block_diag(ws, kmax=KMAX):
    """Branch-block-diagonal weight: rows (k, branch, cin) -> cols (branch, cout)."""
    nb = len(ws)
    cin, cout = ws[0].shape[1], ws[0].shape[2]
    W = jnp.zeros((kmax, nb, cin, nb, cout), jnp.float32)
    for b, w in enumerate(ws):
        W = W.at[:, b, :, b, :].set(_embed_k(w, kmax))
    return W.reshape(kmax * nb * cin, nb * cout)


def build_fused_params(raw):
    fp = {}
    # layer 1: branches share the raw input -> concatenate along Cout
    w1 = jnp.concatenate([_embed_k(w) for w in raw["conv"][0]], axis=-1)
    cin = w1.shape[1]
    fp["W1"] = w1.reshape(KMAX * cin, -1).astype(jnp.bfloat16)
    fp["bias1"] = jnp.concatenate(raw["conv_b"][0])[None, :]
    fp["g1"] = jnp.tile(raw["bn_g"][0], NUM_BRANCH)[None, :]
    fp["beta1"] = jnp.tile(raw["bn_b"][0], NUM_BRANCH)[None, :]
    # layers 2-4: branch-specific inputs -> block-diagonal weights
    for l in range(2, 5):
        fp[f"W{l}"] = _block_diag(raw["conv"][l - 1]).astype(jnp.bfloat16)
        fp[f"bias{l}"] = jnp.concatenate(raw["conv_b"][l - 1])[None, :]
        fp[f"g{l}"] = jnp.tile(raw["bn_g"][l - 1], NUM_BRANCH)[None, :]
        fp[f"beta{l}"] = jnp.tile(raw["bn_b"][l - 1], NUM_BRANCH)[None, :]
    # conv5: weights shared across branches -> replicate on the block diagonal
    fp["W5"] = _block_diag([raw["w5"]] * NUM_BRANCH,
                           kmax=raw["w5"].shape[0]).astype(jnp.bfloat16)
    fp["bias5"] = jnp.tile(raw["b5"], NUM_BRANCH)[None, :]
    fp["g5"] = jnp.tile(raw["bn5_g"], NUM_BRANCH)[None, :]
    fp["beta5"] = jnp.tile(raw["bn5_b"], NUM_BRANCH)[None, :]
    # GaussianSample head: fuse mu / log_var linears into one matmul
    fp["Whead"] = jnp.concatenate([raw["wmu"], raw["wlv"]], axis=1).astype(jnp.bfloat16)
    fp["bhead"] = jnp.concatenate([raw["bmu"], raw["blv"]])[None, :]
    return fp


# --------------------------------------------------------------------------
# Forward pass (Pallas) and pure-JAX reference (PyTorch semantics)
# --------------------------------------------------------------------------
def encoder_forward(fp, x_ncw, eps):
    """x_ncw: (B, num_param, window_size) NCW.  Returns (z, mu, log_var)."""
    x = jnp.transpose(x_ncw, (0, 2, 1)).astype(jnp.bfloat16)   # (B, L, C)
    h = x
    for l in range(1, 5):
        h = conv_pool_layer(h, fp[f"W{l}"], fp[f"bias{l}"],
                            fp[f"g{l}"], fp[f"beta{l}"])
    feat = conv5_bn_relu(h, fp["W5"], fp["bias5"], fp["g5"], fp["beta5"])
    latent_dim = eps.shape[1]
    return gaussian_head(feat, fp["Whead"], fp["bhead"], eps, latent_dim)


def reference_forward(raw, x_ncw, eps):
    """Pure-JAX f32 reference mirroring the PyTorch Encoder layer by layer."""
    x = jnp.transpose(x_ncw, (0, 2, 1)).astype(jnp.float32)

    def conv_same(h, w, b):
        K, cin, cout = w.shape
        p = im2col_1d(h, K, (K - 1) // 2)
        return p @ w.reshape(K * cin, cout) + b

    def bn(y, g, be):
        mean = jnp.mean(y, axis=(0, 1), keepdims=True)
        var = jnp.mean((y - mean) ** 2, axis=(0, 1), keepdims=True)
        return (y - mean) * jax.lax.rsqrt(var + BN_EPS) * g + be

    def pool(y):
        B, L, C = y.shape
        return jnp.max(y.reshape(B, L // 2, 2, C), axis=2)

    feats = []
    for b in range(NUM_BRANCH):
        h = x
        for l in range(4):
            h = pool(jax.nn.relu(bn(conv_same(h, raw["conv"][l][b],
                                              raw["conv_b"][l][b]),
                                    raw["bn_g"][l], raw["bn_b"][l])))
        K5, f4 = raw["w5"].shape[0], raw["w5"].shape[1]
        p = im2col_1d(h, K5, 0)
        y = p @ raw["w5"].reshape(K5 * f4, -1) + raw["b5"]
        h = jax.nn.relu(bn(y, raw["bn5_g"], raw["bn5_b"]))
        feats.append(h.reshape(h.shape[0], -1))
    feat = jnp.concatenate(feats, axis=1)
    mu = feat @ raw["wmu"] + raw["bmu"]
    log_var = jax.nn.softplus(feat @ raw["wlv"] + raw["blv"])
    z = mu + jnp.exp(0.5 * log_var) * eps
    return z, mu, log_var


# --------------------------------------------------------------------------
if __name__ == "__main__":
    B, num_param, window_size, latent_dim = 4, 4, 16, 8

    key = jax.random.PRNGKey(0)
    k_param, k_x, k_eps = jax.random.split(key, 3)

    raw = init_raw_params(k_param, num_param, window_size, latent_dim)
    fused = build_fused_params(raw)
    x = jax.random.normal(k_x, (B, num_param, window_size), jnp.float32)  # NCW
    eps = jax.random.normal(k_eps, (B, latent_dim), jnp.float32)          # reparam noise

    fwd = jax.jit(encoder_forward)
    z, mu, log_var = fwd(fused, x, eps)
    jax.block_until_ready((z, mu, log_var))

    # correctness vs. a pure-JAX f32 reference (loose tolerance: bf16 matmuls)
    z_r, mu_r, lv_r = reference_forward(raw, x, eps)

    assert z.shape == (B, latent_dim)
    assert mu.shape == (B, latent_dim)
    assert log_var.shape == (B, latent_dim)
    assert bool(jnp.all(jnp.isfinite(z)))
    assert bool(jnp.all(log_var >= 0.0))              # softplus output
    assert bool(jnp.allclose(mu, mu_r, rtol=0.2, atol=0.2))
    assert bool(jnp.allclose(log_var, lv_r, rtol=0.2, atol=0.2))
    assert bool(jnp.allclose(z, z_r, rtol=0.25, atol=0.25))
    print("KERNEL_OK")
</pallas_src>

<mosaic_0001>
module attributes {stable_mosaic.version = 11 : i64} {
  func.func @conv_stats_kernel(%arg0: i32, %arg1: memref<2x32x28xbf16, #tpu.memory_space<vmem>>, %arg2: memref<28x24xbf16, #tpu.memory_space<vmem>>, %arg3: memref<1x24xf32, #tpu.memory_space<vmem>>, %arg4: memref<2x32x24xf32, #tpu.memory_space<vmem>>, %arg5: memref<2x24xf32, #tpu.memory_space<vmem>>) attributes {dimension_semantics = [#tpu.dimension_semantics<arbitrary>], iteration_bounds = array<i64: 1>, scalar_prefetch = 0 : i64, scratch_operands = 0 : i64, tpu.core_type = #tpu.core_type<tc>, window_params = [{transform_indices = @transform_0, window_bounds = array<i64: 2, 32, 28>}, {pipeline_mode = #tpu.pipeline_mode<synchronous>, transform_indices = @transform_1, window_bounds = array<i64: 28, 24>}, {pipeline_mode = #tpu.pipeline_mode<synchronous>, transform_indices = @transform_2, window_bounds = array<i64: 1, 24>}, {transform_indices = @transform_3, window_bounds = array<i64: 2, 32, 24>}, {pipeline_mode = #tpu.pipeline_mode<synchronous>, transform_indices = @transform_4, window_bounds = array<i64: 2, 24>}]} {
    %c0_i32 = arith.constant 0 : i32
    %0 = arith.cmpi eq, %arg0, %c0_i32 : i32
    %1 = arith.extui %0 : i1 to i32
    %c0_i32_0 = arith.constant 0 : i32
    %2 = arith.cmpi ne, %1, %c0_i32_0 : i32
    scf.if %2 {
      %cst_24 = arith.constant 0.000000e+00 : f32
      %37 = vector.broadcast %cst_24 : f32 to vector<2x24xf32>
      %c0_25 = arith.constant 0 : index
      %c0_26 = arith.constant 0 : index
      %38 = vector.load %arg5[%c0_25, %c0_26] : memref<2x24xf32, #tpu.memory_space<vmem>>, vector<2x24xf32>
      tpu.vector_store %arg5[%c0_25, %c0_26], %37 {strides = array<i32>} : memref<2x24xf32, #tpu.memory_space<vmem>>, vector<2x24xf32>,
    } else {
    }
    %c0 = arith.constant 0 : index
    %c0_1 = arith.constant 0 : index
    %3 = vector.load %arg2[%c0, %c0_1] : memref<28x24xbf16, #tpu.memory_space<vmem>>, vector<28x24xbf16>
    %c0_2 = arith.constant 0 : index
    %c0_3 = arith.constant 0 : index
    %4 = vector.load %arg3[%c0_2, %c0_3] : memref<1x24xf32, #tpu.memory_space<vmem>>, vector<1x24xf32>
    %c0_4 = arith.constant 0 : index
    %c0_5 = arith.constant 0 : index
    %c0_6 = arith.constant 0 : index
    %5 = vector.load %arg1[%c0_4, %c0_5, %c0_6] : memref<2x32x28xbf16, #tpu.memory_space<vmem>>, vector<1x32x28xbf16>
    %6 = vector.shape_cast %5 : vector<1x32x28xbf16> to vector<32x28xbf16>
    %cst = arith.constant dense<0.000000e+00> : vector<32x24xf32>
    %7 = tpu.matmul %6, %3, %cst {dimension_numbers = #tpu.dot_dimension_numbers<[1], [0], [0], [1], [0, 0, 1, 1], [], []>} : vector<32x28xbf16>, vector<28x24xbf16>, vector<32x24xf32> -> vector<32x24xf32>
    %8 = vector.broadcast %4 : vector<1x24xf32> to vector<32x24xf32>
    %9 = arith.addf %7, %8 : vector<32x24xf32>
    %c1 = arith.constant 1 : index
    %c0_7 = arith.constant 0 : index
    %c0_8 = arith.constant 0 : index
    %10 = vector.load %arg1[%c1, %c0_7, %c0_8] : memref<2x32x28xbf16, #tpu.memory_space<vmem>>, vector<1x32x28xbf16>
    %11 = vector.shape_cast %10 : vector<1x32x28xbf16> to vector<32x28xbf16>
    %cst_9 = arith.constant dense<0.000000e+00> : vector<32x24xf32>
    %12 = tpu.matmul %11, %3, %cst_9 {dimension_numbers = #tpu.dot_dimension_numbers<[1], [0], [0], [1], [0, 0, 1, 1], [], []>} : vector<32x28xbf16>, vector<28x24xbf16>, vector<32x24xf32> -> vector<32x24xf32>
    %13 = vector.broadcast %4 : vector<1x24xf32> to vector<32x24xf32>
    %14 = arith.addf %12, %13 : vector<32x24xf32>
    %c0_10 = arith.constant 0 : index
    %c0_11 = arith.constant 0 : index
    %c0_12 = arith.constant 0 : index
    %15 = vector.load %arg4[%c0_10, %c0_11, %c0_12] : memref<2x32x24xf32, #tpu.memory_space<vmem>>, vector<1x32x24xf32>
    %16 = vector.shape_cast %15 : vector<1x32x24xf32> to vector<32x24xf32>
    %17 = vector.shape_cast %9 : vector<32x24xf32> to vector<1x32x24xf32>
    tpu.vector_store %arg4[%c0_10, %c0_11, %c0_12], %17 {strides = array<i32>} : memref<2x32x24xf32, #tpu.memory_space<vmem>>, vector<1x32x24xf32>,
    %c1_13 = arith.constant 1 : index
    %c0_14 = arith.constant 0 : index
    %c0_15 = arith.constant 0 : index
    %18 = vector.load %arg4[%c1_13, %c0_14, %c0_15] : memref<2x32x24xf32, #tpu.memory_space<vmem>>, vector<1x32x24xf32>
    %19 = vector.shape_cast %18 : vector<1x32x24xf32> to vector<32x24xf32>
    %20 = vector.shape_cast %14 : vector<32x24xf32> to vector<1x32x24xf32>
    tpu.vector_store %arg4[%c1_13, %c0_14, %c0_15], %20 {strides = array<i32>} : memref<2x32x24xf32, #tpu.memory_space<vmem>>, vector<1x32x24xf32>,
    %cst_16 = arith.constant dense<0.000000e+00> : vector<24xf32>
    %21 = vector.multi_reduction <add>, %9, %cst_16 [0] : vector<32x24xf32> to vector<24xf32>
    %22 = vector.shape_cast %21 : vector<24xf32> to vector<1x24xf32>
    %cst_17 = arith.constant dense<0.000000e+00> : vector<24xf32>
    %23 = vector.multi_reduction <add>, %14, %cst_17 [0] : vector<32x24xf32> to vector<24xf32>
    %24 = vector.shape_cast %23 : vector<24xf32> to vector<1x24xf32>
    %25 = arith.addf %22, %24 : vector<1x24xf32>
    %26 = arith.mulf %9, %9 : vector<32x24xf32>
    %cst_18 = arith.constant dense<0.000000e+00> : vector<24xf32>
    %27 = vector.multi_reduction <add>, %26, %cst_18 [0] : vector<32x24xf32> to vector<24xf32>
    %28 = vector.shape_cast %27 : vector<24xf32> to vector<1x24xf32>
    %29 = arith.mulf %14, %14 : vector<32x24xf32>
    %cst_19 = arith.constant dense<0.000000e+00> : vector<24xf32>
    %30 = vector.multi_reduction <add>, %29, %cst_19 [0] : vector<32x24xf32> to vector<24xf32>
    %31 = vector.shape_cast %30 : vector<24xf32> to vector<1x24xf32>
    %32 = arith.addf %28, %31 : vector<1x24xf32>
    %c0_20 = arith.constant 0 : index
    %c0_21 = arith.constant 0 : index
    %33 = vector.load %arg5[%c0_20, %c0_21] : memref<2x24xf32, #tpu.memory_space<vmem>>, vector<2x24xf32>
    %34 = tpu.concatenate %25, %32 in 0 : vector<1x24xf32>, vector<1x24xf32> -> vector<2x24xf32>
    %35 = arith.addf %33, %34 : vector<2x24xf32>
    %c0_22 = arith.constant 0 : index
    %c0_23 = arith.constant 0 : index
    %36 = vector.load %arg5[%c0_22, %c0_23] : memref<2x24xf32, #tpu.memory_space<vmem>>, vector<2x24xf32>
    tpu.vector_store %arg5[%c0_22, %c0_23], %35 {strides = array<i32>} : memref<2x24xf32, #tpu.memory_space<vmem>>, vector<2x24xf32>,
    return
  }
  func.func @transform_0(%arg0: i32) -> (i32, i32, i32) {
    %c0_i32 = arith.constant 0 : i32
    %c0_i32_0 = arith.constant 0 : i32
    %c0_i32_1 = arith.constant 0 : i32
    return %c0_i32, %arg0, %c0_i32_0 : i32, i32, i32
  }
  func.func @transform_1(%arg0: i32) -> (i32, i32) {
    %c0_i32 = arith.constant 0 : i32
    %c0_i32_0 = arith.constant 0 : i32
    %c0_i32_1 = arith.constant 0 : i32
    return %c0_i32, %c0_i32_0 : i32, i32
  }
  func.func @transform_2(%arg0: i32) -> (i32, i32) {
    %c0_i32 = arith.constant 0 : i32
    %c0_i32_0 = arith.constant 0 : i32
    %c0_i32_1 = arith.constant 0 : i32
    return %c0_i32, %c0_i32_0 : i32, i32
  }
  func.func @transform_3(%arg0: i32) -> (i32, i32, i32) {
    %c0_i32 = arith.constant 0 : i32
    %c0_i32_0 = arith.constant 0 : i32
    %c0_i32_1 = arith.constant 0 : i32
    return %c0_i32, %arg0, %c0_i32_0 : i32, i32, i32
  }
  func.func @transform_4(%arg0: i32) -> (i32, i32) {
    %c0_i32 = arith.constant 0 : i32
    %c0_i32_0 = arith.constant 0 : i32
    %c0_i32_1 = arith.constant 0 : i32
    return %c0_i32, %c0_i32_0 : i32, i32
  }
}

module attributes {stable_mosaic.version = 11 : i64} {
  func.func @bn_relu_pool_kernel(%arg0: i32, %arg1: memref<2x32x24xf32, #tpu.memory_space<vmem>>, %arg2: memref<2x24xf32, #tpu.memory_space<vmem>>, %arg3: memref<1x24xf32, #tpu.memory_space<vmem>>, %arg4: memref<1x24xf32, #tpu.memory_space<vmem>>, %arg5: memref<32x24xbf16, #tpu.memory_space<vmem>>) attributes {dimension_semantics = [#tpu.dimension_semantics<parallel>], iteration_bounds = array<i64: 1>, scalar_prefetch = 0 : i64, scratch_operands = 0 : i64, tpu.core_type = #tpu.core_type<tc>, window_params = [{transform_indices = @transform_0, window_bounds = array<i64: 2, 32, 24>}, {pipeline_mode = #tpu.pipeline_mode<synchronous>, transform_indices = @transform_1, window_bounds = array<i64: 2, 24>}, {pipeline_mode = #tpu.pipeline_mode<synchronous>, transform_indices = @transform_2, window_bounds = array<i64: 1, 24>}, {pipeline_mode = #tpu.pipeline_mode<synchronous>, transform_indices = @transform_3, window_bounds = array<i64: 1, 24>}, {transform_indices = @transform_4, window_bounds = array<i64: 32, 24>}]} {
    %c0 = arith.constant 0 : index
    %c0_0 = arith.constant 0 : index
    %0 = vector.load %arg2[%c0, %c0_0] : memref<2x24xf32, #tpu.memory_space<vmem>>, vector<1x24xf32>
    %cst = arith.constant 1.562500e-02 : f32
    %1 = vector.broadcast %cst : f32 to vector<1x24xf32>
    %2 = arith.mulf %0, %1 : vector<1x24xf32>
    %c1 = arith.constant 1 : index
    %c0_1 = arith.constant 0 : index
    %3 = vector.load %arg2[%c1, %c0_1] : memref<2x24xf32, #tpu.memory_space<vmem>>, vector<1x24xf32>
    %cst_2 = arith.constant 1.562500e-02 : f32
    %4 = vector.broadcast %cst_2 : f32 to vector<1x24xf32>
    %5 = arith.mulf %3, %4 : vector<1x24xf32>
    %6 = arith.mulf %2, %2 : vector<1x24xf32>
    %7 = arith.subf %5, %6 : vector<1x24xf32>
    %cst_3 = arith.constant 0.000000e+00 : f32
    %8 = vector.broadcast %cst_3 : f32 to vector<1x24xf32>
    %9 = arith.maximumf %7, %8 : vector<1x24xf32>
    %cst_4 = arith.constant 9.99999974E-6 : f32
    %10 = vector.broadcast %cst_4 : f32 to vector<1x24xf32>
    %11 = arith.addf %9, %10 : vector<1x24xf32>
    %12 = math.rsqrt %11 : vector<1x24xf32>
    %c0_5 = arith.constant 0 : index
    %c0_6 = arith.constant 0 : index
    %13 = vector.load %arg3[%c0_5, %c0_6] : memref<1x24xf32, #tpu.memory_space<vmem>>, vector<1x24xf32>
    %14 = arith.mulf %12, %13 : vector<1x24xf32>
    %c0_7 = arith.constant 0 : index
    %c0_8 = arith.constant 0 : index
    %15 = vector.load %arg4[%c0_7, %c0_8] : memref<1x24xf32, #tpu.memory_space<vmem>>, vector<1x24xf32>
    %16 = arith.mulf %2, %14 : vector<1x24xf32>
    %17 = arith.subf %15, %16 : vector<1x24xf32>
    %c0_9 = arith.constant 0 : index
    %c0_10 = arith.constant 0 : index
    %c0_11 = arith.constant 0 : index
    %18 = vector.load %arg1[%c0_9, %c0_10, %c0_11] : memref<2x32x24xf32, #tpu.memory_space<vmem>>, vector<1x32x24xf32>
    %19 = vector.shape_cast %18 : vector<1x32x24xf32> to vector<32x24xf32>
    %20 = vector.broadcast %14 : vector<1x24xf32> to vector<32x24xf32>
    %21 = arith.mulf %19, %20 : vector<32x24xf32>
    %22 = vector.broadcast %17 : vector<1x24xf32> to vector<32x24xf32>
    %23 = arith.addf %21, %22 : vector<32x24xf32>
    %cst_12 = arith.constant 0.000000e+00 : f32
    %24 = vector.broadcast %cst_12 : f32 to vector<32x24xf32>
    %25 = arith.maximumf %23, %24 : vector<32x24xf32>
    %c1_13 = arith.constant 1 : index
    %c0_14 = arith.constant 0 : index
    %c0_15 = arith.constant 0 : index
    %26 = vector.load %arg1[%c1_13, %c0_14, %c0_15] : memref<2x32x24xf32, #tpu.memory_space<vmem>>, vector<1x32x24xf32>
    %27 = vector.shape_cast %26 : vector<1x32x24xf32> to vector<32x24xf32>
    %28 = vector.broadcast %14 : vector<1x24xf32> to vector<32x24xf32>
    %29 = arith.mulf %27, %28 : vector<32x24xf32>
    %30 = vector.broadcast %17 : vector<1x24xf32> to vector<32x24xf32>
    %31 = arith.addf %29, %30 : vector<32x24xf32>
    %cst_16 = arith.constant 0.000000e+00 : f32
    %32 = vector.broadcast %cst_16 : f32 to vector<32x24xf32>
    %33 = arith.maximumf %31, %32 : vector<32x24xf32>
    %34 = arith.maximumf %25, %33 : vector<32x24xf32>
    %35 = arith.truncf %34 : vector<32x24xf32> to vector<32x24xbf16>
    %c0_17 = arith.constant 0 : index
    %c0_18 = arith.constant 0 : index
    %36 = vector.load %arg5[%c0_17, %c0_18] : memref<32x24xbf16, #tpu.memory_space<vmem>>, vector<32x24xbf16>
    tpu.vector_store %arg5[%c0_17, %c0_18], %35 {strides = array<i32>} : memref<32x24xbf16, #tpu.memory_space<vmem>>, vector<32x24xbf16>,
    return
  }
  func.func @transform_0(%arg0: i32) -> (i32, i32, i32) {
    %c0_i32 = arith.constant 0 : i32
    %c0_i32_0 = arith.constant 0 : i32
    %c0_i32_1 = arith.constant 0 : i32
    return %c0_i32, %arg0, %c0_i32_0 : i32, i32, i32
  }
  func.func @transform_1(%arg0: i32) -> (i32, i32) {
    %c0_i32 = arith.constant 0 : i32
    %c0_i32_0 = arith.constant 0 : i32
    %c0_i32_1 = arith.constant 0 : i32
    return %c0_i32, %c0_i32_0 : i32, i32
  }
  func.func @transform_2(%arg0: i32) -> (i32, i32) {
    %c0_i32 = arith.constant 0 : i32
    %c0_i32_0 = arith.constant 0 : i32
    %c0_i32_1 = arith.constant 0 : i32
    return %c0_i32, %c0_i32_0 : i32, i32
  }
  func.func @transform_3(%arg0: i32) -> (i32, i32) {
    %c0_i32 = arith.constant 0 : i32
    %c0_i32_0 = arith.constant 0 : i32
    %c0_i32_1 = arith.constant 0 : i32
    return %c0_i32, %c0_i32_0 : i32, i32
  }
  func.func @transform_4(%arg0: i32) -> (i32, i32) {
    %c0_i32 = arith.constant 0 : i32
    %c0_i32_0 = arith.constant 0 : i32
    return %arg0, %c0_i32 : i32, i32
  }
}

module attributes {stable_mosaic.version = 11 : i64} {
  func.func @conv_stats_kernel(%arg0: i32, %arg1: memref<2x16x168xbf16, #tpu.memory_space<vmem>>, %arg2: memref<168x48xbf16, #tpu.memory_space<vmem>>, %arg3: memref<1x48xf32, #tpu.memory_space<vmem>>, %arg4: memref<2x16x48xf32, #tpu.memory_space<vmem>>, %arg5: memref<2x48xf32, #tpu.memory_space<vmem>>) attributes {dimension_semantics = [#tpu.dimension_semantics<arbitrary>], iteration_bounds = array<i64: 1>, scalar_prefetch = 0 : i64, scratch_operands = 0 : i64, tpu.core_type = #tpu.core_type<tc>, window_params = [{transform_indices = @transform_0, window_bounds = array<i64: 2, 16, 168>}, {pipeline_mode = #tpu.pipeline_mode<synchronous>, transform_indices = @transform_1, window_bounds = array<i64: 168, 48>}, {pipeline_mode = #tpu.pipeline_mode<synchronous>, transform_indices = @transform_2, window_bounds = array<i64: 1, 48>}, {transform_indices = @transform_3, window_bounds = array<i64: 2, 16, 48>}, {pipeline_mode = #tpu.pipeline_mode<synchronous>, transform_indices = @transform_4, window_bounds = array<i64: 2, 48>}]} {
    %c0_i32 = arith.constant 0 : i32
    %0 = arith.cmpi eq, %arg0, %c0_i32 : i32
    %1 = arith.extui %0 : i1 to i32
    %c0_i32_0 = arith.constant 0 : i32
    %2 = arith.cmpi ne, %1, %c0_i32_0 : i32
    scf.if %2 {
      %cst_24 = arith.constant 0.000000e+00 : f32
      %37 = vector.broadcast %cst_24 : f32 to vector<2x48xf32>
      %c0_25 = arith.constant 0 : index
      %c0_26 = arith.constant 0 : index
      %38 = vector.load %arg5[%c0_25, %c0_26] : memref<2x48xf32, #tpu.memory_space<vmem>>, vector<2x48xf32>
      tpu.vector_store %arg5[%c0_25, %c0_26], %37 {strides = array<i32>} : memref<2x48xf32, #tpu.memory_space<vmem>>, vector<2x48xf32>,
    } else {
    }
    %c0 = arith.constant 0 : index
    %c0_1 = arith.constant 0 : index
    %3 = vector.load %arg2[%c0, %c0_1] : memref<168x48xbf16, #tpu.memory_space<vmem>>, vector<168x48xbf16>
    %c0_2 = arith.constant 0 : index
    %c0_3 = arith.constant 0 : index
    %4 = vector.load %arg3[%c0_2, %c0_3] : memref<1x48xf32, #tpu.memory_space<vmem>>, vector<1x48xf32>
    %c0_4 = arith.constant 0 : index
    %c0_5 = arith.constant 0 : index
    %c0_6 = arith.constant 0 : index
    %5 = vector.load %arg1[%c0_4, %c0_5, %c0_6] : memref<2x16x168xbf16, #tpu.memory_space<vmem>>, vector<1x16x168xbf16>
    %6 = vector.shape_cast %5 : vector<1x16x168xbf16> to vector<16x168xbf16>
    %cst = arith.constant dense<0.000000e+00> : vector<16x48xf32>
    %7 = tpu.matmul %6, %3, %cst {dimension_numbers = #tpu.dot_dimension_numbers<[1], [0], [0], [1], [0, 0, 1, 1], [], []>} : vector<16x168xbf16>, vector<168x48xbf16>, vector<16x48xf32> -> vector<16x48xf32>
    %8 = vector.broadcast %4 : vector<1x48xf32> to vector<16x48xf32>
    %9 = arith.addf %7, %8 : vector<16x48xf32>
    %c1 = arith.constant 1 : index
    %c0_7 = arith.constant 0 : index
    %c0_8 = arith.constant 0 : index
    %10 = vector.load %arg1[%c1, %c0_7, %c0_8] : memref<2x16x168xbf16, #tpu.memory_space<vmem>>, vector<1x16x168xbf16>
    %11 = vector.shape_cast %10 : vector<1x16x168xbf16> to vector<16x168xbf16>
    %cst_9 = arith.constant dense<0.000000e+00> : vector<16x48xf32>
    %12 = tpu.matmul %11, %3, %cst_9 {dimension_numbers = #tpu.dot_dimension_numbers<[1], [0], [0], [1], [0, 0, 1, 1], [], []>} : vector<16x168xbf16>, vector<168x48xbf16>, vector<16x48xf32> -> vector<16x48xf32>
    %13 = vector.broadcast %4 : vector<1x48xf32> to vector<16x48xf32>
    %14 = arith.addf %12, %13 : vector<16x48xf32>
    %c0_10 = arith.constant 0 : index
    %c0_11 = arith.constant 0 : index
    %c0_12 = arith.constant 0 : index
    %15 = vector.load %arg4[%c0_10, %c0_11, %c0_12] : memref<2x16x48xf32, #tpu.memory_space<vmem>>, vector<1x16x48xf32>
    %16 = vector.shape_cast %15 : vector<1x16x48xf32> to vector<16x48xf32>
    %17 = vector.shape_cast %9 : vector<16x48xf32> to vector<1x16x48xf32>
    tpu.vector_store %arg4[%c0_10, %c0_11, %c0_12], %17 {strides = array<i32>} : memref<2x16x48xf32, #tpu.memory_space<vmem>>, vector<1x16x48xf32>,
    %c1_13 = arith.constant 1 : index
    %c0_14 = arith.constant 0 : index
    %c0_15 = arith.constant 0 : index
    %18 = vector.load %arg4[%c1_13, %c0_14, %c0_15] : memref<2x16x48xf32, #tpu.memory_space<vmem>>, vector<1x16x48xf32>
    %19 = vector.shape_cast %18 : vector<1x16x48xf32> to vector<16x48xf32>
    %20 = vector.shape_cast %14 : vector<16x48xf32> to vector<1x16x48xf32>
    tpu.vector_store %arg4[%c1_13, %c0_14, %c0_15], %20 {strides = array<i32>} : memref<2x16x48xf32, #tpu.memory_space<vmem>>, vector<1x16x48xf32>,
    %cst_16 = arith.constant dense<0.000000e+00> : vector<48xf32>
    %21 = vector.multi_reduction <add>, %9, %cst_16 [0] : vector<16x48xf32> to vector<48xf32>
    %22 = vector.shape_cast %21 : vector<48xf32> to vector<1x48xf32>
    %cst_17 = arith.constant dense<0.000000e+00> : vector<48xf32>
    %23 = vector.multi_reduction <add>, %14, %cst_17 [0] : vector<16x48xf32> to vector<48xf32>
    %24 = vector.shape_cast %23 : vector<48xf32> to vector<1x48xf32>
    %25 = arith.addf %22, %24 : vector<1x48xf32>
    %26 = arith.mulf %9, %9 : vector<16x48xf32>
    %cst_18 = arith.constant dense<0.000000e+00> : vector<48xf32>
    %27 = vector.multi_reduction <add>, %26, %cst_18 [0] : vector<16x48xf32> to vector<48xf32>
    %28 = vector.shape_cast %27 : vector<48xf32> to vector<1x48xf32>
    %29 = arith.mulf %14, %14 : vector<16x48xf32>
    %cst_19 = arith.constant dense<0.000000e+00> : vector<48xf32>
    %30 = vector.multi_reduction <add>, %29, %cst_19 [0] : vector<16x48xf32> to vector<48xf32>
    %31 = vector.shape_cast %30 : vector<48xf32> to vector<1x48xf32>
    %32 = arith.addf %28, %31 : vector<1x48xf32>
    %c0_20 = arith.constant 0 : index
    %c0_21 = arith.constant 0 : index
    %33 = vector.load %arg5[%c0_20, %c0_21] : memref<2x48xf32, #tpu.memory_space<vmem>>, vector<2x48xf32>
    %34 = tpu.concatenate %25, %32 in 0 : vector<1x48xf32>, vector<1x48xf32> -> vector<2x48xf32>
    %35 = arith.addf %33, %34 : vector<2x48xf32>
    %c0_22 = arith.constant 0 : index
    %c0_23 = arith.constant 0 : index
    %36 = vector.load %arg5[%c0_22, %c0_23] : memref<2x48xf32, #tpu.memory_space<vmem>>, vector<2x48xf32>
    tpu.vector_store %arg5[%c0_22, %c0_23], %35 {strides = array<i32>} : memref<2x48xf32, #tpu.memory_space<vmem>>, vector<2x48xf32>,
    return
  }
  func.func @transform_0(%arg0: i32) -> (i32, i32, i32) {
    %c0_i32 = arith.constant 0 : i32
    %c0_i32_0 = arith.constant 0 : i32
    %c0_i32_1 = arith.constant 0 : i32
    return %c0_i32, %arg0, %c0_i32_0 : i32, i32, i32
  }
  func.func @transform_1(%arg0: i32) -> (i32, i32) {
    %c0_i32 = arith.constant 0 : i32
    %c0_i32_0 = arith.constant 0 : i32
    %c0_i32_1 = arith.constant 0 : i32
    return %c0_i32, %c0_i32_0 : i32, i32
  }
  func.func @transform_2(%arg0: i32) -> (i32, i32) {
    %c0_i32 = arith.constant 0 : i32
    %c0_i32_0 = arith.constant 0 : i32
    %c0_i32_1 = arith.constant 0 : i32
    return %c0_i32, %c0_i32_0 : i32, i32
  }
  func.func @transform_3(%arg0: i32) -> (i32, i32, i32) {
    %c0_i32 = arith.constant 0 : i32
    %c0_i32_0 = arith.constant 0 : i32
    %c0_i32_1 = arith.constant 0 : i32
    return %c0_i32, %arg0, %c0_i32_0 : i32, i32, i32
  }
  func.func @transform_4(%arg0: i32) -> (i32, i32) {
    %c0_i32 = arith.constant 0 : i32
    %c0_i32_0 = arith.constant 0 : i32
    %c0_i32_1 = arith.constant 0 : i32
    return %c0_i32, %c0_i32_0 : i32, i32
  }
}

module attributes {stable_mosaic.version = 11 : i64} {
  func.func @bn_relu_pool_kernel(%arg0: i32, %arg1: memref<2x16x48xf32, #tpu.memory_space<vmem>>, %arg2: memref<2x48xf32, #tpu.memory_space<vmem>>, %arg3: memref<1x48xf32, #tpu.memory_space<vmem>>, %arg4: memref<1x48xf32, #tpu.memory_space<vmem>>, %arg5: memref<16x48xbf16, #tpu.memory_space<vmem>>) attributes {dimension_semantics = [#tpu.dimension_semantics<parallel>], iteration_bounds = array<i64: 1>, scalar_prefetch = 0 : i64, scratch_operands = 0 : i64, tpu.core_type = #tpu.core_type<tc>, window_params = [{transform_indices = @transform_0, window_bounds = array<i64: 2, 16, 48>}, {pipeline_mode = #tpu.pipeline_mode<synchronous>, transform_indices = @transform_1, window_bounds = array<i64: 2, 48>}, {pipeline_mode = #tpu.pipeline_mode<synchronous>, transform_indices = @transform_2, window_bounds = array<i64: 1, 48>}, {pipeline_mode = #tpu.pipeline_mode<synchronous>, transform_indices = @transform_3, window_bounds = array<i64: 1, 48>}, {transform_indices = @transform_4, window_bounds = array<i64: 16, 48>}]} {
    %c0 = arith.constant 0 : index
    %c0_0 = arith.constant 0 : index
    %0 = vector.load %arg2[%c0, %c0_0] : memref<2x48xf32, #tpu.memory_space<vmem>>, vector<1x48xf32>
    %cst = arith.constant 3.125000e-02 : f32
    %1 = vector.broadcast %cst : f32 to vector<1x48xf32>
    %2 = arith.mulf %0, %1 : vector<1x48xf32>
    %c1 = arith.constant 1 : index
    %c0_1 = arith.constant 0 : index
    %3 = vector.load %arg2[%c1, %c0_1] : memref<2x48xf32, #tpu.memory_space<vmem>>, vector<1x48xf32>
    %cst_2 = arith.constant 3.125000e-02 : f32
    %4 = vector.broadcast %cst_2 : f32 to vector<1x48xf32>
    %5 = arith.mulf %3, %4 : vector<1x48xf32>
    %6 = arith.mulf %2, %2 : vector<1x48xf32>
    %7 = arith.subf %5, %6 : vector<1x48xf32>
    %cst_3 = arith.constant 0.000000e+00 : f32
    %8 = vector.broadcast %cst_3 : f32 to vector<1x48xf32>
    %9 = arith.maximumf %7, %8 : vector<1x48xf32>
    %cst_4 = arith.constant 9.99999974E-6 : f32
    %10 = vector.broadcast %cst_4 : f32 to vector<1x48xf32>
    %11 = arith.addf %9, %10 : vector<1x48xf32>
    %12 = math.rsqrt %11 : vector<1x48xf32>
    %c0_5 = arith.constant 0 : index
    %c0_6 = arith.constant 0 : index
    %13 = vector.load %arg3[%c0_5, %c0_6] : memref<1x48xf32, #tpu.memory_space<vmem>>, vector<1x48xf32>
    %14 = arith.mulf %12, %13 : vector<1x48xf32>
    %c0_7 = arith.constant 0 : index
    %c0_8 = arith.constant 0 : index
    %15 = vector.load %arg4[%c0_7, %c0_8] : memref<1x48xf32, #tpu.memory_space<vmem>>, vector<1x48xf32>
    %16 = arith.mulf %2, %14 : vector<1x48xf32>
    %17 = arith.subf %15, %16 : vector<1x48xf32>
    %c0_9 = arith.constant 0 : index
    %c0_10 = arith.constant 0 : index
    %c0_11 = arith.constant 0 : index
    %18 = vector.load %arg1[%c0_9, %c0_10, %c0_11] : memref<2x16x48xf32, #tpu.memory_space<vmem>>, vector<1x16x48xf32>
    %19 = vector.shape_cast %18 : vector<1x16x48xf32> to vector<16x48xf32>
    %20 = vector.broadcast %14 : vector<1x48xf32> to vector<16x48xf32>
    %21 = arith.mulf %19, %20 : vector<16x48xf32>
    %22 = vector.broadcast %17 : vector<1x48xf32> to vector<16x48xf32>
    %23 = arith.addf %21, %22 : vector<16x48xf32>
    %cst_12 = arith.constant 0.000000e+00 : f32
    %24 = vector.broadcast %cst_12 : f32 to vector<16x48xf32>
    %25 = arith.maximumf %23, %24 : vector<16x48xf32>
    %c1_13 = arith.constant 1 : index
    %c0_14 = arith.constant 0 : index
    %c0_15 = arith.constant 0 : index
    %26 = vector.load %arg1[%c1_13, %c0_14, %c0_15] : memref<2x16x48xf32, #tpu.memory_space<vmem>>, vector<1x16x48xf32>
    %27 = vector.shape_cast %26 : vector<1x16x48xf32> to vector<16x48xf32>
    %28 = vector.broadcast %14 : vector<1x48xf32> to vector<16x48xf32>
    %29 = arith.mulf %27, %28 : vector<16x48xf32>
    %30 = vector.broadcast %17 : vector<1x48xf32> to vector<16x48xf32>
    %31 = arith.addf %29, %30 : vector<16x48xf32>
    %cst_16 = arith.constant 0.000000e+00 : f32
    %32 = vector.broadcast %cst_16 : f32 to vector<16x48xf32>
    %33 = arith.maximumf %31, %32 : vector<16x48xf32>
    %34 = arith.maximumf %25, %33 : vector<16x48xf32>
    %35 = arith.truncf %34 : vector<16x48xf32> to vector<16x48xbf16>
    %c0_17 = arith.constant 0 : index
    %c0_18 = arith.constant 0 : index
    %36 = vector.load %arg5[%c0_17, %c0_18] : memref<16x48xbf16, #tpu.memory_space<vmem>>, vector<16x48xbf16>
    tpu.vector_store %arg5[%c0_17, %c0_18], %35 {strides = array<i32>} : memref<16x48xbf16, #tpu.memory_space<vmem>>, vector<16x48xbf16>,
    return
  }
  func.func @transform_0(%arg0: i32) -> (i32, i32, i32) {
    %c0_i32 = arith.constant 0 : i32
    %c0_i32_0 = arith.constant 0 : i32
    %c0_i32_1 = arith.constant 0 : i32
    return %c0_i32, %arg0, %c0_i32_0 : i32, i32, i32
  }
  func.func @transform_1(%arg0: i32) -> (i32, i32) {
    %c0_i32 = arith.constant 0 : i32
    %c0_i32_0 = arith.constant 0 : i32
    %c0_i32_1 = arith.constant 0 : i32
    return %c0_i32, %c0_i32_0 : i32, i32
  }
  func.func @transform_2(%arg0: i32) -> (i32, i32) {
    %c0_i32 = arith.constant 0 : i32
    %c0_i32_0 = arith.constant 0 : i32
    %c0_i32_1 = arith.constant 0 : i32
    return %c0_i32, %c0_i32_0 : i32, i32
  }
  func.func @transform_3(%arg0: i32) -> (i32, i32) {
    %c0_i32 = arith.constant 0 : i32
    %c0_i32_0 = arith.constant 0 : i32
    %c0_i32_1 = arith.constant 0 : i32
    return %c0_i32, %c0_i32_0 : i32, i32
  }
  func.func @transform_4(%arg0: i32) -> (i32, i32) {
    %c0_i32 = arith.constant 0 : i32
    %c0_i32_0 = arith.constant 0 : i32
    return %arg0, %c0_i32 : i32, i32
  }
}

module attributes {stable_mosaic.version = 11 : i64} {
  func.func @bn_relu_pool_kernel(%arg0: i32, %arg1: memref<2x8x96xf32, #tpu.memory_space<vmem>>, %arg2: memref<2x96xf32, #tpu.memory_space<vmem>>, %arg3: memref<1x96xf32, #tpu.memory_space<vmem>>, %arg4: memref<1x96xf32, #tpu.memory_space<vmem>>, %arg5: memref<8x96xbf16, #tpu.memory_space<vmem>>) attributes {dimension_semantics = [#tpu.dimension_semantics<parallel>], iteration_bounds = array<i64: 1>, scalar_prefetch = 0 : i64, scratch_operands = 0 : i64, tpu.core_type = #tpu.core_type<tc>, window_params = [{transform_indices = @transform_0, window_bounds = array<i64: 2, 8, 96>}, {pipeline_mode = #tpu.pipeline_mode<synchronous>, transform_indices = @transform_1, window_bounds = array<i64: 2, 96>}, {pipeline_mode = #tpu.pipeline_mode<synchronous>, transform_indices = @transform_2, window_bounds = array<i64: 1, 96>}, {pipeline_mode = #tpu.pipeline_mode<synchronous>, transform_indices = @transform_3, window_bounds = array<i64: 1, 96>}, {transform_indices = @transform_4, window_bounds = array<i64: 8, 96>}]} {
    %c0 = arith.constant 0 : index
    %c0_0 = arith.constant 0 : index
    %0 = vector.load %arg2[%c0, %c0_0] : memref<2x96xf32, #tpu.memory_space<vmem>>, vector<1x96xf32>
    %cst = arith.constant 6.250000e-02 : f32
    %1 = vector.broadcast %cst : f32 to vector<1x96xf32>
    %2 = arith.mulf %0, %1 : vector<1x96xf32>
    %c1 = arith.constant 1 : index
    %c0_1 = arith.constant 0 : index
    %3 = vector.load %arg2[%c1, %c0_1] : memref<2x96xf32, #tpu.memory_space<vmem>>, vector<1x96xf32>
    %cst_2 = arith.constant 6.250000e-02 : f32
    %4 = vector.broadcast %cst_2 : f32 to vector<1x96xf32>
    %5 = arith.mulf %3, %4 : vector<1x96xf32>
    %6 = arith.mulf %2, %2 : vector<1x96xf32>
    %7 = arith.subf %5, %6 : vector<1x96xf32>
    %cst_3 = arith.constant 0.000000e+00 : f32
    %8 = vector.broadcast %cst_3 : f32 to vector<1x96xf32>
    %9 = arith.maximumf %7, %8 : vector<1x96xf32>
    %cst_4 = arith.constant 9.99999974E-6 : f32
    %10 = vector.broadcast %cst_4 : f32 to vector<1x96xf32>
    %11 = arith.addf %9, %10 : vector<1x96xf32>
    %12 = math.rsqrt %11 : vector<1x96xf32>
    %c0_5 = arith.constant 0 : index
    %c0_6 = arith.constant 0 : index
    %13 = vector.load %arg3[%c0_5, %c0_6] : memref<1x96xf32, #tpu.memory_space<vmem>>, vector<1x96xf32>
    %14 = arith.mulf %12, %13 : vector<1x96xf32>
    %c0_7 = arith.constant 0 : index
    %c0_8 = arith.constant 0 : index
    %15 = vector.load %arg4[%c0_7, %c0_8] : memref<1x96xf32, #tpu.memory_space<vmem>>, vector<1x96xf32>
    %16 = arith.mulf %2, %14 : vector<1x96xf32>
    %17 = arith.subf %15, %16 : vector<1x96xf32>
    %c0_9 = arith.constant 0 : index
    %c0_10 = arith.constant 0 : index
    %c0_11 = arith.constant 0 : index
    %18 = vector.load %arg1[%c0_9, %c0_10, %c0_11] : memref<2x8x96xf32, #tpu.memory_space<vmem>>, vector<1x8x96xf32>
    %19 = vector.shape_cast %18 : vector<1x8x96xf32> to vector<8x96xf32>
    %20 = vector.broadcast %14 : vector<1x96xf32> to vector<8x96xf32>
    %21 = arith.mulf %19, %20 : vector<8x96xf32>
    %22 = vector.broadcast %17 : vector<1x96xf32> to vector<8x96xf32>
    %23 = arith.addf %21, %22 : vector<8x96xf32>
    %cst_12 = arith.constant 0.000000e+00 : f32
    %24 = vector.broadcast %cst_12 : f32 to vector<8x96xf32>
    %25 = arith.maximumf %23, %24 : vector<8x96xf32>
    %c1_13 = arith.constant 1 : index
    %c0_14 = arith.constant 0 : index
    %c0_15 = arith.constant 0 : index
    %26 = vector.load %arg1[%c1_13, %c0_14, %c0_15] : memref<2x8x96xf32, #tpu.memory_space<vmem>>, vector<1x8x96xf32>
    %27 = vector.shape_cast %26 : vector<1x8x96xf32> to vector<8x96xf32>
    %28 = vector.broadcast %14 : vector<1x96xf32> to vector<8x96xf32>
    %29 = arith.mulf %27, %28 : vector<8x96xf32>
    %30 = vector.broadcast %17 : vector<1x96xf32> to vector<8x96xf32>
    %31 = arith.addf %29, %30 : vector<8x96xf32>
    %cst_16 = arith.constant 0.000000e+00 : f32
    %32 = vector.broadcast %cst_16 : f32 to vector<8x96xf32>
    %33 = arith.maximumf %31, %32 : vector<8x96xf32>
    %34 = arith.maximumf %25, %33 : vector<8x96xf32>
    %35 = arith.truncf %34 : vector<8x96xf32> to vector<8x96xbf16>
    %c0_17 = arith.constant 0 : index
    %c0_18 = arith.constant 0 : index
    %36 = vector.load %arg5[%c0_17, %c0_18] : memref<8x96xbf16, #tpu.memory_space<vmem>>, vector<8x96xbf16>
    tpu.vector_store %arg5[%c0_17, %c0_18], %35 {strides = array<i32>} : memref<8x96xbf16, #tpu.memory_space<vmem>>, vector<8x96xbf16>,
    return
  }
  func.func @transform_0(%arg0: i32) -> (i32, i32, i32) {
    %c0_i32 = arith.constant 0 : i32
    %c0_i32_0 = arith.constant 0 : i32
    %c0_i32_1 = arith.constant 0 : i32
    return %c0_i32, %arg0, %c0_i32_0 : i32, i32, i32
  }
  func.func @transform_1(%arg0: i32) -> (i32, i32) {
    %c0_i32 = arith.constant 0 : i32
    %c0_i32_0 = arith.constant 0 : i32
    %c0_i32_1 = arith.constant 0 : i32
    return %c0_i32, %c0_i32_0 : i32, i32
  }
  func.func @transform_2(%arg0: i32) -> (i32, i32) {
    %c0_i32 = arith.constant 0 : i32
    %c0_i32_0 = arith.constant 0 : i32
    %c0_i32_1 = arith.constant 0 : i32
    return %c0_i32, %c0_i32_0 : i32, i32
  }
  func.func @transform_3(%arg0: i32) -> (i32, i32) {
    %c0_i32 = arith.constant 0 : i32
    %c0_i32_0 = arith.constant 0 : i32
    %c0_i32_1 = arith.constant 0 : i32
    return %c0_i32, %c0_i32_0 : i32, i32
  }
  func.func @transform_4(%arg0: i32) -> (i32, i32) {
    %c0_i32 = arith.constant 0 : i32
    %c0_i32_0 = arith.constant 0 : i32
    return %arg0, %c0_i32 : i32, i32
  }
}

module attributes {stable_mosaic.version = 11 : i64} {
  func.func @conv_stats_kernel(%arg0: i32, %arg1: memref<2x8x336xbf16, #tpu.memory_space<vmem>>, %arg2: memref<336x96xbf16, #tpu.memory_space<vmem>>, %arg3: memref<1x96xf32, #tpu.memory_space<vmem>>, %arg4: memref<2x8x96xf32, #tpu.memory_space<vmem>>, %arg5: memref<2x96xf32, #tpu.memory_space<vmem>>) attributes {dimension_semantics = [#tpu.dimension_semantics<arbitrary>], iteration_bounds = array<i64: 1>, scalar_prefetch = 0 : i64, scratch_operands = 0 : i64, tpu.core_type = #tpu.core_type<tc>, window_params = [{transform_indices = @transform_0, window_bounds = array<i64: 2, 8, 336>}, {pipeline_mode = #tpu.pipeline_mode<synchronous>, transform_indices = @transform_1, window_bounds = array<i64: 336, 96>}, {pipeline_mode = #tpu.pipeline_mode<synchronous>, transform_indices = @transform_2, window_bounds = array<i64: 1, 96>}, {transform_indices = @transform_3, window_bounds = array<i64: 2, 8, 96>}, {pipeline_mode = #tpu.pipeline_mode<synchronous>, transform_indices = @transform_4, window_bounds = array<i64: 2, 96>}]} {
    %c0_i32 = arith.constant 0 : i32
    %0 = arith.cmpi eq, %arg0, %c0_i32 : i32
    %1 = arith.extui %0 : i1 to i32
    %c0_i32_0 = arith.constant 0 : i32
    %2 = arith.cmpi ne, %1, %c0_i32_0 : i32
    scf.if %2 {
      %cst_24 = arith.constant 0.000000e+00 : f32
      %37 = vector.broadcast %cst_24 : f32 to vector<2x96xf32>
      %c0_25 = arith.constant 0 : index
      %c0_26 = arith.constant 0 : index
      %38 = vector.load %arg5[%c0_25, %c0_26] : memref<2x96xf32, #tpu.memory_space<vmem>>, vector<2x96xf32>
      tpu.vector_store %arg5[%c0_25, %c0_26], %37 {strides = array<i32>} : memref<2x96xf32, #tpu.memory_space<vmem>>, vector<2x96xf32>,
    } else {
    }
    %c0 = arith.constant 0 : index
    %c0_1 = arith.constant 0 : index
    %3 = vector.load %arg2[%c0, %c0_1] : memref<336x96xbf16, #tpu.memory_space<vmem>>, vector<336x96xbf16>
    %c0_2 = arith.constant 0 : index
    %c0_3 = arith.constant 0 : index
    %4 = vector.load %arg3[%c0_2, %c0_3] : memref<1x96xf32, #tpu.memory_space<vmem>>, vector<1x96xf32>
    %c0_4 = arith.constant 0 : index
    %c0_5 = arith.constant 0 : index
    %c0_6 = arith.constant 0 : index
    %5 = vector.load %arg1[%c0_4, %c0_5, %c0_6] : memref<2x8x336xbf16, #tpu.memory_space<vmem>>, vector<1x8x336xbf16>
    %6 = vector.shape_cast %5 : vector<1x8x336xbf16> to vector<8x336xbf16>
    %cst = arith.constant dense<0.000000e+00> : vector<8x96xf32>
    %7 = tpu.matmul %6, %3, %cst {dimension_numbers = #tpu.dot_dimension_numbers<[1], [0], [0], [1], [0, 0, 1, 1], [], []>} : vector<8x336xbf16>, vector<336x96xbf16>, vector<8x96xf32> -> vector<8x96xf32>
    %8 = vector.broadcast %4 : vector<1x96xf32> to vector<8x96xf32>
    %9 = arith.addf %7, %8 : vector<8x96xf32>
    %c1 = arith.constant 1 : index
    %c0_7 = arith.constant 0 : index
    %c0_8 = arith.constant 0 : index
    %10 = vector.load %arg1[%c1, %c0_7, %c0_8] : memref<2x8x336xbf16, #tpu.memory_space<vmem>>, vector<1x8x336xbf16>
    %11 = vector.shape_cast %10 : vector<1x8x336xbf16> to vector<8x336xbf16>
    %cst_9 = arith.constant dense<0.000000e+00> : vector<8x96xf32>
    %12 = tpu.matmul %11, %3, %cst_9 {dimension_numbers = #tpu.dot_dimension_numbers<[1], [0], [0], [1], [0, 0, 1, 1], [], []>} : vector<8x336xbf16>, vector<336x96xbf16>, vector<8x96xf32> -> vector<8x96xf32>
    %13 = vector.broadcast %4 : vector<1x96xf32> to vector<8x96xf32>
    %14 = arith.addf %12, %13 : vector<8x96xf32>
    %c0_10 = arith.constant 0 : index
    %c0_11 = arith.constant 0 : index
    %c0_12 = arith.constant 0 : index
    %15 = vector.load %arg4[%c0_10, %c0_11, %c0_12] : memref<2x8x96xf32, #tpu.memory_space<vmem>>, vector<1x8x96xf32>
    %16 = vector.shape_cast %15 : vector<1x8x96xf32> to vector<8x96xf32>
    %17 = vector.shape_cast %9 : vector<8x96xf32> to vector<1x8x96xf32>
    tpu.vector_store %arg4[%c0_10, %c0_11, %c0_12], %17 {strides = array<i32>} : memref<2x8x96xf32, #tpu.memory_space<vmem>>, vector<1x8x96xf32>,
    %c1_13 = arith.constant 1 : index
    %c0_14 = arith.constant 0 : index
    %c0_15 = arith.constant 0 : index
    %18 = vector.load %arg4[%c1_13, %c0_14, %c0_15] : memref<2x8x96xf32, #tpu.memory_space<vmem>>, vector<1x8x96xf32>
    %19 = vector.shape_cast %18 : vector<1x8x96xf32> to vector<8x96xf32>
    %20 = vector.shape_cast %14 : vector<8x96xf32> to vector<1x8x96xf32>
    tpu.vector_store %arg4[%c1_13, %c0_14, %c0_15], %20 {strides = array<i32>} : memref<2x8x96xf32, #tpu.memory_space<vmem>>, vector<1x8x96xf32>,
    %cst_16 = arith.constant dense<0.000000e+00> : vector<96xf32>
    %21 = vector.multi_reduction <add>, %9, %cst_16 [0] : vector<8x96xf32> to vector<96xf32>
    %22 = vector.shape_cast %21 : vector<96xf32> to vector<1x96xf32>
    %cst_17 = arith.constant dense<0.000000e+00> : vector<96xf32>
    %23 = vector.multi_reduction <add>, %14, %cst_17 [0] : vector<8x96xf32> to vector<96xf32>
    %24 = vector.shape_cast %23 : vector<96xf32> to vector<1x96xf32>
    %25 = arith.addf %22, %24 : vector<1x96xf32>
    %26 = arith.mulf %9, %9 : vector<8x96xf32>
    %cst_18 = arith.constant dense<0.000000e+00> : vector<96xf32>
    %27 = vector.multi_reduction <add>, %26, %cst_18 [0] : vector<8x96xf32> to vector<96xf32>
    %28 = vector.shape_cast %27 : vector<96xf32> to vector<1x96xf32>
    %29 = arith.mulf %14, %14 : vector<8x96xf32>
    %cst_19 = arith.constant dense<0.000000e+00> : vector<96xf32>
    %30 = vector.multi_reduction <add>, %29, %cst_19 [0] : vector<8x96xf32> to vector<96xf32>
    %31 = vector.shape_cast %30 : vector<96xf32> to vector<1x96xf32>
    %32 = arith.addf %28, %31 : vector<1x96xf32>
    %c0_20 = arith.constant 0 : index
    %c0_21 = arith.constant 0 : index
    %33 = vector.load %arg5[%c0_20, %c0_21] : memref<2x96xf32, #tpu.memory_space<vmem>>, vector<2x96xf32>
    %34 = tpu.concatenate %25, %32 in 0 : vector<1x96xf32>, vector<1x96xf32> -> vector<2x96xf32>
    %35 = arith.addf %33, %34 : vector<2x96xf32>
    %c0_22 = arith.constant 0 : index
    %c0_23 = arith.constant 0 : index
    %36 = vector.load %arg5[%c0_22, %c0_23] : memref<2x96xf32, #tpu.memory_space<vmem>>, vector<2x96xf32>
    tpu.vector_store %arg5[%c0_22, %c0_23], %35 {strides = array<i32>} : memref<2x96xf32, #tpu.memory_space<vmem>>, vector<2x96xf32>,
    return
  }
  func.func @transform_0(%arg0: i32) -> (i32, i32, i32) {
    %c0_i32 = arith.constant 0 : i32
    %c0_i32_0 = arith.constant 0 : i32
    %c0_i32_1 = arith.constant 0 : i32
    return %c0_i32, %arg0, %c0_i32_0 : i32, i32, i32
  }
  func.func @transform_1(%arg0: i32) -> (i32, i32) {
    %c0_i32 = arith.constant 0 : i32
    %c0_i32_0 = arith.constant 0 : i32
    %c0_i32_1 = arith.constant 0 : i32
    return %c0_i32, %c0_i32_0 : i32, i32
  }
  func.func @transform_2(%arg0: i32) -> (i32, i32) {
    %c0_i32 = arith.constant 0 : i32
    %c0_i32_0 = arith.constant 0 : i32
    %c0_i32_1 = arith.constant 0 : i32
    return %c0_i32, %c0_i32_0 : i32, i32
  }
  func.func @transform_3(%arg0: i32) -> (i32, i32, i32) {
    %c0_i32 = arith.constant 0 : i32
    %c0_i32_0 = arith.constant 0 : i32
    %c0_i32_1 = arith.constant 0 : i32
    return %c0_i32, %arg0, %c0_i32_0 : i32, i32, i32
  }
  func.func @transform_4(%arg0: i32) -> (i32, i32) {
    %c0_i32 = arith.constant 0 : i32
    %c0_i32_0 = arith.constant 0 : i32
    %c0_i32_1 = arith.constant 0 : i32
    return %c0_i32, %c0_i32_0 : i32, i32
  }
}

module attributes {stable_mosaic.version = 11 : i64} {
  func.func @bn_relu_pool_kernel(%arg0: i32, %arg1: memref<2x4x192xf32, #tpu.memory_space<vmem>>, %arg2: memref<2x192xf32, #tpu.memory_space<vmem>>, %arg3: memref<1x192xf32, #tpu.memory_space<vmem>>, %arg4: memref<1x192xf32, #tpu.memory_space<vmem>>, %arg5: memref<4x192xbf16, #tpu.memory_space<vmem>>) attributes {dimension_semantics = [#tpu.dimension_semantics<parallel>], iteration_bounds = array<i64: 1>, scalar_prefetch = 0 : i64, scratch_operands = 0 : i64, tpu.core_type = #tpu.core_type<tc>, window_params = [{transform_indices = @transform_0, window_bounds = array<i64: 2, 4, 192>}, {pipeline_mode = #tpu.pipeline_mode<synchronous>, transform_indices = @transform_1, window_bounds = array<i64: 2, 192>}, {pipeline_mode = #tpu.pipeline_mode<synchronous>, transform_indices = @transform_2, window_bounds = array<i64: 1, 192>}, {pipeline_mode = #tpu.pipeline_mode<synchronous>, transform_indices = @transform_3, window_bounds = array<i64: 1, 192>}, {transform_indices = @transform_4, window_bounds = array<i64: 4, 192>}]} {
    %c0 = arith.constant 0 : index
    %c0_0 = arith.constant 0 : index
    %0 = vector.load %arg2[%c0, %c0_0] : memref<2x192xf32, #tpu.memory_space<vmem>>, vector<1x192xf32>
    %cst = arith.constant 1.250000e-01 : f32
    %1 = vector.broadcast %cst : f32 to vector<1x192xf32>
    %2 = arith.mulf %0, %1 : vector<1x192xf32>
    %c1 = arith.constant 1 : index
    %c0_1 = arith.constant 0 : index
    %3 = vector.load %arg2[%c1, %c0_1] : memref<2x192xf32, #tpu.memory_space<vmem>>, vector<1x192xf32>
    %cst_2 = arith.constant 1.250000e-01 : f32
    %4 = vector.broadcast %cst_2 : f32 to vector<1x192xf32>
    %5 = arith.mulf %3, %4 : vector<1x192xf32>
    %6 = arith.mulf %2, %2 : vector<1x192xf32>
    %7 = arith.subf %5, %6 : vector<1x192xf32>
    %cst_3 = arith.constant 0.000000e+00 : f32
    %8 = vector.broadcast %cst_3 : f32 to vector<1x192xf32>
    %9 = arith.maximumf %7, %8 : vector<1x192xf32>
    %cst_4 = arith.constant 9.99999974E-6 : f32
    %10 = vector.broadcast %cst_4 : f32 to vector<1x192xf32>
    %11 = arith.addf %9, %10 : vector<1x192xf32>
    %12 = math.rsqrt %11 : vector<1x192xf32>
    %c0_5 = arith.constant 0 : index
    %c0_6 = arith.constant 0 : index
    %13 = vector.load %arg3[%c0_5, %c0_6] : memref<1x192xf32, #tpu.memory_space<vmem>>, vector<1x192xf32>
    %14 = arith.mulf %12, %13 : vector<1x192xf32>
    %c0_7 = arith.constant 0 : index
    %c0_8 = arith.constant 0 : index
    %15 = vector.load %arg4[%c0_7, %c0_8] : memref<1x192xf32, #tpu.memory_space<vmem>>, vector<1x192xf32>
    %16 = arith.mulf %2, %14 : vector<1x192xf32>
    %17 = arith.subf %15, %16 : vector<1x192xf32>
    %c0_9 = arith.constant 0 : index
    %c0_10 = arith.constant 0 : index
    %c0_11 = arith.constant 0 : index
    %18 = vector.load %arg1[%c0_9, %c0_10, %c0_11] : memref<2x4x192xf32, #tpu.memory_space<vmem>>, vector<1x4x192xf32>
    %19 = vector.shape_cast %18 : vector<1x4x192xf32> to vector<4x192xf32>
    %20 = vector.broadcast %14 : vector<1x192xf32> to vector<4x192xf32>
    %21 = arith.mulf %19, %20 : vector<4x192xf32>
    %22 = vector.broadcast %17 : vector<1x192xf32> to vector<4x192xf32>
    %23 = arith.addf %21, %22 : vector<4x192xf32>
    %cst_12 = arith.constant 0.000000e+00 : f32
    %24 = vector.broadcast %cst_12 : f32 to vector<4x192xf32>
    %25 = arith.maximumf %23, %24 : vector<4x192xf32>
    %c1_13 = arith.constant 1 : index
    %c0_14 = arith.constant 0 : index
    %c0_15 = arith.constant 0 : index
    %26 = vector.load %arg1[%c1_13, %c0_14, %c0_15] : memref<2x4x192xf32, #tpu.memory_space<vmem>>, vector<1x4x192xf32>
    %27 = vector.shape_cast %26 : vector<1x4x192xf32> to vector<4x192xf32>
    %28 = vector.broadcast %14 : vector<1x192xf32> to vector<4x192xf32>
    %29 = arith.mulf %27, %28 : vector<4x192xf32>
    %30 = vector.broadcast %17 : vector<1x192xf32> to vector<4x192xf32>
    %31 = arith.addf %29, %30 : vector<4x192xf32>
    %cst_16 = arith.constant 0.000000e+00 : f32
    %32 = vector.broadcast %cst_16 : f32 to vector<4x192xf32>
    %33 = arith.maximumf %31, %32 : vector<4x192xf32>
    %34 = arith.maximumf %25, %33 : vector<4x192xf32>
    %35 = arith.truncf %34 : vector<4x192xf32> to vector<4x192xbf16>
    %c0_17 = arith.constant 0 : index
    %c0_18 = arith.constant 0 : index
    %36 = vector.load %arg5[%c0_17, %c0_18] : memref<4x192xbf16, #tpu.memory_space<vmem>>, vector<4x192xbf16>
    tpu.vector_store %arg5[%c0_17, %c0_18], %35 {strides = array<i32>} : memref<4x192xbf16, #tpu.memory_space<vmem>>, vector<4x192xbf16>,
    return
  }
  func.func @transform_0(%arg0: i32) -> (i32, i32, i32) {
    %c0_i32 = arith.constant 0 : i32
    %c0_i32_0 = arith.constant 0 : i32
    %c0_i32_1 = arith.constant 0 : i32
    return %c0_i32, %arg0, %c0_i32_0 : i32, i32, i32
  }
  func.func @transform_1(%arg0: i32) -> (i32, i32) {
    %c0_i32 = arith.constant 0 : i32
    %c0_i32_0 = arith.constant 0 : i32
    %c0_i32_1 = arith.constant 0 : i32
    return %c0_i32, %c0_i32_0 : i32, i32
  }
  func.func @transform_2(%arg0: i32) -> (i32, i32) {
    %c0_i32 = arith.constant 0 : i32
    %c0_i32_0 = arith.constant 0 : i32
    %c0_i32_1 = arith.constant 0 : i32
    return %c0_i32, %c0_i32_0 : i32, i32
  }
  func.func @transform_3(%arg0: i32) -> (i32, i32) {
    %c0_i32 = arith.constant 0 : i32
    %c0_i32_0 = arith.constant 0 : i32
    %c0_i32_1 = arith.constant 0 : i32
    return %c0_i32, %c0_i32_0 : i32, i32
  }
  func.func @transform_4(%arg0: i32) -> (i32, i32) {
    %c0_i32 = arith.constant 0 : i32
    %c0_i32_0 = arith.constant 0 : i32
    return %arg0, %c0_i32 : i32, i32
  }
}

module attributes {stable_mosaic.version = 11 : i64} {
  func.func @conv_stats_kernel(%arg0: i32, %arg1: memref<2x4x672xbf16, #tpu.memory_space<vmem>>, %arg2: memref<672x192xbf16, #tpu.memory_space<vmem>>, %arg3: memref<1x192xf32, #tpu.memory_space<vmem>>, %arg4: memref<2x4x192xf32, #tpu.memory_space<vmem>>, %arg5: memref<2x192xf32, #tpu.memory_space<vmem>>) attributes {dimension_semantics = [#tpu.dimension_semantics<arbitrary>], iteration_bounds = array<i64: 1>, scalar_prefetch = 0 : i64, scratch_operands = 0 : i64, tpu.core_type = #tpu.core_type<tc>, window_params = [{transform_indices = @transform_0, window_bounds = array<i64: 2, 4, 672>}, {pipeline_mode = #tpu.pipeline_mode<synchronous>, transform_indices = @transform_1, window_bounds = array<i64: 672, 192>}, {pipeline_mode = #tpu.pipeline_mode<synchronous>, transform_indices = @transform_2, window_bounds = array<i64: 1, 192>}, {transform_indices = @transform_3, window_bounds = array<i64: 2, 4, 192>}, {pipeline_mode = #tpu.pipeline_mode<synchronous>, transform_indices = @transform_4, window_bounds = array<i64: 2, 192>}]} {
    %c0_i32 = arith.constant 0 : i32
    %0 = arith.cmpi eq, %arg0, %c0_i32 : i32
    %1 = arith.extui %0 : i1 to i32
    %c0_i32_0 = arith.constant 0 : i32
    %2 = arith.cmpi ne, %1, %c0_i32_0 : i32
    scf.if %2 {
      %cst_24 = arith.constant 0.000000e+00 : f32
      %37 = vector.broadcast %cst_24 : f32 to vector<2x192xf32>
      %c0_25 = arith.constant 0 : index
      %c0_26 = arith.constant 0 : index
      %38 = vector.load %arg5[%c0_25, %c0_26] : memref<2x192xf32, #tpu.memory_space<vmem>>, vector<2x192xf32>
      tpu.vector_store %arg5[%c0_25, %c0_26], %37 {strides = array<i32>} : memref<2x192xf32, #tpu.memory_space<vmem>>, vector<2x192xf32>,
    } else {
    }
    %c0 = arith.constant 0 : index
    %c0_1 = arith.constant 0 : index
    %3 = vector.load %arg2[%c0, %c0_1] : memref<672x192xbf16, #tpu.memory_space<vmem>>, vector<672x192xbf16>
    %c0_2 = arith.constant 0 : index
    %c0_3 = arith.constant 0 : index
    %4 = vector.load %arg3[%c0_2, %c0_3] : memref<1x192xf32, #tpu.memory_space<vmem>>, vector<1x192xf32>
    %c0_4 = arith.constant 0 : index
    %c0_5 = arith.constant 0 : index
    %c0_6 = arith.constant 0 : index
    %5 = vector.load %arg1[%c0_4, %c0_5, %c0_6] : memref<2x4x672xbf16, #tpu.memory_space<vmem>>, vector<1x4x672xbf16>
    %6 = vector.shape_cast %5 : vector<1x4x672xbf16> to vector<4x672xbf16>
    %cst = arith.constant dense<0.000000e+00> : vector<4x192xf32>
    %7 = tpu.matmul %6, %3, %cst {dimension_numbers = #tpu.dot_dimension_numbers<[1], [0], [0], [1], [0, 0, 1, 1], [], []>} : vector<4x672xbf16>, vector<672x192xbf16>, vector<4x192xf32> -> vector<4x192xf32>
    %8 = vector.broadcast %4 : vector<1x192xf32> to vector<4x192xf32>
    %9 = arith.addf %7, %8 : vector<4x192xf32>
    %c1 = arith.constant 1 : index
    %c0_7 = arith.constant 0 : index
    %c0_8 = arith.constant 0 : index
    %10 = vector.load %arg1[%c1, %c0_7, %c0_8] : memref<2x4x672xbf16, #tpu.memory_space<vmem>>, vector<1x4x672xbf16>
    %11 = vector.shape_cast %10 : vector<1x4x672xbf16> to vector<4x672xbf16>
    %cst_9 = arith.constant dense<0.000000e+00> : vector<4x192xf32>
    %12 = tpu.matmul %11, %3, %cst_9 {dimension_numbers = #tpu.dot_dimension_numbers<[1], [0], [0], [1], [0, 0, 1, 1], [], []>} : vector<4x672xbf16>, vector<672x192xbf16>, vector<4x192xf32> -> vector<4x192xf32>
    %13 = vector.broadcast %4 : vector<1x192xf32> to vector<4x192xf32>
    %14 = arith.addf %12, %13 : vector<4x192xf32>
    %c0_10 = arith.constant 0 : index
    %c0_11 = arith.constant 0 : index
    %c0_12 = arith.constant 0 : index
    %15 = vector.load %arg4[%c0_10, %c0_11, %c0_12] : memref<2x4x192xf32, #tpu.memory_space<vmem>>, vector<1x4x192xf32>
    %16 = vector.shape_cast %15 : vector<1x4x192xf32> to vector<4x192xf32>
    %17 = vector.shape_cast %9 : vector<4x192xf32> to vector<1x4x192xf32>
    tpu.vector_store %arg4[%c0_10, %c0_11, %c0_12], %17 {strides = array<i32>} : memref<2x4x192xf32, #tpu.memory_space<vmem>>, vector<1x4x192xf32>,
    %c1_13 = arith.constant 1 : index
    %c0_14 = arith.constant 0 : index
    %c0_15 = arith.constant 0 : index
    %18 = vector.load %arg4[%c1_13, %c0_14, %c0_15] : memref<2x4x192xf32, #tpu.memory_space<vmem>>, vector<1x4x192xf32>
    %19 = vector.shape_cast %18 : vector<1x4x192xf32> to vector<4x192xf32>
    %20 = vector.shape_cast %14 : vector<4x192xf32> to vector<1x4x192xf32>
    tpu.vector_store %arg4[%c1_13, %c0_14, %c0_15], %20 {strides = array<i32>} : memref<2x4x192xf32, #tpu.memory_space<vmem>>, vector<1x4x192xf32>,
    %cst_16 = arith.constant dense<0.000000e+00> : vector<192xf32>
    %21 = vector.multi_reduction <add>, %9, %cst_16 [0] : vector<4x192xf32> to vector<192xf32>
    %22 = vector.shape_cast %21 : vector<192xf32> to vector<1x192xf32>
    %cst_17 = arith.constant dense<0.000000e+00> : vector<192xf32>
    %23 = vector.multi_reduction <add>, %14, %cst_17 [0] : vector<4x192xf32> to vector<192xf32>
    %24 = vector.shape_cast %23 : vector<192xf32> to vector<1x192xf32>
    %25 = arith.addf %22, %24 : vector<1x192xf32>
    %26 = arith.mulf %9, %9 : vector<4x192xf32>
    %cst_18 = arith.constant dense<0.000000e+00> : vector<192xf32>
    %27 = vector.multi_reduction <add>, %26, %cst_18 [0] : vector<4x192xf32> to vector<192xf32>
    %28 = vector.shape_cast %27 : vector<192xf32> to vector<1x192xf32>
    %29 = arith.mulf %14, %14 : vector<4x192xf32>
    %cst_19 = arith.constant dense<0.000000e+00> : vector<192xf32>
    %30 = vector.multi_reduction <add>, %29, %cst_19 [0] : vector<4x192xf32> to vector<192xf32>
    %31 = vector.shape_cast %30 : vector<192xf32> to vector<1x192xf32>
    %32 = arith.addf %28, %31 : vector<1x192xf32>
    %c0_20 = arith.constant 0 : index
    %c0_21 = arith.constant 0 : index
    %33 = vector.load %arg5[%c0_20, %c0_21] : memref<2x192xf32, #tpu.memory_space<vmem>>, vector<2x192xf32>
    %34 = tpu.concatenate %25, %32 in 0 : vector<1x192xf32>, vector<1x192xf32> -> vector<2x192xf32>
    %35 = arith.addf %33, %34 : vector<2x192xf32>
    %c0_22 = arith.constant 0 : index
    %c0_23 = arith.constant 0 : index
    %36 = vector.load %arg5[%c0_22, %c0_23] : memref<2x192xf32, #tpu.memory_space<vmem>>, vector<2x192xf32>
    tpu.vector_store %arg5[%c0_22, %c0_23], %35 {strides = array<i32>} : memref<2x192xf32, #tpu.memory_space<vmem>>, vector<2x192xf32>,
    return
  }
  func.func @transform_0(%arg0: i32) -> (i32, i32, i32) {
    %c0_i32 = arith.constant 0 : i32
    %c0_i32_0 = arith.constant 0 : i32
    %c0_i32_1 = arith.constant 0 : i32
    return %c0_i32, %arg0, %c0_i32_0 : i32, i32, i32
  }
  func.func @transform_1(%arg0: i32) -> (i32, i32) {
    %c0_i32 = arith.constant 0 : i32
    %c0_i32_0 = arith.constant 0 : i32
    %c0_i32_1 = arith.constant 0 : i32
    return %c0_i32, %c0_i32_0 : i32, i32
  }
  func.func @transform_2(%arg0: i32) -> (i32, i32) {
    %c0_i32 = arith.constant 0 : i32
    %c0_i32_0 = arith.constant 0 : i32
    %c0_i32_1 = arith.constant 0 : i32
    return %c0_i32, %c0_i32_0 : i32, i32
  }
  func.func @transform_3(%arg0: i32) -> (i32, i32, i32) {
    %c0_i32 = arith.constant 0 : i32
    %c0_i32_0 = arith.constant 0 : i32
    %c0_i32_1 = arith.constant 0 : i32
    return %c0_i32, %arg0, %c0_i32_0 : i32, i32, i32
  }
  func.func @transform_4(%arg0: i32) -> (i32, i32) {
    %c0_i32 = arith.constant 0 : i32
    %c0_i32_0 = arith.constant 0 : i32
    %c0_i32_1 = arith.constant 0 : i32
    return %c0_i32, %c0_i32_0 : i32, i32
  }
}

module attributes {stable_mosaic.version = 11 : i64} {
  func.func @conv_bn_relu_kernel(%arg0: memref<4x192xbf16, #tpu.memory_space<vmem>>, %arg1: memref<192x192xbf16, #tpu.memory_space<vmem>>, %arg2: memref<1x192xf32, #tpu.memory_space<vmem>>, %arg3: memref<1x192xf32, #tpu.memory_space<vmem>>, %arg4: memref<1x192xf32, #tpu.memory_space<vmem>>, %arg5: memref<4x192xf32, #tpu.memory_space<vmem>>) attributes {dimension_semantics = [], scalar_prefetch = 0 : i64, scratch_operands = 0 : i64, tpu.core_type = #tpu.core_type<tc>} {
    %c0 = arith.constant 0 : index
    %c0_0 = arith.constant 0 : index
    %0 = vector.load %arg0[%c0, %c0_0] : memref<4x192xbf16, #tpu.memory_space<vmem>>, vector<4x192xbf16>
    %c0_1 = arith.constant 0 : index
    %c0_2 = arith.constant 0 : index
    %1 = vector.load %arg1[%c0_1, %c0_2] : memref<192x192xbf16, #tpu.memory_space<vmem>>, vector<192x192xbf16>
    %cst = arith.constant dense<0.000000e+00> : vector<4x192xf32>
    %2 = tpu.matmul %0, %1, %cst {dimension_numbers = #tpu.dot_dimension_numbers<[1], [0], [0], [1], [0, 0, 1, 1], [], []>} : vector<4x192xbf16>, vector<192x192xbf16>, vector<4x192xf32> -> vector<4x192xf32>
    %c0_3 = arith.constant 0 : index
    %c0_4 = arith.constant 0 : index
    %3 = vector.load %arg2[%c0_3, %c0_4] : memref<1x192xf32, #tpu.memory_space<vmem>>, vector<1x192xf32>
    %4 = vector.broadcast %3 : vector<1x192xf32> to vector<4x192xf32>
    %5 = arith.addf %2, %4 : vector<4x192xf32>
    %cst_5 = arith.constant dense<0.000000e+00> : vector<192xf32>
    %6 = vector.multi_reduction <add>, %5, %cst_5 [0] : vector<4x192xf32> to vector<192xf32>
    %7 = vector.shape_cast %6 : vector<192xf32> to vector<1x192xf32>
    %cst_6 = arith.constant 4.000000e+00 : f32
    %8 = vector.broadcast %cst_6 : f32 to vector<1x192xf32>
    %9 = arith.divf %7, %8 : vector<1x192xf32>
    %10 = arith.mulf %5, %5 : vector<4x192xf32>
    %cst_7 = arith.constant dense<0.000000e+00> : vector<192xf32>
    %11 = vector.multi_reduction <add>, %10, %cst_7 [0] : vector<4x192xf32> to vector<192xf32>
    %12 = vector.shape_cast %11 : vector<192xf32> to vector<1x192xf32>
    %cst_8 = arith.constant 4.000000e+00 : f32
    %13 = vector.broadcast %cst_8 : f32 to vector<1x192xf32>
    %14 = arith.divf %12, %13 : vector<1x192xf32>
    %15 = arith.mulf %9, %9 : vector<1x192xf32>
    %16 = arith.subf %14, %15 : vector<1x192xf32>
    %cst_9 = arith.constant 0.000000e+00 : f32
    %17 = vector.broadcast %cst_9 : f32 to vector<1x192xf32>
    %18 = arith.maximumf %16, %17 : vector<1x192xf32>
    %cst_10 = arith.constant 9.99999974E-6 : f32
    %19 = vector.broadcast %cst_10 : f32 to vector<1x192xf32>
    %20 = arith.addf %18, %19 : vector<1x192xf32>
    %21 = math.rsqrt %20 : vector<1x192xf32>
    %c0_11 = arith.constant 0 : index
    %c0_12 = arith.constant 0 : index
    %22 = vector.load %arg3[%c0_11, %c0_12] : memref<1x192xf32, #tpu.memory_space<vmem>>, vector<1x192xf32>
    %23 = arith.mulf %21, %22 : vector<1x192xf32>
    %c0_13 = arith.constant 0 : index
    %c0_14 = arith.constant 0 : index
    %24 = vector.load %arg4[%c0_13, %c0_14] : memref<1x192xf32, #tpu.memory_space<vmem>>, vector<1x192xf32>
    %25 = arith.mulf %9, %23 : vector<1x192xf32>
    %26 = arith.subf %24, %25 : vector<1x192xf32>
    %27 = vector.broadcast %23 : vector<1x192xf32> to vector<4x192xf32>
    %28 = arith.mulf %5, %27 : vector<4x192xf32>
    %29 = vector.broadcast %26 : vector<1x192xf32> to vector<4x192xf32>
    %30 = arith.addf %28, %29 : vector<4x192xf32>
    %cst_15 = arith.constant 0.000000e+00 : f32
    %31 = vector.broadcast %cst_15 : f32 to vector<4x192xf32>
    %32 = arith.maximumf %30, %31 : vector<4x192xf32>
    %c0_16 = arith.constant 0 : index
    %c0_17 = arith.constant 0 : index
    %33 = vector.load %arg5[%c0_16, %c0_17] : memref<4x192xf32, #tpu.memory_space<vmem>>, vector<4x192xf32>
    tpu.vector_store %arg5[%c0_16, %c0_17], %32 {strides = array<i32>} : memref<4x192xf32, #tpu.memory_space<vmem>>, vector<4x192xf32>,
    return
  }
}

module attributes {stable_mosaic.version = 11 : i64} {
  func.func @gaussian_head_kernel(%arg0: memref<4x192xbf16, #tpu.memory_space<vmem>>, %arg1: memref<192x16xbf16, #tpu.memory_space<vmem>>, %arg2: memref<1x16xf32, #tpu.memory_space<vmem>>, %arg3: memref<4x8xf32, #tpu.memory_space<vmem>>, %arg4: memref<4x8xf32, #tpu.memory_space<vmem>>, %arg5: memref<4x8xf32, #tpu.memory_space<vmem>>, %arg6: memref<4x8xf32, #tpu.memory_space<vmem>>) attributes {dimension_semantics = [], scalar_prefetch = 0 : i64, scratch_operands = 0 : i64, tpu.core_type = #tpu.core_type<tc>} {
    %c0 = arith.constant 0 : index
    %c0_0 = arith.constant 0 : index
    %0 = vector.load %arg0[%c0, %c0_0] : memref<4x192xbf16, #tpu.memory_space<vmem>>, vector<4x192xbf16>
    %c0_1 = arith.constant 0 : index
    %c0_2 = arith.constant 0 : index
    %1 = vector.load %arg1[%c0_1, %c0_2] : memref<192x16xbf16, #tpu.memory_space<vmem>>, vector<192x16xbf16>
    %cst = arith.constant dense<0.000000e+00> : vector<4x16xf32>
    %2 = tpu.matmul %0, %1, %cst {dimension_numbers = #tpu.dot_dimension_numbers<[1], [0], [0], [1], [0, 0, 1, 1], [], []>} : vector<4x192xbf16>, vector<192x16xbf16>, vector<4x16xf32> -> vector<4x16xf32>
    %c0_3 = arith.constant 0 : index
    %c0_4 = arith.constant 0 : index
    %3 = vector.load %arg2[%c0_3, %c0_4] : memref<1x16xf32, #tpu.memory_space<vmem>>, vector<1x16xf32>
    %4 = vector.broadcast %3 : vector<1x16xf32> to vector<4x16xf32>
    %5 = arith.addf %2, %4 : vector<4x16xf32>
    %6 = vector.extract_strided_slice %5 {offsets = [0, 0], sizes = [4, 8], strides = [1, 1]} : vector<4x16xf32> to vector<4x8xf32>
    %7 = vector.extract_strided_slice %5 {offsets = [0, 8], sizes = [4, 8], strides = [1, 1]} : vector<4x16xf32> to vector<4x8xf32>
    %cst_5 = arith.constant 0.000000e+00 : f32
    %8 = vector.broadcast %cst_5 : f32 to vector<4x8xf32>
    %9 = arith.maximumf %7, %8 : vector<4x8xf32>
    %10 = math.absf %7 : vector<4x8xf32>
    %cst_6 = arith.constant 0.000000e+00 : f32
    %11 = vector.broadcast %cst_6 : f32 to vector<4x8xf32>
    %12 = arith.subf %11, %10 : vector<4x8xf32>
    %13 = math.exp %12 : vector<4x8xf32>
    %14 = math.log1p %13 : vector<4x8xf32>
    %15 = arith.addf %9, %14 : vector<4x8xf32>
    %cst_7 = arith.constant 5.000000e-01 : f32
    %16 = vector.broadcast %cst_7 : f32 to vector<4x8xf32>
    %17 = arith.mulf %16, %15 : vector<4x8xf32>
    %18 = math.exp %17 : vector<4x8xf32>
    %c0_8 = arith.constant 0 : index
    %c0_9 = arith.constant 0 : index
    %19 = vector.load %arg3[%c0_8, %c0_9] : memref<4x8xf32, #tpu.memory_space<vmem>>, vector<4x8xf32>
    %20 = arith.mulf %18, %19 : vector<4x8xf32>
    %21 = arith.addf %6, %20 : vector<4x8xf32>
    %c0_10 = arith.constant 0 : index
    %c0_11 = arith.constant 0 : index
    %22 = vector.load %arg4[%c0_10, %c0_11] : memref<4x8xf32, #tpu.memory_space<vmem>>, vector<4x8xf32>
    tpu.vector_store %arg4[%c0_10, %c0_11], %21 {strides = array<i32>} : memref<4x8xf32, #tpu.memory_space<vmem>>, vector<4x8xf32>,
    %c0_12 = arith.constant 0 : index
    %c0_13 = arith.constant 0 : index
    %23 = vector.load %arg5[%c0_12, %c0_13] : memref<4x8xf32, #tpu.memory_space<vmem>>, vector<4x8xf32>
    tpu.vector_store %arg5[%c0_12, %c0_13], %6 {strides = array<i32>} : memref<4x8xf32, #tpu.memory_space<vmem>>, vector<4x8xf32>,
    %c0_14 = arith.constant 0 : index
    %c0_15 = arith.constant 0 : index
    %24 = vector.load %arg6[%c0_14, %c0_15] : memref<4x8xf32, #tpu.memory_space<vmem>>, vector<4x8xf32>
    tpu.vector_store %arg6[%c0_14, %c0_15], %15 {strides = array<i32>} : memref<4x8xf32, #tpu.memory_space<vmem>>, vector<4x8xf32>,
    return
  }
}

</mosaic_0001>

<bundles_post_ra>
// kernel: encoder_forward.11
= control target key start
LH: loop header
LB: loop body
LE: loop exit
PB: predicated region body
PF: predicated region fallthrough
CT: control target
= control target key end

     0   :  { %v35_v8 = vlaneseq  ;;  %vm94_vm0 = vcmask 191488   ;;  %s190_s1 = inlined_call_operand.vmem [shape: f32[2,24], index: 1, kind: input, shape index: {}]   ;;  %s191_s2 = inlined_call_operand.vmem [shape: f32[1,24], index: 2, kind: input, shape index: {}]   ;;  %s192_s0 = inlined_call_operand.vmem [shape: f32[2,32,24], index: 0, kind: input, shape index: {}]   ;;  %s193_s3 = inlined_call_operand.vmem [shape: f32[1,24], index: 3, kind: input, shape index: {}]   ;;  %s194_s4 = inlined_call_operand.vmem [shape: bf16[32,24], index: 4, kind: output, shape index: {}]  }
   0x1   :  { %v17_v0 = vld [vmem:[%s190_s1] sm:$0x1]  ;;  %v19_v1 = vld [vmem:[%s190_s1 + $0x1] sm:$0x1]  ;;  %v32_v17 = vld [vmem:[%s192_s0 + $0x8] sm:$0xff] }
   0x2   :  { %v18_v2 = vmul.f32 0.015625, %v17_v0  ;;  %v20_v3 = vmul.f32 0.015625, %v19_v1  ;;  %v36_v9 = vshrl.u32 %v35_v8, 7  ;;  %v26_v10 = vld [vmem:[%s191_s2] sm:$0x1]  ;;  %v104_v18 = vld [vmem:[%s192_s0 + $0x28] sm:$0xff] }
   0x3   :  { %v28_v14 = vld [vmem:[%s193_s3] sm:$0x1]  ;;  %v33_v21 = vld [vmem:[%s192_s0 + $0x10] sm:$0xff]  ;;  %v34_v23 = vld [vmem:[%s192_s0 + $0x18] sm:$0xff] }
   0x4   :  { %v21_v4 = vmul.f32 %v18_v2, %v18_v2  ;;  %v37_v11 = vsub.s32 0, %v36_v9  ;;  %v31_v15 = vld [vmem:[%s192_s0] sm:$0xff]  ;;  %v105_v22 = vld [vmem:[%s192_s0 + $0x30] sm:$0xff]  ;;  %v106_v24 = vld [vmem:[%s192_s0 + $0x38] sm:$0xff] }
   0x5   :  { %v103_v16 = vld [vmem:[%s192_s0 + $0x20] sm:$0xff] }
   0x6   :  { %v22_v5 = vsub.f32 %v20_v3, %v21_v4 }
   0x8   :  { %v23_v6 = vmax.f32 %v22_v5, 0.0 }
   0xa   :  { %v24_v7 = vadd.f32 1e-05, %v23_v6 }
   0xc   :  { %115 = vrsqrt.f32 %v24_v7 }
  0x16   :  { %v116_v12 = vpop.eup %115 }
  0x17   :  { %v27_v13 = vmul.f32 %v116_v12, %v26_v10 }
  0x19   :  { %v29_v19 = vmul.f32 %v27_v13, %v18_v2  ;;  %v38_v20 = vrot.slane %v27_v13, %v37_v11 }
  0x1b   :  { %v30_v25 = vsub.f32 %v28_v14, %v29_v19  ;;  %v39_v26 = vmul.f32 %v38_v20, %v31_v15  ;;  %v62_v27 = vmul.f32 %v103_v16, %v38_v20  ;;  %v40_v28 = vmul.f32 %v38_v20, %v32_v17 }
  0x1c   :  { %v63_v29 = vmul.f32 %v104_v18, %v38_v20  ;;  %v41_v30 = vmul.f32 %v38_v20, %v33_v21  ;;  %v64_v31 = vmul.f32 %v105_v22, %v38_v20  ;;  %v42_v32 = vmul.f32 %v38_v20, %v34_v23 }
  0x1d   :  { %v47_v33 = vrot.slane %v30_v25, %v37_v11  ;;  %v65_v34 = vmul.f32 %v106_v24, %v38_v20 }
  0x1f   :  { %v49_v35 = vadd.f32 %v47_v33, %v39_v26  ;;  %v66_v36 = vadd.f32 %v62_v27, %v47_v33  ;;  %v50_v37 = vadd.f32 %v47_v33, %v40_v28  ;;  %v67_v38 = vadd.f32 %v63_v29, %v47_v33 }
  0x20   :  { %v51_v39 = vadd.f32 %v47_v33, %v41_v30  ;;  %v68_v40 = vadd.f32 %v64_v31, %v47_v33  ;;  %v52_v41 = vadd.f32 %v47_v33, %v42_v32  ;;  %v69_v42 = vadd.f32 %v65_v34, %v47_v33 }
  0x21   :  { %v53_v43 = vmax.f32 %v49_v35, 0.0  ;;  %v70_v44 = vmax.f32 %v66_v36, 0.0  ;;  %v54_v45 = vmax.f32 %v50_v37, 0.0  ;;  %v71_v46 = vmax.f32 %v67_v38, 0.0 }
  0x22   :  { %v55_v47 = vmax.f32 %v51_v39, 0.0  ;;  %v72_v48 = vmax.f32 %v68_v40, 0.0  ;;  %v56_v49 = vmax.f32 %v52_v41, 0.0  ;;  %v73_v50 = vmax.f32 %v69_v42, 0.0 }
  0x23   :  { %v74_v51 = vmax.f32 %v53_v43, %v70_v44  ;;  %v75_v52 = vmax.f32 %v54_v45, %v71_v46 }
  0x24   :  { %v76_v53 = vmax.f32 %v55_v47, %v72_v48  ;;  %v77_v54 = vmax.f32 %v56_v49, %v73_v50 }
  0x25   :  { %v111_v55 = vpack.c.bf16 %v74_v51, %v74_v51  ;;  %v112_v56 = vpack.c.bf16 %v75_v52, %v75_v52 }
  0x26   :  { %v113_v57 = vpack.c.bf16 %v76_v53, %v76_v53  ;;  %v114_v58 = vpack.c.bf16 %v77_v54, %v77_v54 }
  0x27   :  { %95 = vst.msk [vmem:[%s194_s4] sm:$0xf] %vm94_vm0, %v111_v55  ;;  %96 = vst.msk [vmem:[%s194_s4 + $0x4] sm:$0xf] %vm94_vm0, %v112_v56 }
  0x28   :  { %97 = vst.msk [vmem:[%s194_s4 + $0x8] sm:$0xf] %vm94_vm0, %v113_v57  ;;  %98 = vst.msk [vmem:[%s194_s4 + $0xc] sm:$0xf] %vm94_vm0, %v114_v58 }

// kernel: encoder_forward.10
= control target key start
LH: loop header
LB: loop body
LE: loop exit
PB: predicated region body
PF: predicated region fallthrough
CT: control target
= control target key end

     0   :  { %vm66_vm0 = vcmask 1045504   ;;  %vm59_vm1 = vcmask 228352   ;;  %vm21_vm2 = vcmask 189440   ;;  %v327_v7 = vmov 0.0   ;;  %s433_s1 = inlined_call_operand.vmem [shape: bf16[28,24], index: 1, kind: input, shape index: {}]   ;;  %s434_s0 = inlined_call_operand.vmem [shape: bf16[2,32,28], index: 0, kind: input, shape index: {}]   ;;  %s435_s4 = inlined_call_operand.vmem [shape: f32[2,24], index: 4, kind: output, shape index: {1}]   ;;  %s436_s2 = inlined_call_operand.vmem [shape: f32[1,24], index: 2, kind: input, shape index: {}]   ;;  %s437_s3 = inlined_call_operand.vmem [shape: f32[2,32,24], index: 3, kind: output, shape index: {0}]  }
   0x1   :  { %v321_v0 = vld [vmem:[%s433_s1] sm:$0xff]   ;;  %v322_v1 = vld [vmem:[%s433_s1 + $0x8] sm:$0x3f]   ;;  %v324_v3 = vld [vmem:[%s434_s0 + $0x10] sm:$0xff]   ;;  %22 = vst.msk [vmem:[%s435_s4] sm:$0x3] %vm21_vm2, %v327_v7 }
   0x2   :  { %302 = vmatprep.subr.bf16.mxu0 %v321_v0  ;;  %310 = vmatprep.subr.bf16.mxu1 %v321_v0  ;;  %v323_v2 = vld [vmem:[%s434_s0] sm:$0xff]   ;;  %v68_v4 = vsel %vm66_vm0, %v322_v1, 0  ;;  %v325_v5 = vld [vmem:[%s434_s0 + $0x8] sm:$0xff]   ;;  %v326_v6 = vld [vmem:[%s434_s0 + $0x18] sm:$0xff]   ;;  %vm189_vm3 = vcmask 195584   ;;  %vm262_vm4 = vcmask 1040384  }
   0x3   :  { %303 = vmatpush3.bf16.msra.mxu0 %v321_v0  ;;  %311 = vmatpush3.bf16.msra.mxu1 %v321_v0  ;;  %v275_v8 = vld [vmem:[%s436_s2] ss:$0 sm:$0xff] }
   0x4   :  { %318 = vmatprep.subr.msk.bf16.mxu0 %vm66_vm0, %v322_v1  ;;  %319 = vmatprep.subr.msk.bf16.mxu1 %vm66_vm0, %v322_v1 }
   0x5   :  { %306 = vmatprep.mubr.msk.bf16.mxu0 %vm59_vm1, %v323_v2  ;;  %314 = vmatprep.mubr.msk.bf16.mxu1 %vm59_vm1, %v324_v3 }
   0x7   :  { %305 = vmatpush3.bf16.msra.mxu0 %v68_v4  ;;  %313 = vmatpush3.bf16.msra.mxu1 %v68_v4 }
   0xa   :  { %307 = vmatmul.mubr.msk.bf16.vlgmr.msra.gmra.mrb[0].mxu0 %vm59_vm1, %v325_v5  ;;  %315 = vmatmul.mubr.msk.bf16.vlgmr.msra.gmra.mrb[0].mxu1 %vm59_vm1, %v326_v6 }
  0xdd   :  { %v308_v9 = vpop.f32.mrb[0].mxu0  ;;  %v316_v10 = vpop.f32.mrb[0].mxu1 }
  0xde   :  { %v113_v11 = vadd.f32 %v308_v9, %v275_v8  ;;  %v183_v12 = vadd.f32 %v316_v10, %v275_v8  ;;  %v104_v13 = vpop.f32.mrb[1].mxu0  ;;  %v174_v14 = vpop.f32.mrb[1].mxu1 }
  0xdf   :  { %v105_v15 = vadd.f32 %v275_v8, %v104_v13  ;;  %v175_v16 = vadd.f32 %v275_v8, %v174_v14  ;;  %v309_v17 = vpop.f32.mrb[2].mxu0  ;;  %v317_v18 = vpop.f32.mrb[2].mxu1 }
  0xe0   :  { %192 = vst.msk [vmem:[%s437_s3 + $0x10] sm:$0xff] %vm189_vm3, %v113_v11  ;;  %292 = vst.msk [vmem:[%s437_s3 + $0x30] sm:$0xff] %vm189_vm3, %v183_v12  ;;  %v107_v19 = vpop.f32.mrb[3].mxu0  ;;  %v177_v20 = vpop.f32.mrb[3].mxu1  ;;  %v116_v23 = vadd.f32 %v309_v17, %v275_v8  ;;  %v186_v24 = vadd.f32 %v317_v18, %v275_v8  ;;  %v202_v25 = vsel %vm189_vm3, %v113_v11, 0.0  ;;  %v228_v26 = vmul.f32 %v113_v11, %v113_v11 }
  0xe1   :  { %190 = vst.msk [vmem:[%s437_s3] sm:$0xff] %vm189_vm3, %v105_v15  ;;  %290 = vst.msk [vmem:[%s437_s3 + $0x20] sm:$0xff] %vm189_vm3, %v175_v16  ;;  %v226_v21 = vmul.f32 %v105_v15, %v105_v15  ;;  %v243_v22 = vmul.f32 %v175_v16, %v175_v16  ;;  %v108_v27 = vadd.f32 %v275_v8, %v107_v19  ;;  %v215_v29 = vsel %vm189_vm3, %v183_v12, 0.0 }
  0xe2   :  { %v178_v28 = vadd.f32 %v275_v8, %v177_v20  ;;  %v245_v30 = vmul.f32 %v183_v12, %v183_v12  ;;  %v199_v31 = vsel %vm189_vm3, %v105_v15, 0.0  ;;  %v212_v32 = vsel %vm189_vm3, %v175_v16, 0.0  ;;  %193 = vst.msk [vmem:[%s437_s3 + $0x18] sm:$0xff] %vm189_vm3, %v116_v23  ;;  %293 = vst.msk [vmem:[%s437_s3 + $0x38] sm:$0xff] %vm189_vm3, %v186_v24 }
  0xe3   :  { %191 = vst.msk [vmem:[%s437_s3 + $0x8] sm:$0xff] %vm189_vm3, %v108_v27  ;;  %v200_v33 = vsel %vm189_vm3, %v108_v27, 0.0  ;;  %v227_v34 = vmul.f32 %v108_v27, %v108_v27  ;;  %v230_v37 = vsel %vm189_vm3, %v226_v21, 0.0  ;;  %v247_v38 = vsel %vm189_vm3, %v243_v22, 0.0 }
  0xe4   :  { %291 = vst.msk [vmem:[%s437_s3 + $0x28] sm:$0xff] %vm189_vm3, %v178_v28  ;;  %v213_v35 = vsel %vm189_vm3, %v178_v28, 0.0  ;;  %v244_v36 = vmul.f32 %v178_v28, %v178_v28  ;;  %v201_v39 = vadd.f32 %v200_v33, %v199_v31  ;;  %v229_v41 = vmul.f32 %v116_v23, %v116_v23 }
  0xe5   :  { %v214_v40 = vadd.f32 %v213_v35, %v212_v32  ;;  %v246_v42 = vmul.f32 %v186_v24, %v186_v24  ;;  %v231_v43 = vsel %vm189_vm3, %v227_v34, 0.0  ;;  %v233_v49 = vsel %vm189_vm3, %v228_v26, 0.0 }
  0xe6   :  { %v248_v44 = vsel %vm189_vm3, %v244_v36, 0.0  ;;  %v203_v45 = vadd.f32 %v202_v25, %v201_v39  ;;  %v232_v46 = vadd.f32 %v231_v43, %v230_v37  ;;  %v250_v50 = vsel %vm189_vm3, %v245_v30, 0.0 }
  0xe7   :  { %v216_v47 = vadd.f32 %v215_v29, %v214_v40  ;;  %v249_v48 = vadd.f32 %v248_v44, %v247_v38  ;;  %v204_v51 = vsel %vm189_vm3, %v116_v23, 0.0  ;;  %v217_v52 = vsel %vm189_vm3, %v186_v24, 0.0  ;;  %v261_v23 = vld [vmem:[%s435_s4] sm:$0x3] }
  0xe8   :  { %v205_v53 = vadd.f32 %v204_v51, %v203_v45  ;;  %v234_v54 = vadd.f32 %v233_v49, %v232_v46  ;;  %v235_v57 = vsel %vm189_vm3, %v229_v41, 0.0  ;;  %v252_v58 = vsel %vm189_vm3, %v246_v42, 0.0 }
  0xe9   :  { %v218_v55 = vadd.f32 %v217_v52, %v216_v47  ;;  %v251_v56 = vadd.f32 %v250_v50, %v249_v48 }
  0xea   :  { %v206_v59 = vrot.slane %v205_v53, 4  ;;  %v236_v60 = vadd.f32 %v235_v57, %v234_v54 }
  0xeb   :  { %v219_v61 = vrot.slane %v218_v55, 4  ;;  %v253_v62 = vadd.f32 %v252_v58, %v251_v56 }
  0xec   :  { %v207_v63 = vadd.f32 %v206_v59, %v205_v53  ;;  %v237_v0 = vrot.slane %v236_v60, 4 }
  0xed   :  { %v220_v1 = vadd.f32 %v219_v61, %v218_v55  ;;  %v254_v2 = vrot.slane %v253_v62, 4 }
  0xee   :  { %v208_v3 = vrot.slane %v207_v63, 2  ;;  %v238_v4 = vadd.f32 %v237_v0, %v236_v60 }
  0xef   :  { %v221_v5 = vrot.slane %v220_v1, 2  ;;  %v255_v6 = vadd.f32 %v254_v2, %v253_v62 }
  0xf0   :  { %v209_v7 = vadd.f32 %v208_v3, %v207_v63  ;;  %v239_v8 = vrot.slane %v238_v4, 2 }
  0xf1   :  { %v222_v9 = vadd.f32 %v221_v5, %v220_v1  ;;  %v256_v10 = vrot.slane %v255_v6, 2 }
  0xf2   :  { %v210_v11 = vrot.slane %v209_v7, 1  ;;  %v240_v12 = vadd.f32 %v239_v8, %v238_v4 }
  0xf3   :  { %v223_v13 = vrot.slane %v222_v9, 1  ;;  %v257_v14 = vadd.f32 %v256_v10, %v255_v6 }
  0xf4   :  { %v211_v15 = vadd.f32 %v210_v11, %v209_v7  ;;  %v241_v16 = vrot.slane %v240_v12, 1 }
  0xf5   :  { %v224_v17 = vadd.f32 %v223_v13, %v222_v9  ;;  %v258_v18 = vrot.slane %v257_v14, 1 }
  0xf6   :  { %v242_v19 = vadd.f32 %v241_v16, %v240_v12 }
  0xf7   :  { %v225_v20 = vadd.f32 %v224_v17, %v211_v15  ;;  %v259_v21 = vadd.f32 %v258_v18, %v257_v14 }
  0xf9   :  { %v260_v22 = vadd.f32 %v259_v21, %v242_v19 }
  0xfb   :  { %v263_v24 = vsel %vm262_vm4, %v225_v20, %v260_v22 }
  0xfc   :  { %v264_v25 = vadd.f32 %v263_v24, %v261_v23 }
  0xfe   :  { %266 = vst.msk [vmem:[%s435_s4] sm:$0x3] %vm21_vm2, %v264_v25 }

// kernel: encoder_forward.12
= control target key start
LH: loop header
LB: loop body
LE: loop exit
PB: predicated region body
PF: predicated region fallthrough
CT: control target
= control target key end

     0   :  { %v333_v0 = vmov 0   ;;  %vm125_vm0 = vcmask 326656   ;;  %vm129_vm1 = vcmask 1043456   ;;  %vm21_vm2 = vcmask 386048   ;;  %s443_s1 = inlined_call_operand.vmem [shape: bf16[168,48], index: 1, kind: input, shape index: {}]   ;;  %s444_s0 = inlined_call_operand.vmem [shape: bf16[2,16,168], index: 0, kind: input, shape index: {}]   ;;  %s445_s4 = inlined_call_operand.vmem [shape: f32[2,48], index: 4, kind: output, shape index: {1}]   ;;  %s446_s2 = inlined_call_operand.vmem [shape: f32[1,48], index: 2, kind: input, shape index: {}]   ;;  %s447_s3 = inlined_call_operand.vmem [shape: f32[2,16,48], index: 3, kind: output, shape index: {0}]  }
   0x1   :  { %133 = vmatprep.subr.bf16.mxu0 %v333_v0  ;;  %189 = vmatprep.subr.bf16.mxu1 %v333_v0  ;;  %v316_v1 = vld [vmem:[%s443_s1] sm:$0xff]   ;;  %v317_v2 = vld [vmem:[%s443_s1 + $0x8] sm:$0xff]   ;;  %v318_v3 = vld [vmem:[%s443_s1 + $0x10] sm:$0xff]   ;;  %v334_v17 = vmov 0.0   ;;  %vm230_vm3 = vcmask 392192   ;;  %vm279_vm4 = vcmask 1040384  }
   0x2   :  { %134 = vmatpush1.bf16.msra.mxu0 %v316_v1  ;;  %190 = vmatpush1.bf16.msra.mxu1 %v316_v1  ;;  %v319_v4 = vld [vmem:[%s443_s1 + $0x18] sm:$0xff]   ;;  %v329_v5 = vld [vmem:[%s444_s0 + $0x4] ss:$8 sps:$4 sm:$0xff]   ;;  %v322_v9 = vld [vmem:[%s443_s1 + $0x30] sm:$0xff]   ;;  %22 = vst.msk [vmem:[%s445_s4] sm:$0x3] %vm21_vm2, %v334_v17 }
   0x3   :  { %135 = vmatprep.subr.bf16.mxu0 %v333_v0  ;;  %191 = vmatprep.subr.bf16.mxu1 %v333_v0  ;;  %v332_v6 = vld [vmem:[%s444_s0 + $0x14] ss:$8 sps:$4 sm:$0xff]   ;;  %v320_v7 = vld [vmem:[%s443_s1 + $0x20] sm:$0xff]   ;;  %v321_v8 = vld [vmem:[%s443_s1 + $0x28] sm:$0xff]  }
   0x4   :  { %306 = vmatprep.mubr.msk.bf16.mxu0 %vm125_vm0, %v329_v5  ;;  %311 = vmatprep.mubr.msk.bf16.mxu1 %vm125_vm0, %v332_v6  ;;  %v323_v10 = vld [vmem:[%s443_s1 + $0x38] sm:$0xff]   ;;  %v324_v11 = vld [vmem:[%s443_s1 + $0x40] sm:$0xff]   ;;  %v325_v12 = vld [vmem:[%s443_s1 + $0x48] sm:$0xff]  }
   0x5   :  { %v326_v13 = vld [vmem:[%s443_s1 + $0x50] ss:$0 sps:$4 sm:$0xff]   ;;  %v327_v15 = vld [vmem:[%s444_s0] ss:$8 sps:$4 sm:$0xff]  }
   0x6   :  { %136 = vmatpush1.bf16.msra.mxu0 %v317_v2  ;;  %192 = vmatpush1.bf16.msra.mxu1 %v317_v2  ;;  %v131_v14 = vsel %vm129_vm1, %v326_v13, 0  ;;  %v330_v16 = vld [vmem:[%s444_s0 + $0x10] ss:$8 sps:$4 sm:$0xff]   ;;  %v292_v18 = vld [vmem:[%s446_s2] ss:$0 sm:$0xff] }
   0x7   :  { %137 = vmatprep.subr.bf16.mxu0 %v333_v0  ;;  %193 = vmatprep.subr.bf16.mxu1 %v333_v0 }
   0xa   :  { %138 = vmatpush1.bf16.msra.mxu0 %v318_v3  ;;  %194 = vmatpush1.bf16.msra.mxu1 %v318_v3 }
   0xb   :  { %139 = vmatprep.subr.bf16.mxu0 %v333_v0  ;;  %195 = vmatprep.subr.bf16.mxu1 %v333_v0 }
   0xe   :  { %140 = vmatpush1.bf16.msra.mxu0 %v319_v4  ;;  %196 = vmatpush1.bf16.msra.mxu1 %v319_v4 }
   0xf   :  { %141 = vmatprep.subr.bf16.mxu0 %v333_v0  ;;  %197 = vmatprep.subr.bf16.mxu1 %v333_v0 }
  0x12   :  { %142 = vmatpush1.bf16.msra.mxu0 %v320_v7  ;;  %198 = vmatpush1.bf16.msra.mxu1 %v320_v7 }
  0x13   :  { %143 = vmatprep.subr.bf16.mxu0 %v333_v0  ;;  %199 = vmatprep.subr.bf16.mxu1 %v333_v0 }
  0x16   :  { %144 = vmatpush1.bf16.msra.mxu0 %v321_v8  ;;  %200 = vmatpush1.bf16.msra.mxu1 %v321_v8 }
  0x17   :  { %145 = vmatprep.subr.bf16.mxu0 %v333_v0  ;;  %201 = vmatprep.subr.bf16.mxu1 %v333_v0 }
  0x1a   :  { %146 = vmatpush1.bf16.msra.mxu0 %v322_v9  ;;  %202 = vmatpush1.bf16.msra.mxu1 %v322_v9  ;;  %v278_v9 = vld [vmem:[%s445_s4] sm:$0x3] }
  0x1b   :  { %147 = vmatprep.subr.bf16.mxu0 %v333_v0  ;;  %203 = vmatprep.subr.bf16.mxu1 %v333_v0 }
  0x1e   :  { %148 = vmatpush1.bf16.msra.mxu0 %v323_v10  ;;  %204 = vmatpush1.bf16.msra.mxu1 %v323_v10 }
  0x1f   :  { %149 = vmatprep.subr.bf16.mxu0 %v333_v0  ;;  %205 = vmatprep.subr.bf16.mxu1 %v333_v0 }
  0x22   :  { %150 = vmatpush1.bf16.msra.mxu0 %v324_v11  ;;  %206 = vmatpush1.bf16.msra.mxu1 %v324_v11 }
  0x23   :  { %151 = vmatprep.subr.bf16.mxu0 %v333_v0  ;;  %207 = vmatprep.subr.bf16.mxu1 %v333_v0 }
  0x26   :  { %152 = vmatpush1.bf16.msra.mxu0 %v325_v12  ;;  %208 = vmatpush1.bf16.msra.mxu1 %v325_v12 }
  0x27   :  { %153 = vmatprep.subr.bf16.mxu0 %v333_v0  ;;  %209 = vmatprep.subr.bf16.mxu1 %v333_v0 }
  0x2a   :  { %154 = vmatpush1.bf16.msra.mxu0 %v131_v14  ;;  %210 = vmatpush1.bf16.msra.mxu1 %v131_v14 }
  0x2d   :  { %166 = vmatmul.mubr.bf16.vlgmr.msra.gmra.mrb[0].mxu0 %v327_v15  ;;  %222 = vmatmul.mubr.bf16.vlgmr.msra.gmra.mrb[0].mxu1 %v330_v16 }
 0x100   :  { %v167_v19 = vpop.f32.mrb[0].mxu0  ;;  %v223_v20 = vpop.f32.mrb[0].mxu1 }
 0x101   :  { %v168_v21 = vadd.f32 %v292_v18, %v167_v19  ;;  %v224_v22 = vadd.f32 %v292_v18, %v223_v20  ;;  %v169_v23 = vpop.f32.mrb[1].mxu0  ;;  %v225_v24 = vpop.f32.mrb[1].mxu1 }
 0x102   :  { %v170_v25 = vpop.f32.mrb[2].mxu0  ;;  %v226_v26 = vpop.f32.mrb[2].mxu1 }
 0x103   :  { %231 = vst.msk [vmem:[%s447_s3] sm:$0xff] %vm230_vm3, %v168_v21  ;;  %312 = vst.msk [vmem:[%s447_s3 + $0x10] sm:$0xff] %vm230_vm3, %v224_v22  ;;  %v172_v27 = vpop.f32.mrb[3].mxu0  ;;  %v228_v28 = vpop.f32.mrb[3].mxu1  ;;  %v255_v29 = vmul.f32 %v168_v21, %v168_v21  ;;  %v266_v30 = vmul.f32 %v224_v22, %v224_v22  ;;  %v171_v31 = vadd.f32 %v292_v18, %v170_v25  ;;  %v236_v33 = vsel %vm230_vm3, %v168_v21, 0.0 }
 0x104   :  { %v227_v32 = vadd.f32 %v292_v18, %v226_v26  ;;  %v245_v34 = vsel %vm230_vm3, %v224_v22, 0.0 }
 0x105   :  { %232 = vst.msk [vmem:[%s447_s3 + $0x8] sm:$0xff] %vm230_vm3, %v171_v31  ;;  %v237_v35 = vsel %vm230_vm3, %v171_v31, 0.0  ;;  %v256_v36 = vmul.f32 %v171_v31, %v171_v31  ;;  %v257_v41 = vsel %vm230_vm3, %v255_v29, 0.0  ;;  %v268_v42 = vsel %vm230_vm3, %v266_v30, 0.0 }
 0x106   :  { %313 = vst.msk [vmem:[%s447_s3 + $0x18] sm:$0xff] %vm230_vm3, %v227_v32  ;;  %v246_v37 = vsel %vm230_vm3, %v227_v32, 0.0  ;;  %v267_v38 = vmul.f32 %v227_v32, %v227_v32  ;;  %v238_v39 = vadd.f32 %v237_v35, %v236_v33 }
 0x107   :  { %v247_v40 = vadd.f32 %v246_v37, %v245_v34  ;;  %v258_v43 = vsel %vm230_vm3, %v256_v36, 0.0 }
 0x108   :  { %v269_v44 = vsel %vm230_vm3, %v267_v38, 0.0  ;;  %v239_v45 = vrot.slane %v238_v39, 4  ;;  %v259_v46 = vadd.f32 %v258_v43, %v257_v41 }
 0x109   :  { %v248_v47 = vrot.slane %v247_v40, 4  ;;  %v270_v48 = vadd.f32 %v269_v44, %v268_v42 }
 0x10a   :  { %v240_v49 = vadd.f32 %v239_v45, %v238_v39  ;;  %v260_v50 = vrot.slane %v259_v46, 4 }
 0x10b   :  { %v249_v51 = vadd.f32 %v248_v47, %v247_v40  ;;  %v271_v52 = vrot.slane %v270_v48, 4 }
 0x10c   :  { %v241_v53 = vrot.slane %v240_v49, 2  ;;  %v261_v54 = vadd.f32 %v260_v50, %v259_v46 }
 0x10d   :  { %v250_v55 = vrot.slane %v249_v51, 2  ;;  %v272_v56 = vadd.f32 %v271_v52, %v270_v48 }
 0x10e   :  { %v242_v57 = vadd.f32 %v241_v53, %v240_v49  ;;  %v262_v58 = vrot.slane %v261_v54, 2 }
 0x10f   :  { %v251_v59 = vadd.f32 %v250_v55, %v249_v51  ;;  %v273_v60 = vrot.slane %v272_v56, 2 }
 0x110   :  { %v243_v61 = vrot.slane %v242_v57, 1  ;;  %v263_v62 = vadd.f32 %v262_v58, %v261_v54 }
 0x111   :  { %v252_v63 = vrot.slane %v251_v59, 1  ;;  %v274_v0 = vadd.f32 %v273_v60, %v272_v56 }
 0x112   :  { %v244_v1 = vadd.f32 %v243_v61, %v242_v57  ;;  %v264_v2 = vrot.slane %v263_v62, 1 }
 0x113   :  { %v253_v3 = vadd.f32 %v252_v63, %v251_v59  ;;  %v275_v4 = vrot.slane %v274_v0, 1 }
 0x114   :  { %v265_v5 = vadd.f32 %v264_v2, %v263_v62 }
 0x115   :  { %v254_v6 = vadd.f32 %v253_v3, %v244_v1  ;;  %v276_v7 = vadd.f32 %v275_v4, %v274_v0 }
 0x117   :  { %v277_v8 = vadd.f32 %v276_v7, %v265_v5 }
 0x119   :  { %v280_v10 = vsel %vm279_vm4, %v254_v6, %v277_v8 }
 0x11a   :  { %v281_v11 = vadd.f32 %v280_v10, %v278_v9 }
 0x11c   :  { %283 = vst.msk [vmem:[%s445_s4] sm:$0x3] %vm21_vm2, %v281_v11 }

// kernel: encoder_forward.13
= control target key start
LH: loop header
LB: loop body
LE: loop exit
PB: predicated region body
PF: predicated region fallthrough
CT: control target
= control target key end

     0   :  { %v33_v8 = vlaneseq  ;;  %vm68_vm0 = vcmask 388096   ;;  %s138_s1 = inlined_call_operand.vmem [shape: f32[2,48], index: 1, kind: input, shape index: {}]   ;;  %s139_s2 = inlined_call_operand.vmem [shape: f32[1,48], index: 2, kind: input, shape index: {}]   ;;  %s140_s3 = inlined_call_operand.vmem [shape: f32[1,48], index: 3, kind: input, shape index: {}]   ;;  %s141_s0 = inlined_call_operand.vmem [shape: f32[2,16,48], index: 0, kind: input, shape index: {}]   ;;  %s142_s4 = inlined_call_operand.vmem [shape: bf16[16,48], index: 4, kind: output, shape index: {}]  }
   0x1   :  { %v17_v0 = vld [vmem:[%s138_s1] sm:$0x1]  ;;  %v19_v1 = vld [vmem:[%s138_s1 + $0x1] sm:$0x1]  ;;  %v75_v16 = vld [vmem:[%s141_s0 + $0x10] sm:$0xff] }
   0x2   :  { %v18_v2 = vmul.f32 0.03125, %v17_v0  ;;  %v20_v3 = vmul.f32 0.03125, %v19_v1  ;;  %v34_v9 = vshrl.u32 %v33_v8, 7  ;;  %v26_v10 = vld [vmem:[%s139_s2] sm:$0x1]  ;;  %v32_v17 = vld [vmem:[%s141_s0 + $0x8] sm:$0xff] }
   0x3   :  { %v28_v14 = vld [vmem:[%s140_s3] sm:$0x1]  ;;  %v76_v20 = vld [vmem:[%s141_s0 + $0x18] sm:$0xff] }
   0x4   :  { %v21_v4 = vmul.f32 %v18_v2, %v18_v2  ;;  %v35_v11 = vsub.s32 0, %v34_v9  ;;  %v31_v15 = vld [vmem:[%s141_s0] sm:$0xff] }
   0x6   :  { %v22_v5 = vsub.f32 %v20_v3, %v21_v4 }
   0x8   :  { %v23_v6 = vmax.f32 %v22_v5, 0.0 }
   0xa   :  { %v24_v7 = vadd.f32 1e-05, %v23_v6 }
   0xc   :  { %81 = vrsqrt.f32 %v24_v7 }
  0x16   :  { %v82_v12 = vpop.eup %81 }
  0x17   :  { %v27_v13 = vmul.f32 %v82_v12, %v26_v10 }
  0x19   :  { %v29_v18 = vmul.f32 %v27_v13, %v18_v2  ;;  %v36_v19 = vrot.slane %v27_v13, %v35_v11 }
  0x1b   :  { %v30_v21 = vsub.f32 %v28_v14, %v29_v18  ;;  %v37_v22 = vmul.f32 %v36_v19, %v31_v15  ;;  %v52_v23 = vmul.f32 %v75_v16, %v36_v19  ;;  %v38_v24 = vmul.f32 %v36_v19, %v32_v17 }
  0x1c   :  { %v53_v25 = vmul.f32 %v76_v20, %v36_v19 }
  0x1d   :  { %v43_v26 = vrot.slane %v30_v21, %v35_v11 }
  0x1f   :  { %v45_v27 = vadd.f32 %v43_v26, %v37_v22  ;;  %v54_v28 = vadd.f32 %v52_v23, %v43_v26  ;;  %v46_v29 = vadd.f32 %v43_v26, %v38_v24  ;;  %v55_v30 = vadd.f32 %v53_v25, %v43_v26 }
  0x21   :  { %v47_v31 = vmax.f32 %v45_v27, 0.0  ;;  %v56_v32 = vmax.f32 %v54_v28, 0.0  ;;  %v48_v33 = vmax.f32 %v46_v29, 0.0  ;;  %v57_v34 = vmax.f32 %v55_v30, 0.0 }
  0x23   :  { %v58_v35 = vmax.f32 %v47_v31, %v56_v32  ;;  %v59_v36 = vmax.f32 %v48_v33, %v57_v34 }
  0x25   :  { %v79_v37 = vpack.c.bf16 %v58_v35, %v58_v35  ;;  %v80_v38 = vpack.c.bf16 %v59_v36, %v59_v36 }
  0x27   :  { %69 = vst.msk [vmem:[%s142_s4] sm:$0xf] %vm68_vm0, %v79_v37  ;;  %70 = vst.msk [vmem:[%s142_s4 + $0x4] sm:$0xf] %vm68_vm0, %v80_v38 }

// kernel: encoder_forward.15
= control target key start
LH: loop header
LB: loop body
LE: loop exit
PB: predicated region body
PF: predicated region fallthrough
CT: control target
= control target key end

     0   :  { %v32_v8 = vlaneseq  ;;  %vm52_vm0 = vcmask 781312   ;;  %s107_s1 = inlined_call_operand.vmem [shape: f32[2,96], index: 1, kind: input, shape index: {}]   ;;  %s108_s2 = inlined_call_operand.vmem [shape: f32[1,96], index: 2, kind: input, shape index: {}]   ;;  %s109_s0 = inlined_call_operand.vmem [shape: f32[2,8,96], index: 0, kind: input, shape index: {}]   ;;  %s110_s3 = inlined_call_operand.vmem [shape: f32[1,96], index: 3, kind: input, shape index: {}]   ;;  %s111_s4 = inlined_call_operand.vmem [shape: bf16[8,96], index: 4, kind: output, shape index: {}]  }
   0x1   :  { %v17_v0 = vld [vmem:[%s107_s1] sm:$0x1]  ;;  %v19_v1 = vld [vmem:[%s107_s1 + $0x1] sm:$0x1]  ;;  %v58_v16 = vld [vmem:[%s109_s0 + $0x8] sm:$0xff] }
   0x2   :  { %v18_v2 = vmul.f32 0.0625, %v17_v0  ;;  %v20_v3 = vmul.f32 0.0625, %v19_v1  ;;  %v33_v9 = vshrl.u32 %v32_v8, 7  ;;  %v26_v10 = vld [vmem:[%s108_s2] sm:$0x1] }
   0x3   :  { %v28_v14 = vld [vmem:[%s110_s3] sm:$0x1] }
   0x4   :  { %v21_v4 = vmul.f32 %v18_v2, %v18_v2  ;;  %v34_v11 = vsub.s32 0, %v33_v9  ;;  %v31_v15 = vld [vmem:[%s109_s0] sm:$0xff] }
   0x6   :  { %v22_v5 = vsub.f32 %v20_v3, %v21_v4 }
   0x8   :  { %v23_v6 = vmax.f32 %v22_v5, 0.0 }
   0xa   :  { %v24_v7 = vadd.f32 1e-05, %v23_v6 }
   0xc   :  { %59 = vrsqrt.f32 %v24_v7 }
  0x16   :  { %v60_v12 = vpop.eup %59 }
  0x17   :  { %v27_v13 = vmul.f32 %v60_v12, %v26_v10 }
  0x19   :  { %v29_v17 = vmul.f32 %v27_v13, %v18_v2  ;;  %v35_v18 = vrot.slane %v27_v13, %v34_v11 }
  0x1b   :  { %v30_v19 = vsub.f32 %v28_v14, %v29_v17  ;;  %v36_v20 = vmul.f32 %v35_v18, %v31_v15  ;;  %v47_v21 = vmul.f32 %v58_v16, %v35_v18 }
  0x1d   :  { %v41_v22 = vrot.slane %v30_v19, %v34_v11 }
  0x1f   :  { %v43_v23 = vadd.f32 %v41_v22, %v36_v20  ;;  %v48_v24 = vadd.f32 %v47_v21, %v41_v22 }
  0x21   :  { %v44_v25 = vmax.f32 %v43_v23, 0.0  ;;  %v49_v26 = vmax.f32 %v48_v24, 0.0 }
  0x23   :  { %v50_v27 = vmax.f32 %v44_v25, %v49_v26 }
  0x25   :  { %v51_v28 = vpack.c.bf16 %v50_v27, %v50_v27 }
  0x27   :  { %53 = vst.msk [vmem:[%s111_s4] sm:$0xf] %vm52_vm0, %v51_v28 }

// kernel: encoder_forward.14
= control target key start
LH: loop header
LB: loop body
LE: loop exit
PB: predicated region body
PF: predicated region fallthrough
CT: control target
= control target key end

     0   :  { %v586_v0 = vmov 0.0   ;;  %vm587_vm0 = vmmov 0   ;;  %vm210_vm1 = vcmask 654336   ;;  %vm21_vm2 = vcmask 779264   ;;  %s739_s1 = inlined_call_operand.vmem [shape: bf16[336,96], index: 1, kind: input, shape index: {}]   ;;  %s740_s0 = inlined_call_operand.vmem [shape: bf16[2,8,336], index: 0, kind: input, shape index: {}]   ;;  %s741_s4 = inlined_call_operand.vmem [shape: f32[2,96], index: 4, kind: output, shape index: {1}]   ;;  %s742_s2 = inlined_call_operand.vmem [shape: f32[1,96], index: 2, kind: input, shape index: {}]   ;;  %s743_s3 = inlined_call_operand.vmem [shape: f32[2,8,96], index: 3, kind: output, shape index: {0}]  }
   0x1   :  { %529 = vmatprep.subr.bf16.mxu1 %v586_v0  ;;  %v559_v1 = vld [vmem:[%s739_s1 + $0x40] sm:$0xff]   ;;  %539 = vmatprep.mubr.msk.bf16.mxu1 %vm587_vm0, %v586_v0  ;;  %v562_v4 = vld [vmem:[%s739_s1 + $0x48] sm:$0xff]   ;;  %v565_v7 = vld [vmem:[%s739_s1 + $0x50] sm:$0xff]   ;;  %22 = vst.msk [vmem:[%s741_s4] sm:$0x3] %vm21_vm2, %v586_v0  ;;  %vm390_vm3 = vcmask 785408  }
   0x2   :  { %v622_v2 = vld [vmem:[%s739_s1 + $0x80] sm:$0xff]   ;;  %473 = vmatprep.subr.bf16.mxu0 %v559_v1  ;;  %v635_v5 = vld [vmem:[%s739_s1 + $0x88] sm:$0xff]   ;;  %v566_v8 = vld [vmem:[%s739_s1 + $0x90] sm:$0xff]   ;;  %vm427_vm4 = vcmask 1040384  }
   0x3   :  { %v561_v3 = vld [vmem:[%s739_s1] sm:$0xff]   ;;  %530 = vmatpush3.bf16.msra.mxu1 %v622_v2  ;;  %v564_v6 = vld [vmem:[%s739_s1 + $0x8] sm:$0xff]   ;;  %v567_v9 = vld [vmem:[%s739_s1 + $0x10] sm:$0xff]  }
   0x4   :  { %474 = vmatpush3.bf16.msra.mxu0 %v561_v3  ;;  %531 = vmatprep.subr.bf16.mxu1 %v586_v0  ;;  %v568_v10 = vld [vmem:[%s739_s1 + $0x58] sm:$0xff]   ;;  %v571_v13 = vld [vmem:[%s739_s1 + $0x60] sm:$0xff]   ;;  %v575_v16 = vld [vmem:[%s739_s1 + $0x68] sm:$0xff]  }
   0x5   :  { %475 = vmatprep.subr.bf16.mxu0 %v562_v4  ;;  %v569_v11 = vld [vmem:[%s739_s1 + $0x98] sm:$0xff]   ;;  %v572_v14 = vld [vmem:[%s739_s1 + $0xa0] sm:$0xff]   ;;  %v574_v17 = vld [vmem:[%s740_s0 + $0x8] ss:$0 sps:$4 sm:$0xff]  }
   0x6   :  { %v570_v12 = vld [vmem:[%s739_s1 + $0x18] sm:$0xff]   ;;  %v573_v15 = vld [vmem:[%s739_s1 + $0x20] sm:$0xff]   ;;  %v576_v18 = vld [vmem:[%s739_s1 + $0x28] sm:$0xff]  }
   0x7   :  { %532 = vmatpush3.bf16.msra.mxu1 %v635_v5  ;;  %v577_v19 = vld [vmem:[%s739_s1 + $0x70] sm:$0xff]   ;;  %v66_v20 = vld [vmem:[%s740_s0] sm:$0xff]  ;;  %v579_v25 = vld [vmem:[%s739_s1 + $0x78] sm:$0xff]  }
   0x8   :  { %476 = vmatpush3.bf16.msra.mxu0 %v564_v6  ;;  %533 = vmatprep.subr.bf16.mxu1 %v586_v0  ;;  %v442_v21 = vcombine.high %v66_v20, %v66_v20  ;;  %v466_v22 = vld [vmem:[%s740_s0 + $0xc] sm:$0xff]  ;;  %v580_v26 = vld [vmem:[%s739_s1 + $0x38] sm:$0xff]   ;;  %v441_v27 = vcombine.low %v66_v20, %v66_v20  ;;  %v585_v29 = vld [vmem:[%s740_s0 + $0x14] ss:$0 sps:$4 sm:$0xff]  }
   0x9   :  { %477 = vmatprep.subr.bf16.mxu0 %v565_v7  ;;  %v469_v23 = vcombine.high %v466_v22, %v466_v22  ;;  %v578_v24 = vld [vmem:[%s739_s1 + $0x30] sm:$0xff]   ;;  %v468_v28 = vcombine.low %v466_v22, %v466_v22  ;;  %v440_v35 = vld [vmem:[%s742_s2] ss:$0 sm:$0xff] }
   0xa   :  { %246 = vmatprep.mubr.bf16.mxu0 %v442_v21  ;;  %v426_v21 = vld [vmem:[%s741_s4] sm:$0x3] }
   0xb   :  { %534 = vmatpush3.bf16.msra.mxu1 %v566_v8 }
   0xc   :  { %478 = vmatpush3.bf16.msra.mxu0 %v567_v9  ;;  %535 = vmatprep.subr.bf16.mxu1 %v586_v0 }
   0xd   :  { %479 = vmatprep.subr.bf16.mxu0 %v568_v10 }
   0xf   :  { %536 = vmatpush3.bf16.msra.mxu1 %v569_v11 }
  0x10   :  { %480 = vmatpush3.bf16.msra.mxu0 %v570_v12  ;;  %537 = vmatprep.subr.bf16.mxu1 %v586_v0 }
  0x11   :  { %481 = vmatprep.subr.bf16.mxu0 %v571_v13 }
  0x13   :  { %538 = vmatpush3.bf16.msra.mxu1 %v572_v14 }
  0x14   :  { %482 = vmatpush3.bf16.msra.mxu0 %v573_v15  ;;  %501 = vmatprep.subr.bf16.mxu1 %v559_v1 }
  0x15   :  { %483 = vmatprep.subr.bf16.mxu0 %v575_v16 }
  0x16   :  { %540 = vmatmul.mubr.msk.bf16.vlgmr.msra.gmra.mrb[0].mxu1 %vm210_vm1, %v574_v17 }
  0x17   :  { %502 = vmatpush3.bf16.msra.mxu1 %v561_v3  ;;  %342 = vmatprep.mubr.bf16.mxu1 %v469_v23 }
  0x18   :  { %484 = vmatpush3.bf16.msra.mxu0 %v576_v18  ;;  %503 = vmatprep.subr.bf16.mxu1 %v562_v4 }
  0x19   :  { %485 = vmatprep.subr.bf16.mxu0 %v577_v19 }
  0x1b   :  { %504 = vmatpush3.bf16.msra.mxu1 %v564_v6 }
  0x1c   :  { %486 = vmatpush3.bf16.msra.mxu0 %v578_v24  ;;  %505 = vmatprep.subr.bf16.mxu1 %v565_v7 }
  0x1d   :  { %487 = vmatprep.subr.bf16.mxu0 %v579_v25 }
  0x1f   :  { %506 = vmatpush3.bf16.msra.mxu1 %v567_v9 }
  0x20   :  { %488 = vmatpush3.bf16.msra.mxu0 %v580_v26  ;;  %507 = vmatprep.subr.bf16.mxu1 %v568_v10 }
  0x21   :  { %543 = vmatprep.subr.bf16.mxu0 %v586_v0 }
  0x23   :  { %247 = vmatmul.mubr.bf16.vlgmr.msra.gmra.mrb[0].mxu0 %v441_v27  ;;  %508 = vmatpush3.bf16.msra.mxu1 %v570_v12 }
  0x24   :  { %544 = vmatpush3.bf16.msra.mxu0 %v622_v2  ;;  %509 = vmatprep.subr.bf16.mxu1 %v571_v13 }
  0x25   :  { %545 = vmatprep.subr.bf16.mxu0 %v586_v0  ;;  %553 = vmatprep.mubr.msk.bf16.mxu0 %vm587_vm0, %v586_v0 }
  0x27   :  { %510 = vmatpush3.bf16.msra.mxu1 %v573_v15 }
  0x28   :  { %546 = vmatpush3.bf16.msra.mxu0 %v635_v5  ;;  %511 = vmatprep.subr.bf16.mxu1 %v575_v16 }
  0x29   :  { %547 = vmatprep.subr.bf16.mxu0 %v586_v0 }
  0x2b   :  { %512 = vmatpush3.bf16.msra.mxu1 %v576_v18 }
  0x2c   :  { %548 = vmatpush3.bf16.msra.mxu0 %v566_v8  ;;  %513 = vmatprep.subr.bf16.mxu1 %v577_v19 }
  0x2d   :  { %549 = vmatprep.subr.bf16.mxu0 %v586_v0 }
  0x2f   :  { %514 = vmatpush3.bf16.msra.mxu1 %v578_v24 }
  0x30   :  { %550 = vmatpush3.bf16.msra.mxu0 %v569_v11  ;;  %515 = vmatprep.subr.bf16.mxu1 %v579_v25 }
  0x31   :  { %551 = vmatprep.subr.bf16.mxu0 %v586_v0 }
  0x33   :  { %516 = vmatpush3.bf16.msra.mxu1 %v580_v26 }
  0x34   :  { %552 = vmatpush3.bf16.msra.mxu0 %v572_v14 }
  0x36   :  { %343 = vmatmul.mubr.bf16.vlgmr.msra.gmra.mrb[4].mxu1 %v468_v28 }
  0x37   :  { %554 = vmatmul.mubr.msk.bf16.vlgmr.msra.gmra.mrb[4].mxu0 %vm210_vm1, %v585_v29 }
  0xe9   :  { %v288_v30 = vpop.f32.mrb[0].mxu1 }
  0xea   :  { %v541_v31 = vpop.f32.mrb[1].mxu1 }
  0xeb   :  { %v291_v32 = vpop.f32.mrb[2].mxu1 }
  0xec   :  { %v542_v33 = vpop.f32.mrb[3].mxu1 }
  0xf6   :  { %v489_v34 = vpop.f32.mrb[0].mxu0 }
  0xf7   :  { %v490_v36 = vpop.f32.mrb[1].mxu0 }
  0xf8   :  { %v491_v37 = vadd.f32 %v490_v36, %v489_v34  ;;  %v492_v38 = vpop.f32.mrb[2].mxu0 }
  0xf9   :  { %v493_v39 = vpop.f32.mrb[3].mxu0 }
  0xfa   :  { %v249_v40 = vadd.f32 %v491_v37, %v440_v35 }
  0xfc   :  { %v289_v41 = vadd.f32 %v288_v30, %v249_v40 }
  0xfe   :  { %391 = vst.msk [vmem:[%s743_s3] sm:$0xff] %vm390_vm3, %v289_v41  ;;  %v409_v42 = vmul.f32 %v289_v41, %v289_v41  ;;  %v394_v43 = vsel %vm390_vm3, %v289_v41, 0.0 }
  0xff   :  { %v395_v45 = vrot.slane %v394_v43, 4 }
 0x100   :  { %v410_v44 = vsel %vm390_vm3, %v409_v42, 0.0 }
 0x101   :  { %v411_v47 = vrot.slane %v410_v44, 4  ;;  %v396_v53 = vadd.f32 %v395_v45, %v394_v43 }
 0x103   :  { %v412_v58 = vadd.f32 %v411_v47, %v410_v44  ;;  %v397_v60 = vrot.slane %v396_v53, 2 }
 0x105   :  { %v413_v63 = vrot.slane %v412_v58, 2  ;;  %v398_v2 = vadd.f32 %v397_v60, %v396_v53 }
 0x107   :  { %v414_v5 = vadd.f32 %v413_v63, %v412_v58  ;;  %v399_v8 = vrot.slane %v398_v2, 1 }
 0x109   :  { %v517_v46 = vpop.f32.mrb[4].mxu1  ;;  %v415_v11 = vrot.slane %v414_v5, 1  ;;  %v400_v14 = vadd.f32 %v399_v8, %v398_v2 }
 0x10a   :  { %v518_v48 = vpop.f32.mrb[5].mxu1  ;;  %v384_v49 = vpop.f32.mrb[4].mxu0 }
 0x10b   :  { %v519_v50 = vadd.f32 %v518_v48, %v517_v46  ;;  %v520_v51 = vpop.f32.mrb[6].mxu1  ;;  %v555_v52 = vpop.f32.mrb[5].mxu0  ;;  %v416_v18 = vadd.f32 %v415_v11, %v414_v5 }
 0x10c   :  { %v521_v54 = vpop.f32.mrb[7].mxu1  ;;  %v387_v55 = vpop.f32.mrb[6].mxu0 }
 0x10d   :  { %v345_v56 = vadd.f32 %v519_v50, %v440_v35  ;;  %v556_v57 = vpop.f32.mrb[7].mxu0 }
 0x10f   :  { %v385_v59 = vadd.f32 %v384_v49, %v345_v56 }
 0x111   :  { %472 = vst.msk [vmem:[%s743_s3 + $0x8] sm:$0xff] %vm390_vm3, %v385_v59  ;;  %v401_v61 = vsel %vm390_vm3, %v385_v59, 0.0  ;;  %v417_v62 = vmul.f32 %v385_v59, %v385_v59 }
 0x112   :  { %v402_v0 = vrot.slane %v401_v61, 4 }
 0x113   :  { %v418_v1 = vsel %vm390_vm3, %v417_v62, 0.0 }
 0x114   :  { %v403_v3 = vadd.f32 %v402_v0, %v401_v61  ;;  %v419_v4 = vrot.slane %v418_v1, 4 }
 0x116   :  { %v404_v6 = vrot.slane %v403_v3, 2  ;;  %v420_v7 = vadd.f32 %v419_v4, %v418_v1 }
 0x118   :  { %v405_v9 = vadd.f32 %v404_v6, %v403_v3  ;;  %v421_v10 = vrot.slane %v420_v7, 2 }
 0x11a   :  { %v406_v12 = vrot.slane %v405_v9, 1  ;;  %v422_v13 = vadd.f32 %v421_v10, %v420_v7 }
 0x11c   :  { %v407_v15 = vadd.f32 %v406_v12, %v405_v9  ;;  %v423_v16 = vrot.slane %v422_v13, 1 }
 0x11e   :  { %v408_v17 = vadd.f32 %v407_v15, %v400_v14  ;;  %v424_v19 = vadd.f32 %v423_v16, %v422_v13 }
 0x120   :  { %v425_v20 = vadd.f32 %v424_v19, %v416_v18 }
 0x122   :  { %v428_v22 = vsel %vm427_vm4, %v408_v17, %v425_v20 }
 0x123   :  { %v429_v23 = vadd.f32 %v428_v22, %v426_v21 }
 0x125   :  { %431 = vst.msk [vmem:[%s741_s4] sm:$0x3] %vm21_vm2, %v429_v23 }

// kernel: encoder_forward.17
= control target key start
LH: loop header
LB: loop body
LE: loop exit
PB: predicated region body
PF: predicated region fallthrough
CT: control target
= control target key end

     0   :  { %v34_v8 = vlaneseq  ;;  %v94_v28 = vmov 1983009808   ;;  %vm80_vm0 = vcmask 1041408   ;;  %vm81_vm1 = vcmask 519170   ;;  %s141_s1 = inlined_call_operand.vmem [shape: f32[2,192], index: 1, kind: input, shape index: {}]   ;;  %s142_s2 = inlined_call_operand.vmem [shape: f32[1,192], index: 2, kind: input, shape index: {}]   ;;  %s143_s3 = inlined_call_operand.vmem [shape: f32[1,192], index: 3, kind: input, shape index: {}]   ;;  %s144_s0 = inlined_call_operand.vmem [shape: f32[2,4,192], index: 0, kind: input, shape index: {}]   ;;  %s145_s4 = inlined_call_operand.vmem [shape: bf16[4,192], index: 4, kind: output, shape index: {}]  }
   0x1   :  { %v17_v0 = vld [vmem:[%s141_s1] ss:$2 sm:$0x3]  ;;  %v88_v1 = vld [vmem:[%s141_s1 + $0x1] ss:$2 sm:$0x3]  ;;  %v73_v29 = vunpack.c.l.s4 %v94_v28  ;;  %vm82_vm2 = vmor %vm81_vm1, %vm80_vm0 }
   0x2   :  { %v18_v2 = vmul.f32 0.125, %v17_v0  ;;  %v21_v3 = vmul.f32 0.125, %v88_v1  ;;  %v35_v9 = vshrl.u32 %v34_v8, 7  ;;  %v27_v10 = vld [vmem:[%s142_s2] sm:$0x3]  ;;  %v89_v20 = vld [vmem:[%s144_s0 + $0x8] sm:$0xff] }
   0x3   :  { %v29_v15 = vld [vmem:[%s143_s3] sm:$0x3]  ;;  %v74_v34 = vunpack.c.0.s8 %v73_v29 }
   0x4   :  { %v22_v4 = vmul.f32 %v18_v2, %v18_v2  ;;  %v36_v11 = vsub.s32 0, %v35_v9  ;;  %v40_v12 = vsub.s32 1, %v35_v9  ;;  %v32_v19 = vld [vmem:[%s144_s0] sm:$0xff] }
   0x5   :  { %v77_v37 = vsub.s32 %v74_v34, %v35_v9 }
   0x6   :  { %v23_v5 = vsub.f32 %v21_v3, %v22_v4 }
   0x8   :  { %v24_v6 = vmax.f32 %v23_v5, 0.0 }
   0xa   :  { %v25_v7 = vadd.f32 1e-05, %v24_v6 }
   0xc   :  { %92 = vrsqrt.f32 %v25_v7 }
  0x16   :  { %v93_v13 = vpop.eup %92 }
  0x17   :  { %v28_v14 = vmul.f32 %v93_v13, %v27_v10 }
  0x19   :  { %v30_v16 = vmul.f32 %v28_v14, %v18_v2  ;;  %v37_v17 = vrot.slane %v28_v14, %v36_v11  ;;  %v41_v18 = vrot.slane %v28_v14, %v40_v12 }
  0x1b   :  { %v31_v21 = vsub.f32 %v29_v15, %v30_v16  ;;  %v42_v22 = vcombine.low %v37_v17, %v41_v18 }
  0x1d   :  { %v44_v23 = vmul.f32 %v42_v22, %v32_v19  ;;  %v49_v24 = vrot.slane %v31_v21, %v36_v11  ;;  %v53_v25 = vrot.slane %v31_v21, %v40_v12  ;;  %v60_v26 = vmul.f32 %v89_v20, %v42_v22 }
  0x1f   :  { %v54_v27 = vcombine.low %v49_v24, %v53_v25 }
  0x21   :  { %v56_v30 = vadd.f32 %v54_v27, %v44_v23  ;;  %v61_v31 = vadd.f32 %v60_v26, %v54_v27 }
  0x23   :  { %v57_v32 = vmax.f32 %v56_v30, 0.0  ;;  %v62_v33 = vmax.f32 %v61_v31, 0.0 }
  0x25   :  { %v63_v35 = vmax.f32 %v57_v32, %v62_v33 }
  0x27   :  { %v65_v36 = vcombine.high %v63_v35, %v63_v35 }
  0x29   :  { %v90_v38 = vpack.c.bf16 %v65_v36, %v63_v35 }
  0x2b   :  { %v78_v39 = vrot.slane %v90_v38, %v77_v37 }
  0x2d   :  { %83 = vst.msk [vmem:[%s145_s4] sm:$0xf] %vm82_vm2, %v78_v39 }

// kernel: encoder_forward.18
= control target key start
LH: loop header
LB: loop body
LE: loop exit
PB: predicated region body
PF: predicated region fallthrough
CT: control target
= control target key end

     0   :  { %vm188_vm0 = vcmask 523264   ;;  %v48_v26 = vlaneseq  ;;  %vm233_vm1 = vcmask 1043456   ;;  %vm241_vm2 = vcmask 519168   ;;  %s569_s1 = inlined_call_operand.vmem [shape: bf16[192,192], index: 1, kind: input, shape index: {}]   ;;  %s570_s0 = inlined_call_operand.vmem [shape: bf16[4,192], index: 0, kind: input, shape index: {}]   ;;  %s571_s2 = inlined_call_operand.vmem [shape: f32[1,192], index: 2, kind: input, shape index: {}]   ;;  %s572_s3 = inlined_call_operand.vmem [shape: f32[1,192], index: 3, kind: input, shape index: {}]   ;;  %s573_s4 = inlined_call_operand.vmem [shape: f32[1,192], index: 4, kind: input, shape index: {}]   ;;  %s574_s5 = inlined_call_operand.vmem [shape: f32[4,192], index: 5, kind: output, shape index: {}]  }
   0x1   :  { %v379_v0 = vld [vmem:[%s569_s1 + $0x4] ss:$8 sps:$4 sm:$0xff]   ;;  %v381_v1 = vld [vmem:[%s569_s1] ss:$8 sps:$4 sm:$0xff]   ;;  %v382_v2 = vld [vmem:[%s569_s1 + $0x14] ss:$8 sps:$4 sm:$0xff]  }
   0x2   :  { %192 = vmatprep.subr.bf16.mxu0 %v379_v0  ;;  %v384_v3 = vld [vmem:[%s569_s1 + $0x10] ss:$8 sps:$4 sm:$0xff]   ;;  %v385_v4 = vld [vmem:[%s569_s1 + $0x24] ss:$8 sps:$4 sm:$0xff]   ;;  %v387_v5 = vld [vmem:[%s569_s1 + $0x20] ss:$8 sps:$4 sm:$0xff]  }
   0x3   :  { %193 = vmatpush1.bf16.msra.mxu0 %v381_v1  ;;  %v388_v6 = vld [vmem:[%s569_s1 + $0x34] ss:$8 sps:$4 sm:$0xff]   ;;  %v390_v7 = vld [vmem:[%s569_s1 + $0x30] ss:$8 sps:$4 sm:$0xff]   ;;  %v391_v8 = vld [vmem:[%s569_s1 + $0x44] ss:$8 sps:$4 sm:$0xff]  }
   0x4   :  { %194 = vmatprep.subr.bf16.mxu0 %v382_v2  ;;  %v393_v9 = vld [vmem:[%s569_s1 + $0x40] ss:$8 sps:$4 sm:$0xff]   ;;  %v394_v10 = vld [vmem:[%s569_s1 + $0x54] ss:$8 sps:$4 sm:$0xff]   ;;  %v396_v13 = vld [vmem:[%s569_s1 + $0x50] ss:$8 sps:$4 sm:$0xff]  }
   0x5   :  { %v352_v11 = vld.sshfl [vmem:[%s570_s0] sm:$0x33 pattern:$0x76325410]  ;;  %v397_v14 = vld [vmem:[%s569_s1 + $0x64] ss:$8 sps:$4 sm:$0xff]  }
   0x6   :  { %v66_v12 = vcombine.high %v352_v11, %v352_v11  ;;  %v399_v15 = vld [vmem:[%s569_s1 + $0x60] ss:$8 sps:$4 sm:$0xff]   ;;  %v400_v16 = vld [vmem:[%s569_s1 + $0x74] ss:$8 sps:$4 sm:$0xff]   ;;  %v402_v17 = vld [vmem:[%s569_s1 + $0x70] ss:$8 sps:$4 sm:$0xff]  }
   0x7   :  { %195 = vmatpush1.bf16.msra.mxu0 %v384_v3  ;;  %v403_v18 = vld [vmem:[%s569_s1 + $0x84] ss:$8 sps:$4 sm:$0xff]   ;;  %v405_v19 = vld [vmem:[%s569_s1 + $0x80] ss:$8 sps:$4 sm:$0xff]   ;;  %v406_v20 = vld [vmem:[%s569_s1 + $0x94] ss:$8 sps:$4 sm:$0xff]  }
   0x8   :  { %196 = vmatprep.subr.bf16.mxu0 %v385_v4  ;;  %377 = vmatprep.mubr.msk.bf16.mxu0 %vm188_vm0, %v66_v12  ;;  %v408_v21 = vld [vmem:[%s569_s1 + $0x90] ss:$8 sps:$4 sm:$0xff]   ;;  %v409_v22 = vld [vmem:[%s569_s1 + $0xa4] ss:$8 sps:$4 sm:$0xff]   ;;  %v411_v23 = vld [vmem:[%s569_s1 + $0xa0] ss:$8 sps:$4 sm:$0xff]  }
   0x9   :  { %v412_v24 = vld [vmem:[%s569_s1 + $0xb4] ss:$8 sps:$4 sm:$0xff]   ;;  %v414_v25 = vld [vmem:[%s569_s1 + $0xb0] ss:$8 sps:$4 sm:$0xff]   ;;  %v525_v27 = vshrl.u32 %v48_v26, 7  ;;  %vm345_vm3 = vcmask 523268  }
   0xa   :  { %v46_v29 = vld [vmem:[%s571_s2] sm:$0x3]  ;;  %vm346_vm4 = vmor %vm345_vm3, %vm233_vm1 }
   0xb   :  { %197 = vmatpush1.bf16.msra.mxu0 %v387_v5  ;;  %v528_v28 = vsub.s32 0, %v525_v27  ;;  %v534_v30 = vsub.s32 1, %v525_v27 }
   0xc   :  { %198 = vmatprep.subr.bf16.mxu0 %v388_v6 }
   0xd   :  { %v51_v31 = vrot.slane %v46_v29, %v528_v28  ;;  %v55_v32 = vrot.slane %v46_v29, %v534_v30 }
   0xf   :  { %199 = vmatpush1.bf16.msra.mxu0 %v390_v7 }
  0x10   :  { %200 = vmatprep.subr.bf16.mxu0 %v391_v8 }
  0x13   :  { %201 = vmatpush1.bf16.msra.mxu0 %v393_v9 }
  0x14   :  { %202 = vmatprep.subr.bf16.mxu0 %v394_v10 }
  0x17   :  { %203 = vmatpush1.bf16.msra.mxu0 %v396_v13 }
  0x18   :  { %204 = vmatprep.subr.bf16.mxu0 %v397_v14 }
  0x1b   :  { %205 = vmatpush1.bf16.msra.mxu0 %v399_v15 }
  0x1c   :  { %206 = vmatprep.subr.bf16.mxu0 %v400_v16 }
  0x1f   :  { %207 = vmatpush1.bf16.msra.mxu0 %v402_v17  ;;  %v280_v17 = vld [vmem:[%s572_s3] sm:$0x3] }
  0x20   :  { %208 = vmatprep.subr.bf16.mxu0 %v403_v18  ;;  %v419_v18 = vmov 1966171168  }
  0x23   :  { %209 = vmatpush1.bf16.msra.mxu0 %v405_v19  ;;  %v301_v19 = vunpack.c.l.s4 %v419_v18 }
  0x24   :  { %210 = vmatprep.subr.bf16.mxu0 %v406_v20  ;;  %v285_v20 = vrot.slane %v280_v17, %v528_v28 }
  0x27   :  { %211 = vmatpush1.bf16.msra.mxu0 %v408_v21  ;;  %v289_v21 = vrot.slane %v280_v17, %v534_v30 }
  0x28   :  { %212 = vmatprep.subr.bf16.mxu0 %v409_v22 }
  0x2b   :  { %213 = vmatpush1.bf16.msra.mxu0 %v411_v23  ;;  %v302_v23 = vunpack.c.0.s8 %v301_v19 }
  0x2c   :  { %214 = vmatprep.subr.bf16.mxu0 %v412_v24 }
  0x2f   :  { %215 = vmatpush1.bf16.msra.mxu0 %v414_v25 }
  0x32   :  { %225 = vmatmul.mubr.bf16.vlgmr.msra.gmra.mrb[0].mxu0 %v352_v11 }
 0x105   :  { %v226_v33 = vpop.f32.mrb[0].mxu0 }
 0x106   :  { %v538_v34 = vadd.f32 %v226_v33, %v51_v31  ;;  %v228_v35 = vpop.f32.mrb[1].mxu0 }
 0x107   :  { %v540_v36 = vadd.f32 %v228_v35, %v55_v32  ;;  %v230_v37 = vpop.f32.mrb[2].mxu0  ;;  %v305_v32 = vsub.s32 %v302_v23, %v525_v27 }
 0x108   :  { %v234_v38 = vsel %vm233_vm1, %v538_v34, 0.0  ;;  %v252_v39 = vmul.f32 %v538_v34, %v538_v34  ;;  %v231_v40 = vpop.f32.mrb[3].mxu0  ;;  %v294_v37 = vld [vmem:[%s573_s4] sm:$0x3] }
 0x109   :  { %v235_v41 = vrot.slane %v234_v38, 4  ;;  %v242_v42 = vsel %vm241_vm2, %v540_v36, 0.0  ;;  %v253_v43 = vmul.f32 %v540_v36, %v540_v36 }
 0x10a   :  { %v254_v44 = vsel %vm233_vm1, %v252_v39, 0.0  ;;  %v243_v45 = vrot.slane %v242_v42, 4 }
 0x10b   :  { %v236_v46 = vadd.f32 %v235_v41, %v234_v38  ;;  %v255_v47 = vrot.slane %v254_v44, 4  ;;  %v261_v48 = vsel %vm241_vm2, %v253_v43, 0.0 }
 0x10c   :  { %v244_v49 = vadd.f32 %v243_v45, %v242_v42  ;;  %v262_v50 = vrot.slane %v261_v48, 4 }
 0x10d   :  { %v237_v51 = vrot.slane %v236_v46, 2  ;;  %v256_v52 = vadd.f32 %v255_v47, %v254_v44 }
 0x10e   :  { %v245_v53 = vrot.slane %v244_v49, 2  ;;  %v263_v54 = vadd.f32 %v262_v50, %v261_v48 }
 0x10f   :  { %v238_v55 = vadd.f32 %v237_v51, %v236_v46  ;;  %v257_v56 = vrot.slane %v256_v52, 2 }
 0x110   :  { %v246_v57 = vadd.f32 %v245_v53, %v244_v49  ;;  %v264_v58 = vrot.slane %v263_v54, 2 }
 0x111   :  { %v239_v59 = vrot.slane %v238_v55, 1  ;;  %v258_v60 = vadd.f32 %v257_v56, %v256_v52 }
 0x112   :  { %v247_v61 = vrot.slane %v246_v57, 1  ;;  %v265_v62 = vadd.f32 %v264_v58, %v263_v54 }
 0x113   :  { %v240_v63 = vadd.f32 %v239_v59, %v238_v55  ;;  %v259_v0 = vrot.slane %v258_v60, 1 }
 0x114   :  { %v248_v1 = vadd.f32 %v247_v61, %v246_v57  ;;  %v266_v2 = vrot.slane %v265_v62, 1 }
 0x115   :  { %v250_v3 = vmul.f32 0.25, %v240_v63  ;;  %v260_v4 = vadd.f32 %v259_v0, %v258_v60 }
 0x116   :  { %v251_v5 = vmul.f32 0.25, %v248_v1  ;;  %v267_v6 = vadd.f32 %v266_v2, %v265_v62 }
 0x117   :  { %v268_v7 = vmul.f32 0.25, %v260_v4  ;;  %v270_v8 = vmul.f32 %v250_v3, %v250_v3 }
 0x118   :  { %v269_v9 = vmul.f32 0.25, %v267_v6  ;;  %v271_v10 = vmul.f32 %v251_v5, %v251_v5 }
 0x119   :  { %v272_v11 = vsub.f32 %v268_v7, %v270_v8 }
 0x11a   :  { %v273_v12 = vsub.f32 %v269_v9, %v271_v10 }
 0x11b   :  { %v274_v13 = vmax.f32 %v272_v11, 0.0 }
 0x11c   :  { %v275_v14 = vmax.f32 %v273_v12, 0.0 }
 0x11d   :  { %v276_v15 = vadd.f32 1e-05, %v274_v13 }
 0x11e   :  { %v277_v16 = vadd.f32 1e-05, %v275_v14 }
 0x11f   :  { %415 = vrsqrt.f32 %v276_v15 }
 0x120   :  { %417 = vrsqrt.f32 %v277_v16 }
 0x129   :  { %v416_v22 = vpop.eup %415 }
 0x12a   :  { %v418_v24 = vpop.eup %417  ;;  %v292_v25 = vmul.f32 %v416_v22, %v285_v20 }
 0x12b   :  { %v293_v26 = vmul.f32 %v418_v24, %v289_v21 }
 0x12c   :  { %v295_v29 = vmul.f32 %v292_v25, %v250_v3  ;;  %v319_v38 = vrot.slane %v292_v25, %v528_v28 }
 0x12d   :  { %v296_v31 = vmul.f32 %v293_v26, %v251_v5  ;;  %v323_v40 = vrot.slane %v293_v26, %v528_v28 }
 0x12e   :  { %v324_v42 = vmul.f32 %v319_v38, %v538_v34 }
 0x12f   :  { %v299_v33 = vcombine.low %v295_v29, %v296_v31  ;;  %v325_v43 = vmul.f32 %v323_v40, %v540_v36 }
 0x131   :  { %v306_v35 = vrot.slane %v299_v33, %v305_v32 }
 0x133   :  { %v313_v39 = vrot.slane %v306_v35, %v305_v32 }
 0x135   :  { %v315_v41 = vsub.f32 %v294_v37, %v313_v39 }
 0x137   :  { %v330_v44 = vrot.slane %v315_v41, %v528_v28  ;;  %v334_v27 = vrot.slane %v315_v41, %v534_v30 }
 0x139   :  { %v337_v45 = vadd.f32 %v330_v44, %v324_v42  ;;  %v338_v46 = vadd.f32 %v334_v27, %v325_v43 }
 0x13b   :  { %v339_v47 = vmax.f32 %v337_v45, 0.0  ;;  %v340_v48 = vmax.f32 %v338_v46, 0.0 }
 0x13d   :  { %v343_v49 = vcombine.low %v339_v47, %v340_v48 }
 0x13f   :  { %347 = vst.msk [vmem:[%s574_s5] sm:$0xff] %vm346_vm4, %v343_v49 }

// kernel: encoder_forward.16
= control target key start
LH: loop header
LB: loop body
LE: loop exit
PB: predicated region body
PF: predicated region fallthrough
CT: control target
= control target key end

     0   :  { %v113_v7 = vlaneseq  ;;  %v1211_v8 = vmov 1983009808   ;;  %vm575_vm0 = vcmask 261120   ;;  %vm21_vm1 = vcmask 1041408   ;;  %s1598_s1 = inlined_call_operand.vmem [shape: bf16[672,192], index: 1, kind: input, shape index: {}]   ;;  %s1599_s0 = inlined_call_operand.vmem [shape: bf16[2,4,672], index: 0, kind: input, shape index: {}]   ;;  %s1600_s4 = inlined_call_operand.vmem [shape: f32[2,192], index: 4, kind: output, shape index: {1}]   ;;  %s1601_s2 = inlined_call_operand.vmem [shape: f32[1,192], index: 2, kind: input, shape index: {}]   ;;  %s1602_s3 = inlined_call_operand.vmem [shape: f32[2,4,192], index: 3, kind: output, shape index: {0}]  }
   0x1   :  { %v1083_v0 = vld [vmem:[%s1598_s1 + $0x4] ss:$8 sps:$4 sm:$0xff]   ;;  %v1085_v1 = vld [vmem:[%s1598_s1] ss:$8 sps:$4 sm:$0xff]   ;;  %v1086_v2 = vld [vmem:[%s1598_s1 + $0x14] ss:$8 sps:$4 sm:$0xff]   ;;  %v127_v9 = vunpack.c.l.s4 %v1211_v8 }
   0x2   :  { %579 = vmatprep.subr.bf16.mxu0 %v1083_v0  ;;  %740 = vmatprep.subr.bf16.mxu1 %v1083_v0  ;;  %v1088_v3 = vld [vmem:[%s1598_s1 + $0x10] ss:$8 sps:$4 sm:$0xff]   ;;  %v1089_v4 = vld [vmem:[%s1598_s1 + $0x24] ss:$8 sps:$4 sm:$0xff]   ;;  %v1091_v5 = vld [vmem:[%s1598_s1 + $0x20] ss:$8 sps:$4 sm:$0xff]  }
   0x3   :  { %580 = vmatpush1.bf16.msra.mxu0 %v1085_v1  ;;  %741 = vmatpush1.bf16.msra.mxu1 %v1085_v1  ;;  %v1092_v6 = vld [vmem:[%s1598_s1 + $0x34] ss:$8 sps:$4 sm:$0xff]   ;;  %v1094_v10 = vld [vmem:[%s1598_s1 + $0x30] ss:$8 sps:$4 sm:$0xff]   ;;  %v1095_v11 = vld [vmem:[%s1598_s1 + $0x44] ss:$8 sps:$4 sm:$0xff]   ;;  %v128_v13 = vunpack.c.0.s8 %v127_v9 }
   0x4   :  { %581 = vmatprep.subr.bf16.mxu0 %v1086_v2  ;;  %742 = vmatprep.subr.bf16.mxu1 %v1086_v2  ;;  %v1265_v12 = vshrl.u32 %v113_v7, 7  ;;  %v1097_v14 = vld [vmem:[%s1598_s1 + $0x40] ss:$8 sps:$4 sm:$0xff]   ;;  %v1098_v15 = vld [vmem:[%s1598_s1 + $0x54] ss:$8 sps:$4 sm:$0xff]   ;;  %v1297_v22 = vld [vmem:[%s1599_s0 + $0xc] sm:$0xff] }
   0x5   :  { %v1100_v17 = vld [vmem:[%s1598_s1 + $0x50] ss:$8 sps:$4 sm:$0xff]   ;;  %v1101_v18 = vld [vmem:[%s1598_s1 + $0x64] ss:$8 sps:$4 sm:$0xff]   ;;  %v1103_v20 = vld [vmem:[%s1598_s1 + $0x60] ss:$8 sps:$4 sm:$0xff]   ;;  %v707_v44 = vcombine.high %v1297_v22, %v1297_v22 }
   0x6   :  { %v1274_v16 = vsub.s32 %v128_v13, %v1265_v12  ;;  %v1285_v19 = vld [vmem:[%s1599_s0] sm:$0xff]  ;;  %v1104_v23 = vld [vmem:[%s1598_s1 + $0x74] ss:$8 sps:$4 sm:$0xff]   ;;  %v1106_v27 = vld [vmem:[%s1598_s1 + $0x70] ss:$8 sps:$4 sm:$0xff]   ;;  %vm22_vm2 = vcmask 519170  }
   0x7   :  { %582 = vmatpush1.bf16.msra.mxu0 %v1088_v3  ;;  %743 = vmatpush1.bf16.msra.mxu1 %v1088_v3  ;;  %v1107_v28 = vld [vmem:[%s1598_s1 + $0x84] ss:$8 sps:$4 sm:$0xff]   ;;  %v1109_v29 = vld [vmem:[%s1598_s1 + $0x80] ss:$8 sps:$4 sm:$0xff]   ;;  %v1110_v30 = vld [vmem:[%s1598_s1 + $0x94] ss:$8 sps:$4 sm:$0xff]   ;;  %v125_v43 = vcombine.high %v1285_v19, %v1285_v19 }
   0x8   :  { %583 = vmatprep.subr.bf16.mxu0 %v1089_v4  ;;  %744 = vmatprep.subr.bf16.mxu1 %v1089_v4  ;;  %v1292_v21 = vrot.slane %v1285_v19, %v1274_v16  ;;  %v1306_v25 = vrot.slane %v1297_v22, %v1274_v16  ;;  %v1112_v31 = vld [vmem:[%s1598_s1 + $0x90] ss:$8 sps:$4 sm:$0xff]   ;;  %v1113_v32 = vld [vmem:[%s1598_s1 + $0xa4] ss:$8 sps:$4 sm:$0xff]   ;;  %v1115_v33 = vld [vmem:[%s1598_s1 + $0xa0] ss:$8 sps:$4 sm:$0xff]   ;;  %v1372_v48 = vrot.slane %v707_v44, %v1274_v16 }
   0x9   :  { %v1116_v34 = vld [vmem:[%s1598_s1 + $0xb4] ss:$8 sps:$4 sm:$0xff]   ;;  %v1118_v35 = vld [vmem:[%s1598_s1 + $0xb0] ss:$8 sps:$4 sm:$0xff]   ;;  %v1119_v36 = vld [vmem:[%s1598_s1 + $0xc4] ss:$8 sps:$4 sm:$0xff]   ;;  %v1369_v47 = vrot.slane %v125_v43, %v1274_v16 }
   0xa   :  { %v140_v24 = vcombine.high %v1292_v21, %v1292_v21  ;;  %v722_v26 = vcombine.high %v1306_v25, %v1306_v25  ;;  %v1121_v37 = vld [vmem:[%s1598_s1 + $0xc0] ss:$8 sps:$4 sm:$0xff]   ;;  %v1122_v38 = vld [vmem:[%s1598_s1 + $0xd4] ss:$8 sps:$4 sm:$0xff]   ;;  %v1124_v39 = vld [vmem:[%s1598_s1 + $0xd0] ss:$8 sps:$4 sm:$0xff]   ;;  %v723_v52 = vcombine.high %v1372_v48, %v1372_v48 }
   0xb   :  { %584 = vmatpush1.bf16.msra.mxu0 %v1091_v5  ;;  %745 = vmatpush1.bf16.msra.mxu1 %v1091_v5  ;;  %v1125_v40 = vld [vmem:[%s1598_s1 + $0xe4] ss:$8 sps:$4 sm:$0xff]   ;;  %v1127_v41 = vld [vmem:[%s1598_s1 + $0xe0] ss:$8 sps:$4 sm:$0xff]   ;;  %v1128_v42 = vld [vmem:[%s1598_s1 + $0xf4] ss:$8 sps:$4 sm:$0xff]   ;;  %v141_v51 = vcombine.high %v1369_v47, %v1369_v47 }
   0xc   :  { %585 = vmatprep.subr.bf16.mxu0 %v1092_v6  ;;  %746 = vmatprep.subr.bf16.mxu1 %v1092_v6  ;;  %v1130_v45 = vld [vmem:[%s1598_s1 + $0xf0] ss:$8 sps:$4 sm:$0xff]   ;;  %v1134_v46 = vld [vmem:[%s1598_s1 + $0x104] ss:$8 sps:$4 sm:$0xff]   ;;  %v1132_v49 = vld [vmem:[%s1598_s1 + $0x100] ss:$8 sps:$4 sm:$0xff]  }
   0xd   :  { %611 = vmatprep.mubr.bf16.mxu0 %v140_v24  ;;  %772 = vmatprep.mubr.bf16.mxu1 %v722_v26  ;;  %v1138_v50 = vld [vmem:[%s1598_s1 + $0x114] ss:$8 sps:$4 sm:$0xff]   ;;  %v1136_v53 = vld [vmem:[%s1598_s1 + $0x110] ss:$8 sps:$4 sm:$0xff]   ;;  %v1141_v54 = vld [vmem:[%s1598_s1 + $0x124] ss:$8 sps:$4 sm:$0xff]  }
   0xe   :  { %v1139_v55 = vld [vmem:[%s1598_s1 + $0x120] ss:$8 sps:$4 sm:$0xff]   ;;  %v1144_v56 = vld [vmem:[%s1598_s1 + $0x134] ss:$8 sps:$4 sm:$0xff]   ;;  %v1142_v57 = vld [vmem:[%s1598_s1 + $0x130] ss:$8 sps:$4 sm:$0xff]  }
   0xf   :  { %586 = vmatpush1.bf16.msra.mxu0 %v1094_v10  ;;  %747 = vmatpush1.bf16.msra.mxu1 %v1094_v10  ;;  %v1147_v58 = vld [vmem:[%s1598_s1 + $0x144] ss:$8 sps:$4 sm:$0xff]   ;;  %v1145_v59 = vld [vmem:[%s1598_s1 + $0x140] ss:$8 sps:$4 sm:$0xff]   ;;  %v1150_v60 = vld [vmem:[%s1598_s1 + $0x154] ss:$8 sps:$4 sm:$0xff]  }
  0x10   :  { %587 = vmatprep.subr.bf16.mxu0 %v1095_v11  ;;  %748 = vmatprep.subr.bf16.mxu1 %v1095_v11  ;;  %v1148_v61 = vld [vmem:[%s1598_s1 + $0x150] ss:$8 sps:$4 sm:$0xff]   ;;  %v1153_v62 = vld [vmem:[%s1598_s1 + $0x164] ss:$8 sps:$4 sm:$0xff]   ;;  %v1151_v63 = vld [vmem:[%s1598_s1 + $0x160] ss:$8 sps:$4 sm:$0xff]  }
  0x11   :  { %v1156_v0 = vld [vmem:[%s1598_s1 + $0x174] ss:$8 sps:$4 sm:$0xff]   ;;  %v1154_v1 = vld [vmem:[%s1598_s1 + $0x170] ss:$8 sps:$4 sm:$0xff]   ;;  %v1159_v2 = vld [vmem:[%s1598_s1 + $0x184] ss:$8 sps:$4 sm:$0xff]  }
  0x12   :  { %v1157_v3 = vld [vmem:[%s1598_s1 + $0x180] ss:$8 sps:$4 sm:$0xff]   ;;  %v1162_v4 = vld [vmem:[%s1598_s1 + $0x194] ss:$8 sps:$4 sm:$0xff]   ;;  %v1160_v5 = vld [vmem:[%s1598_s1 + $0x190] ss:$8 sps:$4 sm:$0xff]  }
  0x13   :  { %588 = vmatpush1.bf16.msra.mxu0 %v1097_v14  ;;  %749 = vmatpush1.bf16.msra.mxu1 %v1097_v14  ;;  %v1165_v6 = vld [vmem:[%s1598_s1 + $0x1a4] ss:$8 sps:$4 sm:$0xff]   ;;  %v1163_v7 = vld [vmem:[%s1598_s1 + $0x1a0] ss:$8 sps:$4 sm:$0xff]   ;;  %v1168_v8 = vld [vmem:[%s1598_s1 + $0x1b4] ss:$8 sps:$4 sm:$0xff]  }
  0x14   :  { %589 = vmatprep.subr.bf16.mxu0 %v1098_v15  ;;  %750 = vmatprep.subr.bf16.mxu1 %v1098_v15  ;;  %v1166_v9 = vld [vmem:[%s1598_s1 + $0x1b0] ss:$8 sps:$4 sm:$0xff]   ;;  %v1171_v10 = vld [vmem:[%s1598_s1 + $0x1c4] ss:$8 sps:$4 sm:$0xff]   ;;  %v1169_v11 = vld [vmem:[%s1598_s1 + $0x1c0] ss:$8 sps:$4 sm:$0xff]  }
  0x15   :  { %v1174_v13 = vld [vmem:[%s1598_s1 + $0x1d4] ss:$8 sps:$4 sm:$0xff]   ;;  %v1172_v14 = vld [vmem:[%s1598_s1 + $0x1d0] ss:$8 sps:$4 sm:$0xff]   ;;  %v1177_v15 = vld [vmem:[%s1598_s1 + $0x1e4] ss:$8 sps:$4 sm:$0xff]  }
  0x16   :  { %v1178_v19 = vld [vmem:[%s1598_s1 + $0x1f0] ss:$8 sps:$4 sm:$0xff]   ;;  %v1484_v22 = vld.sshfl [vmem:[%s1599_s0 + $0x14] sm:$0x33 pattern:$0x76325410]  ;;  %vm1551_vm3 = vmor %vm22_vm2, %vm21_vm1 }
  0x17   :  { %590 = vmatpush1.bf16.msra.mxu0 %v1100_v17  ;;  %751 = vmatpush1.bf16.msra.mxu1 %v1100_v17  ;;  %v1175_v17 = vld [vmem:[%s1598_s1 + $0x1e0] ss:$8 sps:$4 sm:$0xff]   ;;  %v1186_v24 = vld [vmem:[%s1598_s1 + $0x214] ss:$8 sps:$4 sm:$0xff]   ;;  %v731_v26 = vcombine.high %v1484_v22, %v1484_v22  ;;  %v1208_v43 = vld [vmem:[%s1598_s1 + $0x290] ss:$8 sps:$4 sm:$0xff]  }
  0x18   :  { %591 = vmatprep.subr.bf16.mxu0 %v1101_v18  ;;  %752 = vmatprep.subr.bf16.mxu1 %v1101_v18  ;;  %v1180_v18 = vld [vmem:[%s1598_s1 + $0x1f4] ss:$8 sps:$4 sm:$0xff]   ;;  %vm867_vm4 = vcmask 1043456   ;;  %vm868_vm5 = vcmask 523268   ;;  %vm884_vm6 = vcmask 519168   ;;  %vm943_vm8 = vcmask 1040384  }
  0x19   :  { %vm1569_vm7 = vmor %vm868_vm5, %vm867_vm4 }
  0x1b   :  { %592 = vmatpush1.bf16.msra.mxu0 %v1103_v20  ;;  %753 = vmatpush1.bf16.msra.mxu1 %v1103_v20  ;;  %v1183_v20 = vld [vmem:[%s1598_s1 + $0x204] ss:$8 sps:$4 sm:$0xff]  }
  0x1c   :  { %593 = vmatprep.subr.bf16.mxu0 %v1104_v23  ;;  %754 = vmatprep.subr.bf16.mxu1 %v1104_v23  ;;  %v1181_v23 = vld [vmem:[%s1598_s1 + $0x200] ss:$8 sps:$4 sm:$0xff]  }
  0x1f   :  { %594 = vmatpush1.bf16.msra.mxu0 %v1106_v27  ;;  %755 = vmatpush1.bf16.msra.mxu1 %v1106_v27  ;;  %v1184_v27 = vld [vmem:[%s1598_s1 + $0x210] ss:$8 sps:$4 sm:$0xff]  }
  0x20   :  { %595 = vmatprep.subr.bf16.mxu0 %v1107_v28  ;;  %756 = vmatprep.subr.bf16.mxu1 %v1107_v28  ;;  %v1189_v28 = vld [vmem:[%s1598_s1 + $0x224] ss:$8 sps:$4 sm:$0xff]  }
  0x23   :  { %596 = vmatpush1.bf16.msra.mxu0 %v1109_v29  ;;  %757 = vmatpush1.bf16.msra.mxu1 %v1109_v29  ;;  %v1187_v29 = vld [vmem:[%s1598_s1 + $0x220] ss:$8 sps:$4 sm:$0xff]  }
  0x24   :  { %597 = vmatprep.subr.bf16.mxu0 %v1110_v30  ;;  %758 = vmatprep.subr.bf16.mxu1 %v1110_v30  ;;  %v1192_v30 = vld [vmem:[%s1598_s1 + $0x234] ss:$8 sps:$4 sm:$0xff]  }
  0x27   :  { %598 = vmatpush1.bf16.msra.mxu0 %v1112_v31  ;;  %759 = vmatpush1.bf16.msra.mxu1 %v1112_v31  ;;  %v1190_v31 = vld [vmem:[%s1598_s1 + $0x230] ss:$8 sps:$4 sm:$0xff]  }
  0x28   :  { %599 = vmatprep.subr.bf16.mxu0 %v1113_v32  ;;  %760 = vmatprep.subr.bf16.mxu1 %v1113_v32  ;;  %v1195_v32 = vld [vmem:[%s1598_s1 + $0x244] ss:$8 sps:$4 sm:$0xff]  }
  0x2b   :  { %600 = vmatpush1.bf16.msra.mxu0 %v1115_v33  ;;  %761 = vmatpush1.bf16.msra.mxu1 %v1115_v33  ;;  %v1193_v33 = vld [vmem:[%s1598_s1 + $0x240] ss:$8 sps:$4 sm:$0xff]  }
  0x2c   :  { %601 = vmatprep.subr.bf16.mxu0 %v1116_v34  ;;  %762 = vmatprep.subr.bf16.mxu1 %v1116_v34  ;;  %v1198_v34 = vld [vmem:[%s1598_s1 + $0x254] ss:$8 sps:$4 sm:$0xff]  }
  0x2f   :  { %602 = vmatpush1.bf16.msra.mxu0 %v1118_v35  ;;  %763 = vmatpush1.bf16.msra.mxu1 %v1118_v35  ;;  %v1196_v35 = vld [vmem:[%s1598_s1 + $0x250] ss:$8 sps:$4 sm:$0xff]  }
  0x30   :  { %603 = vmatprep.subr.bf16.mxu0 %v1119_v36  ;;  %764 = vmatprep.subr.bf16.mxu1 %v1119_v36  ;;  %v1201_v36 = vld [vmem:[%s1598_s1 + $0x264] ss:$8 sps:$4 sm:$0xff]  }
  0x33   :  { %604 = vmatpush1.bf16.msra.mxu0 %v1121_v37  ;;  %765 = vmatpush1.bf16.msra.mxu1 %v1121_v37  ;;  %v1199_v37 = vld [vmem:[%s1598_s1 + $0x260] ss:$8 sps:$4 sm:$0xff]  }
  0x34   :  { %605 = vmatprep.subr.bf16.mxu0 %v1122_v38  ;;  %766 = vmatprep.subr.bf16.mxu1 %v1122_v38  ;;  %v1204_v38 = vld [vmem:[%s1598_s1 + $0x274] ss:$8 sps:$4 sm:$0xff]  }
  0x37   :  { %606 = vmatpush1.bf16.msra.mxu0 %v1124_v39  ;;  %767 = vmatpush1.bf16.msra.mxu1 %v1124_v39  ;;  %v1202_v39 = vld [vmem:[%s1598_s1 + $0x270] ss:$8 sps:$4 sm:$0xff]  }
  0x38   :  { %607 = vmatprep.subr.bf16.mxu0 %v1125_v40  ;;  %768 = vmatprep.subr.bf16.mxu1 %v1125_v40  ;;  %v1207_v40 = vld [vmem:[%s1598_s1 + $0x284] ss:$8 sps:$4 sm:$0xff]  }
  0x3b   :  { %608 = vmatpush1.bf16.msra.mxu0 %v1127_v41  ;;  %769 = vmatpush1.bf16.msra.mxu1 %v1127_v41  ;;  %v1205_v41 = vld [vmem:[%s1598_s1 + $0x280] ss:$8 sps:$4 sm:$0xff]  }
  0x3c   :  { %609 = vmatprep.subr.bf16.mxu0 %v1128_v42  ;;  %770 = vmatprep.subr.bf16.mxu1 %v1128_v42  ;;  %v1210_v42 = vld [vmem:[%s1598_s1 + $0x294] ss:$8 sps:$4 sm:$0xff]  }
  0x3f   :  { %610 = vmatpush1.bf16.msra.mxu0 %v1130_v45  ;;  %771 = vmatpush1.bf16.msra.mxu1 %v1130_v45  ;;  %v1212_v45 = vmov 0.0  }
  0x40   :  { %620 = vmatprep.subr.bf16.mxu0 %v1134_v46  ;;  %781 = vmatprep.subr.bf16.mxu1 %v1134_v46  ;;  %24 = vst.msk [vmem:[%s1600_s4] sm:$0xf] %vm1551_vm3, %v1212_v45  ;;  %v115_v46 = vsub.s32 0, %v1265_v12 }
  0x42   :  { %612 = vmatmul.mubr.bf16.vlgmr.msra.gmra.mrb[0].mxu0 %v1292_v21  ;;  %773 = vmatmul.mubr.bf16.vlgmr.msra.gmra.mrb[0].mxu1 %v1306_v25  ;;  %v1479_v21 = vld.sshfl [vmem:[%s1599_s0 + $0x8] sm:$0x33 pattern:$0x76325410] }
  0x43   :  { %621 = vmatpush1.bf16.msra.mxu0 %v1132_v49  ;;  %782 = vmatpush1.bf16.msra.mxu1 %v1132_v49  ;;  %v149_v25 = vcombine.high %v1479_v21, %v1479_v21 }
  0x44   :  { %622 = vmatprep.subr.bf16.mxu0 %v1138_v50  ;;  %783 = vmatprep.subr.bf16.mxu1 %v1138_v50 }
  0x45   :  { %652 = vmatprep.mubr.bf16.mxu0 %v141_v51  ;;  %813 = vmatprep.mubr.bf16.mxu1 %v723_v52 }
  0x47   :  { %623 = vmatpush1.bf16.msra.mxu0 %v1136_v53  ;;  %784 = vmatpush1.bf16.msra.mxu1 %v1136_v53 }
  0x48   :  { %624 = vmatprep.subr.bf16.mxu0 %v1141_v54  ;;  %785 = vmatprep.subr.bf16.mxu1 %v1141_v54 }
  0x4b   :  { %625 = vmatpush1.bf16.msra.mxu0 %v1139_v55  ;;  %786 = vmatpush1.bf16.msra.mxu1 %v1139_v55 }
  0x4c   :  { %626 = vmatprep.subr.bf16.mxu0 %v1144_v56  ;;  %787 = vmatprep.subr.bf16.mxu1 %v1144_v56 }
  0x4f   :  { %627 = vmatpush1.bf16.msra.mxu0 %v1142_v57  ;;  %788 = vmatpush1.bf16.msra.mxu1 %v1142_v57 }
  0x50   :  { %628 = vmatprep.subr.bf16.mxu0 %v1147_v58  ;;  %789 = vmatprep.subr.bf16.mxu1 %v1147_v58 }
  0x53   :  { %629 = vmatpush1.bf16.msra.mxu0 %v1145_v59  ;;  %790 = vmatpush1.bf16.msra.mxu1 %v1145_v59 }
  0x54   :  { %630 = vmatprep.subr.bf16.mxu0 %v1150_v60  ;;  %791 = vmatprep.subr.bf16.mxu1 %v1150_v60 }
  0x57   :  { %631 = vmatpush1.bf16.msra.mxu0 %v1148_v61  ;;  %792 = vmatpush1.bf16.msra.mxu1 %v1148_v61 }
  0x58   :  { %632 = vmatprep.subr.bf16.mxu0 %v1153_v62  ;;  %793 = vmatprep.subr.bf16.mxu1 %v1153_v62 }
  0x5b   :  { %633 = vmatpush1.bf16.msra.mxu0 %v1151_v63  ;;  %794 = vmatpush1.bf16.msra.mxu1 %v1151_v63 }
  0x5c   :  { %634 = vmatprep.subr.bf16.mxu0 %v1156_v0  ;;  %795 = vmatprep.subr.bf16.mxu1 %v1156_v0 }
  0x5f   :  { %635 = vmatpush1.bf16.msra.mxu0 %v1154_v1  ;;  %796 = vmatpush1.bf16.msra.mxu1 %v1154_v1 }
  0x60   :  { %636 = vmatprep.subr.bf16.mxu0 %v1159_v2  ;;  %797 = vmatprep.subr.bf16.mxu1 %v1159_v2 }
  0x63   :  { %637 = vmatpush1.bf16.msra.mxu0 %v1157_v3  ;;  %798 = vmatpush1.bf16.msra.mxu1 %v1157_v3 }
  0x64   :  { %638 = vmatprep.subr.bf16.mxu0 %v1162_v4  ;;  %799 = vmatprep.subr.bf16.mxu1 %v1162_v4 }
  0x67   :  { %639 = vmatpush1.bf16.msra.mxu0 %v1160_v5  ;;  %800 = vmatpush1.bf16.msra.mxu1 %v1160_v5 }
  0x68   :  { %640 = vmatprep.subr.bf16.mxu0 %v1165_v6  ;;  %801 = vmatprep.subr.bf16.mxu1 %v1165_v6 }
  0x6b   :  { %641 = vmatpush1.bf16.msra.mxu0 %v1163_v7  ;;  %802 = vmatpush1.bf16.msra.mxu1 %v1163_v7 }
  0x6c   :  { %642 = vmatprep.subr.bf16.mxu0 %v1168_v8  ;;  %803 = vmatprep.subr.bf16.mxu1 %v1168_v8 }
  0x6f   :  { %643 = vmatpush1.bf16.msra.mxu0 %v1166_v9  ;;  %804 = vmatpush1.bf16.msra.mxu1 %v1166_v9 }
  0x70   :  { %644 = vmatprep.subr.bf16.mxu0 %v1171_v10  ;;  %805 = vmatprep.subr.bf16.mxu1 %v1171_v10 }
  0x73   :  { %645 = vmatpush1.bf16.msra.mxu0 %v1169_v11  ;;  %806 = vmatpush1.bf16.msra.mxu1 %v1169_v11 }
  0x74   :  { %646 = vmatprep.subr.bf16.mxu0 %v1174_v13  ;;  %807 = vmatprep.subr.bf16.mxu1 %v1174_v13 }
  0x77   :  { %647 = vmatpush1.bf16.msra.mxu0 %v1172_v14  ;;  %808 = vmatpush1.bf16.msra.mxu1 %v1172_v14 }
  0x78   :  { %648 = vmatprep.subr.bf16.mxu0 %v1177_v15  ;;  %809 = vmatprep.subr.bf16.mxu1 %v1177_v15 }
  0x7b   :  { %649 = vmatpush1.bf16.msra.mxu0 %v1175_v17  ;;  %810 = vmatpush1.bf16.msra.mxu1 %v1175_v17 }
  0x7c   :  { %650 = vmatprep.subr.bf16.mxu0 %v1180_v18  ;;  %811 = vmatprep.subr.bf16.mxu1 %v1180_v18 }
  0x7f   :  { %651 = vmatpush1.bf16.msra.mxu0 %v1178_v19  ;;  %812 = vmatpush1.bf16.msra.mxu1 %v1178_v19 }
  0x80   :  { %661 = vmatprep.subr.bf16.mxu0 %v1183_v20  ;;  %822 = vmatprep.subr.bf16.mxu1 %v1183_v20 }
  0x82   :  { %653 = vmatmul.mubr.bf16.vlgmr.msra.gmra.mrb[0].mxu0 %v1369_v47  ;;  %814 = vmatmul.mubr.bf16.vlgmr.msra.gmra.mrb[0].mxu1 %v1372_v48  ;;  %v109_v47 = vld [vmem:[%s1601_s2] sm:$0x3]  ;;  %v119_v48 = vsub.s32 1, %v1265_v12 }
  0x83   :  { %662 = vmatpush1.bf16.msra.mxu0 %v1181_v23  ;;  %823 = vmatpush1.bf16.msra.mxu1 %v1181_v23  ;;  %v116_v49 = vrot.slane %v109_v47, %v115_v46 }
  0x84   :  { %663 = vmatprep.subr.bf16.mxu0 %v1186_v24  ;;  %824 = vmatprep.subr.bf16.mxu1 %v1186_v24  ;;  %v120_v50 = vrot.slane %v109_v47, %v119_v48 }
  0x85   :  { %1055 = vmatprep.mubr.msk.bf16.mxu0 %vm575_vm0, %v149_v25  ;;  %1059 = vmatprep.mubr.msk.bf16.mxu1 %vm575_vm0, %v731_v26 }
  0x87   :  { %664 = vmatpush1.bf16.msra.mxu0 %v1184_v27  ;;  %825 = vmatpush1.bf16.msra.mxu1 %v1184_v27 }
  0x88   :  { %665 = vmatprep.subr.bf16.mxu0 %v1189_v28  ;;  %826 = vmatprep.subr.bf16.mxu1 %v1189_v28 }
  0x8b   :  { %666 = vmatpush1.bf16.msra.mxu0 %v1187_v29  ;;  %827 = vmatpush1.bf16.msra.mxu1 %v1187_v29 }
  0x8c   :  { %667 = vmatprep.subr.bf16.mxu0 %v1192_v30  ;;  %828 = vmatprep.subr.bf16.mxu1 %v1192_v30 }
  0x8f   :  { %668 = vmatpush1.bf16.msra.mxu0 %v1190_v31  ;;  %829 = vmatpush1.bf16.msra.mxu1 %v1190_v31 }
  0x90   :  { %669 = vmatprep.subr.bf16.mxu0 %v1195_v32  ;;  %830 = vmatprep.subr.bf16.mxu1 %v1195_v32 }
  0x93   :  { %670 = vmatpush1.bf16.msra.mxu0 %v1193_v33  ;;  %831 = vmatpush1.bf16.msra.mxu1 %v1193_v33 }
  0x94   :  { %671 = vmatprep.subr.bf16.mxu0 %v1198_v34  ;;  %832 = vmatprep.subr.bf16.mxu1 %v1198_v34 }
  0x97   :  { %672 = vmatpush1.bf16.msra.mxu0 %v1196_v35  ;;  %833 = vmatpush1.bf16.msra.mxu1 %v1196_v35 }
  0x98   :  { %673 = vmatprep.subr.bf16.mxu0 %v1201_v36  ;;  %834 = vmatprep.subr.bf16.mxu1 %v1201_v36 }
  0x9b   :  { %674 = vmatpush1.bf16.msra.mxu0 %v1199_v37  ;;  %835 = vmatpush1.bf16.msra.mxu1 %v1199_v37 }
  0x9c   :  { %675 = vmatprep.subr.bf16.mxu0 %v1204_v38  ;;  %836 = vmatprep.subr.bf16.mxu1 %v1204_v38 }
  0x9f   :  { %676 = vmatpush1.bf16.msra.mxu0 %v1202_v39  ;;  %837 = vmatpush1.bf16.msra.mxu1 %v1202_v39 }
  0xa0   :  { %677 = vmatprep.subr.bf16.mxu0 %v1207_v40  ;;  %838 = vmatprep.subr.bf16.mxu1 %v1207_v40 }
  0xa3   :  { %678 = vmatpush1.bf16.msra.mxu0 %v1205_v41  ;;  %839 = vmatpush1.bf16.msra.mxu1 %v1205_v41 }
  0xa4   :  { %679 = vmatprep.subr.bf16.mxu0 %v1210_v42  ;;  %840 = vmatprep.subr.bf16.mxu1 %v1210_v42 }
  0xa7   :  { %680 = vmatpush1.bf16.msra.mxu0 %v1208_v43  ;;  %841 = vmatpush1.bf16.msra.mxu1 %v1208_v43 }
  0xaa   :  { %694 = vmatmul.mubr.bf16.vlgmr.msra.gmra.mrb[0].mxu0 %v1479_v21  ;;  %855 = vmatmul.mubr.bf16.vlgmr.msra.gmra.mrb[0].mxu1 %v1484_v22 }
 0x17d   :  { %v695_v51 = vpop.f32.mrb[0].mxu0  ;;  %v856_v52 = vpop.f32.mrb[0].mxu1 }
 0x17e   :  { %v1061_v53 = vadd.f32 %v695_v51, %v116_v49  ;;  %v1063_v54 = vadd.f32 %v856_v52, %v116_v49  ;;  %v697_v55 = vpop.f32.mrb[1].mxu0  ;;  %v858_v56 = vpop.f32.mrb[1].mxu1 }
 0x17f   :  { %v1062_v57 = vadd.f32 %v697_v55, %v120_v50  ;;  %v1064_v58 = vadd.f32 %v858_v56, %v120_v50  ;;  %v699_v59 = vpop.f32.mrb[2].mxu0  ;;  %v860_v60 = vpop.f32.mrb[2].mxu1 }
 0x180   :  { %v877_v61 = vsel %vm867_vm4, %v1061_v53, 0.0  ;;  %v908_v62 = vmul.f32 %v1061_v53, %v1061_v53  ;;  %v892_v12 = vsel %vm867_vm4, %v1063_v54, 0.0  ;;  %v924_v63 = vmul.f32 %v1063_v54, %v1063_v54  ;;  %v700_v1 = vpop.f32.mrb[3].mxu0  ;;  %v861_v2 = vpop.f32.mrb[3].mxu1 }
 0x181   :  { %v878_v3 = vrot.slane %v877_v61, 4  ;;  %v893_v4 = vrot.slane %v892_v12, 4  ;;  %v865_v5 = vcombine.low %v1061_v53, %v1062_v57  ;;  %v885_v6 = vsel %vm884_vm6, %v1062_v57, 0.0 }
 0x182   :  { %v910_v7 = vsel %vm867_vm4, %v908_v62, 0.0  ;;  %v926_v8 = vsel %vm867_vm4, %v924_v63, 0.0  ;;  %v886_v9 = vrot.slane %v885_v6, 4  ;;  %v909_v10 = vmul.f32 %v1062_v57, %v1062_v57 }
 0x183   :  { %v879_v11 = vadd.f32 %v878_v3, %v877_v61  ;;  %v911_v13 = vrot.slane %v910_v7, 4  ;;  %v894_v14 = vadd.f32 %v893_v4, %v892_v12  ;;  %v927_v15 = vrot.slane %v926_v8, 4  ;;  %870 = vst.msk [vmem:[%s1602_s3] sm:$0xff] %vm1569_vm7, %v865_v5 }
 0x184   :  { %v887_v17 = vadd.f32 %v886_v9, %v885_v6  ;;  %v917_v18 = vsel %vm884_vm6, %v909_v10, 0.0  ;;  %v873_v19 = vcombine.low %v1063_v54, %v1064_v58  ;;  %v899_v20 = vsel %vm884_vm6, %v1064_v58, 0.0  ;;  %v942_v6 = vld [vmem:[%s1600_s4] sm:$0xf] }
 0x185   :  { %v880_v21 = vrot.slane %v879_v11, 2  ;;  %v912_v22 = vadd.f32 %v911_v13, %v910_v7  ;;  %v895_v23 = vrot.slane %v894_v14, 2  ;;  %v928_v24 = vadd.f32 %v927_v15, %v926_v8 }
 0x186   :  { %v888_v25 = vrot.slane %v887_v17, 2  ;;  %v918_v26 = vrot.slane %v917_v18, 4  ;;  %1060 = vst.msk [vmem:[%s1602_s3 + $0x8] sm:$0xff] %vm1569_vm7, %v873_v19  ;;  %v900_v27 = vrot.slane %v899_v20, 4  ;;  %v925_v28 = vmul.f32 %v1064_v58, %v1064_v58 }
 0x187   :  { %v881_v29 = vadd.f32 %v880_v21, %v879_v11  ;;  %v913_v30 = vrot.slane %v912_v22, 2  ;;  %v896_v31 = vadd.f32 %v895_v23, %v894_v14  ;;  %v929_v32 = vrot.slane %v928_v24, 2 }
 0x188   :  { %v889_v33 = vadd.f32 %v888_v25, %v887_v17  ;;  %v919_v34 = vadd.f32 %v918_v26, %v917_v18  ;;  %v901_v35 = vadd.f32 %v900_v27, %v899_v20  ;;  %v933_v36 = vsel %vm884_vm6, %v925_v28, 0.0 }
 0x189   :  { %v882_v37 = vrot.slane %v881_v29, 1  ;;  %v914_v38 = vadd.f32 %v913_v30, %v912_v22  ;;  %v897_v39 = vrot.slane %v896_v31, 1  ;;  %v930_v40 = vadd.f32 %v929_v32, %v928_v24 }
 0x18a   :  { %v890_v41 = vrot.slane %v889_v33, 1  ;;  %v920_v42 = vrot.slane %v919_v34, 2  ;;  %v902_v43 = vrot.slane %v901_v35, 2  ;;  %v934_v45 = vrot.slane %v933_v36, 4 }
 0x18b   :  { %v883_v46 = vadd.f32 %v882_v37, %v881_v29  ;;  %v915_v47 = vrot.slane %v914_v38, 1  ;;  %v898_v48 = vadd.f32 %v897_v39, %v896_v31  ;;  %v931_v49 = vrot.slane %v930_v40, 1 }
 0x18c   :  { %v921_v50 = vadd.f32 %v920_v42, %v919_v34  ;;  %v903_v51 = vadd.f32 %v902_v43, %v901_v35  ;;  %v935_v52 = vadd.f32 %v934_v45, %v933_v36  ;;  %v891_v56 = vadd.f32 %v890_v41, %v889_v33 }
 0x18d   :  { %v916_v53 = vadd.f32 %v915_v47, %v914_v38  ;;  %v906_v54 = vadd.f32 %v898_v48, %v883_v46  ;;  %v932_v55 = vadd.f32 %v931_v49, %v930_v40 }
 0x18e   :  { %v922_v57 = vrot.slane %v921_v50, 1  ;;  %v904_v58 = vrot.slane %v903_v51, 1  ;;  %v936_v59 = vrot.slane %v935_v52, 2 }
 0x18f   :  { %v940_v60 = vadd.f32 %v932_v55, %v916_v53 }
 0x190   :  { %v905_v61 = vadd.f32 %v904_v58, %v903_v51  ;;  %v937_v62 = vadd.f32 %v936_v59, %v935_v52  ;;  %v923_v63 = vadd.f32 %v922_v57, %v921_v50 }
 0x191   :  { %v944_v12 = vsel %vm943_vm8, %v906_v54, %v940_v60 }
 0x192   :  { %v907_v0 = vadd.f32 %v905_v61, %v891_v56  ;;  %v938_v1 = vrot.slane %v937_v62, 1 }
 0x194   :  { %v939_v2 = vadd.f32 %v938_v1, %v937_v62 }
 0x196   :  { %v941_v3 = vadd.f32 %v939_v2, %v923_v63 }
 0x198   :  { %v945_v4 = vsel %vm943_vm8, %v907_v0, %v941_v3 }
 0x199   :  { %v948_v5 = vcombine.low %v944_v12, %v945_v4 }
 0x19b   :  { %v955_v7 = vrot.slane %v948_v5, %v1274_v16 }
 0x19d   :  { %v957_v8 = vadd.f32 %v955_v7, %v942_v6 }
 0x19f   :  { %961 = vst.msk [vmem:[%s1600_s4] sm:$0xf] %vm1551_vm3, %v957_v8 }

// kernel: encoder_forward.19
= control target key start
LH: loop header
LB: loop body
LE: loop exit
PB: predicated region body
PF: predicated region fallthrough
CT: control target
= control target key end

     0   :  { %12 = vsyncpa [#allocation3], 0  ;;  %v368_v1 = vmov 0   ;;  %vm137_vm0 = vcmask 523264   ;;  %s369_s9 = smov 8   ;;  %s499_s0 = inlined_call_operand.vmem [shape: bf16[4,192], index: 0, kind: input, shape index: {}]   ;;  %s500_s1 = inlined_call_operand.vmem [shape: bf16[192,16], index: 1, kind: input, shape index: {}]   ;;  %s501_s2 = inlined_call_operand.vmem [shape: f32[1,16], index: 2, kind: input, shape index: {}]   ;;  %s502_s3 = inlined_call_operand.vmem [shape: f32[4,8], index: 3, kind: input, shape index: {}]   ;;  %s503_s4 = inlined_call_operand.hbm [shape: f32[4,8], index: 4, kind: output, shape index: {0}]   ;;  %s504_s5 = inlined_call_operand.hbm [shape: f32[4,8], index: 5, kind: output, shape index: {1}]   ;;  %s505_s6 = inlined_call_operand.hbm [shape: f32[4,8], index: 6, kind: output, shape index: {2}]  }
   0x1   :  { %v280_v0 = vld [vmem:[%s500_s1] sm:$0xff]   ;;  %141 = vmatprep.subr.bf16.mxu0 %v368_v1  ;;  %v281_v2 = vld [vmem:[%s500_s1 + $0x8] sm:$0xff]   ;;  %v282_v3 = vld [vmem:[%s500_s1 + $0x10] sm:$0xff]  }
   0x2   :  { %142 = vmatpush1.bf16.msra.mxu0 %v280_v0  ;;  %v283_v4 = vld [vmem:[%s500_s1 + $0x18] sm:$0xff]   ;;  %v260_v5 = vld.sshfl [vmem:[%s499_s0] sm:$0x33 pattern:$0x76325410] }
   0x3   :  { %143 = vmatprep.subr.bf16.mxu0 %v368_v1  ;;  %v199_v6 = vld [vmem:[%s502_s3] sm:$0xf]  ;;  %v63_v7 = vcombine.high %v260_v5, %v260_v5 }
   0x4   :  { %201 = vrot.lane.b32.xlu0 %v199_v6, %s369_s9 }
   0x6   :  { %144 = vmatpush1.bf16.msra.mxu0 %v281_v2 }
   0x7   :  { %145 = vmatprep.subr.bf16.mxu0 %v368_v1 }
   0xa   :  { %146 = vmatpush1.bf16.msra.mxu0 %v282_v3 }
   0xb   :  { %147 = vmatprep.subr.bf16.mxu0 %v368_v1 }
   0xc   :  { %13 = vsyncpa [#allocation5], 0  ;;  %v284_v8 = vld [vmem:[%s500_s1 + $0x20] sm:$0xff]   ;;  %273 = vmatprep.mubr.msk.bf16.mxu0 %vm137_vm0, %v63_v7  ;;  %v285_v9 = vld [vmem:[%s500_s1 + $0x28] sm:$0xff]   ;;  %vm210_vm1 = vcmask 60416  }
   0xd   :  { %v286_v10 = vld [vmem:[%s500_s1 + $0x30] sm:$0xff]   ;;  %v287_v11 = vld [vmem:[%s500_s1 + $0x38] sm:$0xff]   ;;  %v288_v12 = vld [vmem:[%s500_s1 + $0x40] sm:$0xff]  }
   0xe   :  { %148 = vmatpush1.bf16.msra.mxu0 %v283_v4  ;;  %v289_v13 = vld [vmem:[%s500_s1 + $0x48] sm:$0xff]   ;;  %v290_v14 = vld [vmem:[%s500_s1 + $0x50] sm:$0xff]   ;;  %v291_v15 = vld [vmem:[%s500_s1 + $0x58] sm:$0xff]   ;;  %s370_s1 = smov 120  }
   0xf   :  { %149 = vmatprep.subr.bf16.mxu0 %v368_v1  ;;  %v259_v16 = vld [vmem:[%s501_s2] ss:$0 sm:$0xff]  ;;  %s371_s2 = smov [#allocation4]  }
  0x10   :  { %s234_s26 = sshll.u32 %s371_s2, 4  ;;  %s235_s26 = int_to_ptr.vmem [resolvable:$true] %s234_s26 }
  0x11   :  { %s298_s27 = scalar_lea.vmem %s235_s26, 64  ;;  %p303_p1 = scmp.lt.s32.totalorder %s235_s26, %s235_s26 }
  0x12   :  { %150 = vmatpush1.bf16.msra.mxu0 %v284_v8  ;;  %p299_p0 = scmp.ne.s32.totalorder %s235_s26, %s298_s27  ;;  %p304_p2 = scmp.lt.s32.totalorder %s298_s27, %s298_s27 }
  0x13   :  { %151 = vmatprep.subr.bf16.mxu0 %v368_v1 }
  0x14   :  { %p305_p3 = por %p304_p2, %p303_p1 }
  0x16   :  { %152 = vmatpush1.bf16.msra.mxu0 %v285_v9  ;;  %p306_p4 = pnand %p305_p3, %p299_p0 }
  0x17   :  { %153 = vmatprep.subr.bf16.mxu0 %v368_v1 }
  0x1a   :  { %154 = vmatpush1.bf16.msra.mxu0 %v286_v10 }
  0x1b   :  { %155 = vmatprep.subr.bf16.mxu0 %v368_v1 }
  0x1e   :  { %156 = vmatpush1.bf16.msra.mxu0 %v287_v11 }
  0x1f   :  { %157 = vmatprep.subr.bf16.mxu0 %v368_v1 }
  0x22   :  { %158 = vmatpush1.bf16.msra.mxu0 %v288_v12 }
  0x23   :  { %159 = vmatprep.subr.bf16.mxu0 %v368_v1 }
  0x26   :  { %160 = vmatpush1.bf16.msra.mxu0 %v289_v13 }
  0x27   :  { %161 = vmatprep.subr.bf16.mxu0 %v368_v1 }
  0x2a   :  { %162 = vmatpush1.bf16.msra.mxu0 %v290_v14 }
  0x2b   :  { %163 = vmatprep.subr.bf16.mxu0 %v368_v1 }
  0x2e   :  { %164 = vmatpush1.bf16.msra.mxu0 %v291_v15 }
  0x31   :  { %174 = vmatmul.mubr.bf16.vlgmr.msra.gmra.mrb[0].mxu0 %v260_v5 }
 0x104   :  { %v175_v17 = vpop.f32.mrb[0].mxu0 }
 0x105   :  { %v454_v18 = vadd.f32 %v259_v16, %v175_v17  ;;  %v177_v19 = vpop.f32.mrb[1].mxu0 }
 0x106   :  { %v178_v20 = vpop.f32.mrb[2].mxu0 }
 0x107   :  { %v182_v21 = vand.u32 2147483647, %v454_v18  ;;  %v179_v22 = vpop.f32.mrb[3].mxu0  ;;  %212 = vst.msk [vmem:[#allocation4] sm:$0xf] %vm210_vm1, %v454_v18  ;;  %v181_v33 = vmax.f32 %v454_v18, 0.0 }
 0x109   :  { %v183_v23 = vsub.f32 0.0, %v182_v21 }
 0x10b   :  { %v184_v24 = vmul.f32 1.442695, %v183_v23 }
 0x10d   :  { %292 = vpow2.f32 %v184_v24 }
 0x117   :  { %v293_v25 = vpop.eup %292 }
 0x118   :  { %v186_v26 = vadd.f32 1.0, %v293_v25  ;;  %v189_v27 = vmul.f32 -0.5, %v293_v25  ;;  %v192_v29 = vand.u32 2147483647, %v293_v25 }
 0x11a   :  { %294 = vlog2.f32 %v186_v26  ;;  %v190_v28 = vadd.f32 1.0, %v189_v27  ;;  %vm193_vm2 = vcmp.lt.f32.partialorder %v192_v29, 0.0004427343 }
 0x11c   :  { %v191_v32 = vmul.f32 %v293_v25, %v190_v28 }
 0x124   :  { %v295_v30 = vpop.eup %294 }
 0x125   :  { %v188_v31 = vmul.f32 0.6931472, %v295_v30 }
 0x127   :  { %v194_v34 = vsel %vm193_vm2, %v191_v32, %v188_v31 }
 0x128   :  { %v195_v35 = vadd.f32 %v194_v34, %v181_v33 }
 0x12a   :  { %214 = vrot.lane.b32.xlu1 %v195_v35, %s370_s1  ;;  %v196_v36 = vmul.f32 0.5, %v195_v35 }
 0x12c   :  { %v197_v37 = vmul.f32 1.442695, %v196_v36 }
 0x12e   :  { %296 = vpow2.f32 %v197_v37 }
 0x12f   :  { %309 = shalt.err (!%p306_p4)
}
 0x130   :  { %s310_s30 = scalar_lea.hbm %s504_s5, 64 }
 0x131   :  { %p311_p5 = scmp.ne.s32.totalorder %s504_s5, %s310_s30  ;;  %p314_p6 = scmp.lt.u32.totalorder %s310_s30, %s504_s5 }
 0x133   :  { %p316_p7 = pnand %p314_p6, %p311_p5 }
 0x135   :  { %319 = shalt.err (!%p316_p7)
}
 0x136   :  { %237 = dma.vmem_to_hbm [thread:$0]  %s235_s26, 64, %s504_s5, [#allocation5]   ;;  %v202_v38 = vpop.permute.xlu0 %201 }
 0x137   :  { %s372_s13 = smov [#allocation6]  }
 0x138   :  { %v297_v39 = vpop.eup %296  ;;  %s244_s0 = sshll.u32 %s372_s13, 4  ;;  %s245_s0 = int_to_ptr.vmem [resolvable:$true] %s244_s0 }
 0x139   :  { %v204_v40 = vmul.f32 %v297_v39, %v202_v38  ;;  %s320_s3 = scalar_lea.vmem %s245_s0, 64  ;;  %p325_p9 = scmp.lt.s32.totalorder %s245_s0, %s245_s0 }
 0x13a   :  { %p321_p8 = scmp.ne.s32.totalorder %s245_s0, %s320_s3  ;;  %p326_p10 = scmp.lt.s32.totalorder %s320_s3, %s320_s3 }
 0x13b   :  { %206 = vrot.lane.b32.xlu0 %v204_v40, %s370_s1 }
 0x13c   :  { %p327_p11 = por %p326_p10, %p325_p9 }
 0x13e   :  { %p328_p12 = pnand %p327_p11, %p321_p8 }
 0x19c   :  { %v215_v41 = vpop.permute.xlu1 %214 }
 0x19d   :  { %217 = vst.msk [vmem:[#allocation6] sm:$0xf] %vm210_vm1, %v215_v41 }
 0x19e   :  { %331 = shalt.err (!%p328_p12)
}
 0x19f   :  { %s332_s5 = scalar_lea.hbm %s505_s6, 64 }
 0x1a0   :  { %p333_p13 = scmp.ne.s32.totalorder %s505_s6, %s332_s5  ;;  %p336_p0 = scmp.lt.u32.totalorder %s332_s5, %s505_s6 }
 0x1a2   :  { %p338_p1 = pnand %p336_p0, %p333_p13 }
 0x1a4   :  { %341 = shalt.err (!%p338_p1)
}
 0x1a5   :  { %247 = dma.vmem_to_hbm [thread:$0]  %s245_s0, 64, %s505_s6, [#allocation5]  }
 0x1a6   :  { %s373_s22 = smov [#allocation2]  }
 0x1a7   :  { %s224_s23 = sshll.u32 %s373_s22, 4  ;;  %s225_s23 = int_to_ptr.vmem [resolvable:$true] %s224_s23 }
 0x1a8   :  { %s342_s24 = scalar_lea.vmem %s225_s23, 64  ;;  %p347_p3 = scmp.lt.s32.totalorder %s225_s23, %s225_s23 }
 0x1a9   :  { %p343_p2 = scmp.ne.s32.totalorder %s225_s23, %s342_s24  ;;  %p348_p4 = scmp.lt.s32.totalorder %s342_s24, %s342_s24 }
 0x1ab   :  { %p349_p5 = por %p348_p4, %p347_p3 }
 0x1ad   :  { %v207_v42 = vpop.permute.xlu0 %206  ;;  %p350_p6 = pnand %p349_p5, %p343_p2 }
 0x1ae   :  { %v209_v43 = vadd.f32 %v207_v42, %v454_v18 }
 0x1b0   :  { %211 = vst.msk [vmem:[#allocation2] sm:$0xf] %vm210_vm1, %v209_v43 }
 0x1b1   :  { %353 = shalt.err (!%p350_p6)
}
 0x1b2   :  { %s354_s2 = scalar_lea.hbm %s503_s4, 64 }
 0x1b3   :  { %p355_p7 = scmp.ne.s32.totalorder %s503_s4, %s354_s2  ;;  %p358_p8 = scmp.lt.u32.totalorder %s354_s2, %s503_s4 }
 0x1b5   :  { %p360_p9 = pnand %p358_p8, %p355_p7 }
 0x1b7   :  { %363 = shalt.err (!%p360_p9)
}
 0x1b8   :  { %227 = dma.vmem_to_hbm [thread:$0]  %s225_s23, 64, %s503_s4, [#allocation3]  }
 0x1b9   :  { %364 = dma.done.wait [#allocation3], 64  }
 0x1ba   :  { %365 = vsyncadd [#allocation3], 4294967232 }
 0x1bb   :  { %366 = dma.done.wait [#allocation5], 128  }
 0x1bc   :  { %367 = vsyncadd [#allocation5], 4294967168 }
 0x1bd   :  { %257 = vsyncpa [#allocation3], 1 }
 0x1be   :  { %258 = vsyncpa [#allocation5], 1 }

</bundles_post_ra>
